<compile_context>
chip_gen: v7x
topology: tpu7x:2x2x1
jax: 0.10.0
libtpu: 0.0.40
codegen_flags: <defaults>
</compile_context>

<pallas_src>
import math
import functools

import jax
import jax.numpy as jnp
from jax.experimental import pallas as pl
from jax.experimental.pallas import tpu as pltpu

EPS = 1e-12  # matches F.normalize default eps


def _decoder_kernel(x_ref, w_ref, label_ref, out_ref, *,
                    s, cos_m, sin_m, th, mm, easy_margin,
                    tile_n, n_classes, ragged):
    j = pl.program_id(0)

    x = x_ref[...].astype(jnp.float32)        # (B, D) raw input rows
    w = w_ref[...].astype(jnp.float32)        # (tile_n, D) raw class rows
    label = label_ref[...]                    # (B, 1) int32

    b, D = x.shape
    tn = w.shape[0]

    # ---- x L2-normalize in-kernel (EUP rsqrt; hidden under the W DMA). ----
    xsq = jnp.sum(x * x, axis=1, keepdims=True)             # (B, 1)
    xn = x * jax.lax.rsqrt(jnp.maximum(xsq, EPS * EPS))      # (B, D)

    # ---- per-class ||w||^2 via MXU reduction: ones(1,D) @ (W*W)^T --------
    # Result is lane-major (1, tile_n): broadcasts over the (B, tile_n)
    # cosine for free — W is never normalized elementwise.
    wsq = jax.lax.dot_general(
        jnp.ones((1, D), jnp.float32), w * w,
        dimension_numbers=(((1,), (1,)), ((), ())),
        preferred_element_type=jnp.float32)                  # (1, tile_n)

    # global class indices covered by this tile
    col_ids = j * tile_n + jax.lax.broadcasted_iota(jnp.int32, (b, tn), 1)

    if ragged:
        # Last tile reads past N: OOB VMEM contents are unspecified, so force
        # safe values BEFORE rsqrt/sqrt (avoids NaN/Inf in intermediates).
        valid1 = (j * tile_n
                  + jax.lax.broadcasted_iota(jnp.int32, (1, tn), 1)) < n_classes
        wsq = jnp.where(valid1, wsq, 1.0)

    # 1 / max(||w||, eps)  ==  rsqrt(max(||w||^2, eps^2))
    inv_w = jax.lax.rsqrt(jnp.maximum(wsq, EPS * EPS))       # (1, tile_n)

    # cosine = x_n @ W^T * inv_w : contract D directly (no explicit transpose)
    dots = jax.lax.dot_general(
        xn, w,
        dimension_numbers=(((1,), (1,)), ((), ())),
        preferred_element_type=jnp.float32)                  # (B, tile_n)
    cosine = dots * inv_w
    if ragged:
        cosine = jnp.where(col_ids < n_classes, cosine, 0.0)

    # ---- ArcFace margin math on the small (B, tile_n) result -------------
    sine = jnp.sqrt(jnp.clip(1.0 - cosine * cosine, 0.0, 1.0))
    phi = cosine * cos_m - sine * sin_m
    if easy_margin:
        phi = jnp.where(cosine > 0.0, phi, cosine)
    else:
        phi = jnp.where(cosine > th, phi, cosine - mm)

    # one-hot scatter along the class axis == (global column index == label)
    one_hot = (col_ids == label)                              # broadcast (B,1)

    out_ref[...] = (jnp.where(one_hot, phi, cosine) * s).astype(out_ref.dtype)


def _round_up(v, mult):
    return -(-v // mult) * mult


def decoder_forward(x, weight, label, *, s, m, easy_margin=False,
                    num_tiles=None, core_parallel=False,
                    w_tile_vmem_cap_bytes=8 << 20):
    """x: (B, D), weight: (N, D), label: (B,) int -> (B, N) f32.

    num_tiles=None     -> derive the class-axis tile count from a VMEM cap
                          (1 tile at typical face-ID sizes).
    core_parallel=True -> v7x: even tile count + CORE_PARALLEL so the class
                          axis is split across both TensorCores.
    """
    B, D = x.shape
    N, D2 = weight.shape
    assert D == D2

    cos_m = math.cos(m)
    sin_m = math.sin(m)
    th = math.cos(math.pi - m)
    mm = math.sin(math.pi - m) * m

    # --- batch padding to sublane granularity (8); padded labels never match.
    B_pad = _round_up(B, 8)
    xp = x if B_pad == B else jnp.pad(x, ((0, B_pad - B), (0, 0)))
    label2d = label.reshape(B, 1).astype(jnp.int32)
    if B_pad != B:
        label2d = jnp.pad(label2d, ((0, B_pad - B), (0, 0)), constant_values=-1)

    # --- class-axis tiling.  Keep the double-buffered W block under a VMEM
    # cap (8 MiB default: safe on v5e/v6e/v7x scoped limits) so the identical
    # kernel stays portable if N scales to 100K+ classes.
    itemsize = jnp.dtype(weight.dtype).itemsize
    max_tile_n = max(128, ((w_tile_vmem_cap_bytes // (2 * D * itemsize)) // 128) * 128)
    if num_tiles is None:
        n_tiles = max(1, pl.cdiv(N, max_tile_n))
    else:
        n_tiles = max(1, int(num_tiles))
    if core_parallel and n_tiles % 2 != 0:
        n_tiles += 1

    if n_tiles == 1:
        # Single full-array W block: no padding anywhere, no output re-slice
        # (when B is already a multiple of 8).
        tile_n, N_out, ragged = N, N, False
    else:
        tile_n = 128 * (-(-N // (n_tiles * 128)))   # lane-dense output tiles
        N_out = tile_n * n_tiles
        ragged = (N_out != N)                       # last tile masked in-kernel

    kernel = functools.partial(
        _decoder_kernel, s=float(s), cos_m=cos_m, sin_m=sin_m, th=th, mm=mm,
        easy_margin=easy_margin, tile_n=tile_n, n_classes=N, ragged=ragged)

    if core_parallel:
        semantics = (pltpu.CORE_PARALLEL,)
    else:
        semantics = ("arbitrary",) if n_tiles == 1 else ("parallel",)

    out = pl.pallas_call(
        kernel,
        out_shape=jax.ShapeDtypeStruct((B_pad, N_out), jnp.float32),
        grid_spec=pltpu.PrefetchScalarGridSpec(
            num_scalar_prefetch=0,
            grid=(n_tiles,),
            in_specs=[
                pl.BlockSpec((B_pad, D), lambda j: (0, 0)),     # x (resident; normalized in-kernel)
                pl.BlockSpec((tile_n, D), lambda j: (j, 0)),    # W tile, native dtype/layout
                pl.BlockSpec((B_pad, 1), lambda j: (0, 0)),     # label (resident)
            ],
            out_specs=pl.BlockSpec((B_pad, tile_n), lambda j: (0, j)),
        ),
        compiler_params=pltpu.CompilerParams(dimension_semantics=semantics),
    )(xp, weight, label2d)

    if B_pad != B or N_out != N:
        out = out[:B, :N]
    return out


def xavier_uniform(key, shape, dtype=jnp.float32):
    fan_out, fan_in = shape  # torch Linear-style weight (out, in)
    bound = math.sqrt(6.0 / (fan_in + fan_out))
    return jax.random.uniform(key, shape, dtype, minval=-bound, maxval=bound)


def decoder_reference(x, weight, label, *, s, m, easy_margin=False):
    """Pure-JAX reference mirroring the PyTorch forward, for sanity checking."""
    xn = x / jnp.maximum(jnp.linalg.norm(x, axis=1, keepdims=True), EPS)
    wn = weight / jnp.maximum(jnp.linalg.norm(weight, axis=1, keepdims=True), EPS)
    cosine = xn @ wn.T
    sine = jnp.sqrt(jnp.clip(1.0 - cosine ** 2, 0.0, 1.0))
    phi = cosine * math.cos(m) - sine * math.sin(m)
    if easy_margin:
        phi = jnp.where(cosine > 0, phi, cosine)
    else:
        th = math.cos(math.pi - m)
        mm = math.sin(math.pi - m) * m
        phi = jnp.where(cosine > th, phi, cosine - mm)
    one_hot = jax.nn.one_hot(label, cosine.shape[1], dtype=cosine.dtype)
    return (one_hot * phi + (1.0 - one_hot) * cosine) * s


if __name__ == "__main__":
    # Shapes consistent with the module: identity_nums = 2622 (module constant),
    # small batch and latent dim.
    B = 8
    latent_dim = 128
    identity_nums = 2622
    s, m = 30.0, 0.5

    key = jax.random.PRNGKey(0)
    kx, kw, kl = jax.random.split(key, 3)

    x = jax.random.normal(kx, (B, latent_dim), dtype=jnp.float32)
    weight = xavier_uniform(kw, (identity_nums, latent_dim))
    label = jax.random.randint(kl, (B,), 0, identity_nums, dtype=jnp.int32)

    for em in (False, True):
        ref = decoder_reference(x, weight, label, s=s, m=m, easy_margin=em)

        # Default path: single full-N W block, no HBM pad/cast round trip.
        out = jax.block_until_ready(
            decoder_forward(x, weight, label, s=s, m=m, easy_margin=em))
        assert out.shape == (B, identity_nums)
        assert jnp.allclose(out, ref, atol=2e-4, rtol=2e-4), \
            f"mismatch vs reference (easy_margin={em}, 1 tile)"

        # Tiled path (ragged last tile masked in-kernel) — the layout a v7x
        # run with core_parallel=True would use.
        out2 = jax.block_until_ready(
            decoder_forward(x, weight, label, s=s, m=m, easy_margin=em,
                            num_tiles=2))
        assert out2.shape == (B, identity_nums)
        assert jnp.allclose(out2, ref, atol=2e-4, rtol=2e-4), \
            f"mismatch vs reference (easy_margin={em}, 2 tiles)"

    print("KERNEL_OK")
</pallas_src>

<mosaic_0001>
module attributes {stable_mosaic.version = 11 : i64} {
  func.func @_decoder_kernel(%arg0: i32, %arg1: memref<8x128xf32, #tpu.memory_space<vmem>>, %arg2: memref<2622x128xf32, #tpu.memory_space<vmem>>, %arg3: memref<8x1xi32, #tpu.memory_space<vmem>>, %arg4: memref<8x2622xf32, #tpu.memory_space<vmem>>) attributes {dimension_semantics = [#tpu.dimension_semantics<arbitrary>], iteration_bounds = array<i64: 1>, scalar_prefetch = 0 : i64, scratch_operands = 0 : i64, tpu.core_type = #tpu.core_type<tc>, window_params = [{pipeline_mode = #tpu.pipeline_mode<synchronous>, transform_indices = @transform_0, window_bounds = array<i64: 8, 128>}, {transform_indices = @transform_1, window_bounds = array<i64: 2622, 128>}, {pipeline_mode = #tpu.pipeline_mode<synchronous>, transform_indices = @transform_2, window_bounds = array<i64: 8, 1>}, {transform_indices = @transform_3, window_bounds = array<i64: 8, 2622>}]} {
    %c0 = arith.constant 0 : index
    %c0_0 = arith.constant 0 : index
    %0 = vector.load %arg1[%c0, %c0_0] : memref<8x128xf32, #tpu.memory_space<vmem>>, vector<8x128xf32>
    %c0_1 = arith.constant 0 : index
    %c0_2 = arith.constant 0 : index
    %1 = vector.load %arg2[%c0_1, %c0_2] : memref<2622x128xf32, #tpu.memory_space<vmem>>, vector<2622x128xf32>
    %c0_3 = arith.constant 0 : index
    %c0_4 = arith.constant 0 : index
    %2 = vector.load %arg3[%c0_3, %c0_4] : memref<8x1xi32, #tpu.memory_space<vmem>>, vector<8x1xi32>
    %3 = arith.mulf %0, %0 : vector<8x128xf32>
    %cst = arith.constant dense<0.000000e+00> : vector<8xf32>
    %4 = vector.multi_reduction <add>, %3, %cst [1] : vector<8x128xf32> to vector<8xf32>
    %5 = vector.shape_cast %4 : vector<8xf32> to vector<8x1xf32>
    %cst_5 = arith.constant 1.000000e-24 : f32
    %6 = vector.broadcast %cst_5 : f32 to vector<8x1xf32>
    %7 = arith.maximumf %5, %6 : vector<8x1xf32>
    %8 = math.rsqrt %7 : vector<8x1xf32>
    %9 = vector.broadcast %8 : vector<8x1xf32> to vector<8x128xf32>
    %10 = arith.mulf %0, %9 : vector<8x128xf32>
    %cst_6 = arith.constant 1.000000e+00 : f32
    %11 = vector.broadcast %cst_6 : f32 to vector<1x128xf32>
    %12 = arith.mulf %1, %1 : vector<2622x128xf32>
    %cst_7 = arith.constant dense<0.000000e+00> : vector<1x2622xf32>
    %13 = tpu.matmul %11, %12, %cst_7 {dimension_numbers = #tpu.dot_dimension_numbers<[1], [1], [0], [0], [0, 0, 1, 0], [], []>} : vector<1x128xf32>, vector<2622x128xf32>, vector<1x2622xf32> -> vector<1x2622xf32>
    %c2622_i32 = arith.constant 2622 : i32
    %14 = arith.muli %arg0, %c2622_i32 : i32
    %15 = tpu.iota {dimensions = array<i32: 1>} : vector<8x2622xi32>
    %16 = vector.broadcast %14 : i32 to vector<8x2622xi32>
    %17 = arith.addi %16, %15 : vector<8x2622xi32>
    %cst_8 = arith.constant 1.000000e-24 : f32
    %18 = vector.broadcast %cst_8 : f32 to vector<1x2622xf32>
    %19 = arith.maximumf %13, %18 : vector<1x2622xf32>
    %20 = math.rsqrt %19 : vector<1x2622xf32>
    %cst_9 = arith.constant dense<0.000000e+00> : vector<8x2622xf32>
    %21 = tpu.matmul %10, %1, %cst_9 {dimension_numbers = #tpu.dot_dimension_numbers<[1], [1], [0], [0], [0, 0, 1, 0], [], []>} : vector<8x128xf32>, vector<2622x128xf32>, vector<8x2622xf32> -> vector<8x2622xf32>
    %22 = vector.broadcast %20 : vector<1x2622xf32> to vector<8x2622xf32>
    %23 = arith.mulf %21, %22 : vector<8x2622xf32>
    %24 = arith.mulf %23, %23 : vector<8x2622xf32>
    %cst_10 = arith.constant 1.000000e+00 : f32
    %25 = vector.broadcast %cst_10 : f32 to vector<8x2622xf32>
    %26 = arith.subf %25, %24 : vector<8x2622xf32>
    %cst_11 = arith.constant 0.000000e+00 : f32
    %cst_12 = arith.constant 1.000000e+00 : f32
    %27 = vector.broadcast %cst_11 : f32 to vector<8x2622xf32>
    %28 = arith.maximumf %27, %26 : vector<8x2622xf32>
    %29 = vector.broadcast %cst_12 : f32 to vector<8x2622xf32>
    %30 = arith.minimumf %29, %28 : vector<8x2622xf32>
    %31 = math.sqrt %30 : vector<8x2622xf32>
    %cst_13 = arith.constant 0.87758255 : f32
    %32 = vector.broadcast %cst_13 : f32 to vector<8x2622xf32>
    %33 = arith.mulf %23, %32 : vector<8x2622xf32>
    %cst_14 = arith.constant 0.47942555 : f32
    %34 = vector.broadcast %cst_14 : f32 to vector<8x2622xf32>
    %35 = arith.mulf %31, %34 : vector<8x2622xf32>
    %36 = arith.subf %33, %35 : vector<8x2622xf32>
    %cst_15 = arith.constant -0.87758255 : f32
    %37 = vector.broadcast %cst_15 : f32 to vector<8x2622xf32>
    %38 = arith.cmpf ogt, %23, %37 : vector<8x2622xf32>
    %cst_16 = arith.constant 0.239712775 : f32
    %39 = vector.broadcast %cst_16 : f32 to vector<8x2622xf32>
    %40 = arith.subf %23, %39 : vector<8x2622xf32>
    %41 = arith.select %38, %36, %40 : vector<8x2622xi1>, vector<8x2622xf32>
    %42 = vector.broadcast %2 : vector<8x1xi32> to vector<8x2622xi32>
    %43 = arith.cmpi eq, %17, %42 : vector<8x2622xi32>
    %44 = arith.select %43, %41, %23 : vector<8x2622xi1>, vector<8x2622xf32>
    %cst_17 = arith.constant 3.000000e+01 : f32
    %45 = vector.broadcast %cst_17 : f32 to vector<8x2622xf32>
    %46 = arith.mulf %44, %45 : vector<8x2622xf32>
    %c0_18 = arith.constant 0 : index
    %c0_19 = arith.constant 0 : index
    %47 = vector.load %arg4[%c0_18, %c0_19] : memref<8x2622xf32, #tpu.memory_space<vmem>>, vector<8x2622xf32>
    tpu.vector_store %arg4[%c0_18, %c0_19], %46 {strides = array<i32>} : memref<8x2622xf32, #tpu.memory_space<vmem>>, vector<8x2622xf32>,
    return
  }
  func.func @transform_0(%arg0: i32) -> (i32, i32) {
    %c0_i32 = arith.constant 0 : i32
    %c0_i32_0 = arith.constant 0 : i32
    %c0_i32_1 = arith.constant 0 : i32
    return %c0_i32, %c0_i32_0 : i32, i32
  }
  func.func @transform_1(%arg0: i32) -> (i32, i32) {
    %c0_i32 = arith.constant 0 : i32
    %c0_i32_0 = arith.constant 0 : i32
    return %arg0, %c0_i32 : i32, i32
  }
  func.func @transform_2(%arg0: i32) -> (i32, i32) {
    %c0_i32 = arith.constant 0 : i32
    %c0_i32_0 = arith.constant 0 : i32
    %c0_i32_1 = arith.constant 0 : i32
    return %c0_i32, %c0_i32_0 : i32, i32
  }
  func.func @transform_3(%arg0: i32) -> (i32, i32) {
    %c0_i32 = arith.constant 0 : i32
    %c0_i32_0 = arith.constant 0 : i32
    return %c0_i32, %arg0 : i32, i32
  }
}

</mosaic_0001>

<bundles_post_ra>
// kernel: tpu_custom_call.1
= control target key start
LH: loop header
LB: loop body
LE: loop exit
PB: predicated region body
PF: predicated region fallthrough
CT: control target
= control target key end

     0   :  { %8 = vsyncpa [#allocation3], 0  ;;  %s5333_s0 = inlined_call_operand.hbm [shape: f32[8,128], index: 0, kind: input, shape index: {}]   ;;  %s5334_s1 = inlined_call_operand.hbm [shape: f32[2622,128], index: 1, kind: input, shape index: {}]   ;;  %s5335_s2 = inlined_call_operand.vmem [shape: s32[8,1], index: 2, kind: input, shape index: {}]   ;;  %s5336_s3 = inlined_call_operand.hbm [shape: f32[8,2622], index: 3, kind: output, shape index: {}]  }
   0x1   :  { %9 = vsyncpa [#allocation6], 0 }
   0x2   :  { %10 = vsyncpa [#allocation4], 0  ;;  %s4796_s12 = smov [#allocation2]   ;;  %s4797_s14 = smov [#allocation5]  }
   0x3   :  { %s17_s13 = sshll.u32 %s4796_s12, 4  ;;  %s26_s15 = sshll.u32 %s4797_s14, 4  ;;  %s18_s13 = int_to_ptr.vmem [resolvable:$true] %s17_s13  ;;  %s4826_s15 = int_to_ptr.vmem [resolvable:$true] %s26_s15 }
   0x4   :  { %s4724_s18 = scalar_lea.hbm %s5333_s0, 128 }
   0x5   :  { %p4725_p0 = scmp.ne.s32.totalorder %s5333_s0, %s4724_s18  ;;  %p4728_p1 = scmp.lt.u32.totalorder %s4724_s18, %s5333_s0 }
   0x7   :  { %p4730_p2 = pnand %p4728_p1, %p4725_p0 }
   0x9   :  { %4733 = shalt.err (!%p4730_p2)
}
   0xa   :  { %s4734_s23 = scalar_lea.vmem %s18_s13, 128  ;;  %p4739_p4 = scmp.lt.s32.totalorder %s18_s13, %s18_s13 }
   0xb   :  { %p4735_p3 = scmp.ne.s32.totalorder %s18_s13, %s4734_s23  ;;  %p4740_p5 = scmp.lt.s32.totalorder %s4734_s23, %s4734_s23 }
   0xd   :  { %p4741_p6 = por %p4740_p5, %p4739_p4 }
   0xf   :  { %p4742_p7 = pnand %p4741_p6, %p4735_p3 }
  0x11   :  { %4745 = shalt.err (!%p4742_p7)
}
  0x12   :  { %20 = dma.hbm_to_vmem [thread:$0]  %s5333_s0, 128, %s18_s13, [#allocation3]  }
  0x13   :  { %s4746_s28 = scalar_lea.hbm %s5334_s1, 41984 }
  0x14   :  { %p4747_p8 = scmp.ne.s32.totalorder %s5334_s1, %s4746_s28  ;;  %p4750_p9 = scmp.lt.u32.totalorder %s4746_s28, %s5334_s1 }
  0x16   :  { %p4752_p10 = pnand %p4750_p9, %p4747_p8 }
  0x18   :  { %4755 = shalt.err (!%p4752_p10)
}
  0x19   :  { %s4756_s6 = scalar_lea.vmem %s4826_s15, 41984  ;;  %p4761_p12 = scmp.lt.s32.totalorder %s4826_s15, %s4826_s15 }
  0x1a   :  { %p4757_p11 = scmp.ne.s32.totalorder %s4826_s15, %s4756_s6  ;;  %p4762_p13 = scmp.lt.s32.totalorder %s4756_s6, %s4756_s6 }
  0x1c   :  { %p4763_p0 = por %p4762_p13, %p4761_p12 }
  0x1e   :  { %p4764_p1 = pnand %p4763_p0, %p4757_p11 }
  0x20   :  { %4767 = shalt.err (!%p4764_p1)
}
  0x21   :  { %s4798_s0 = smov 128   ;;  %s4799_s7 = smov 8  }
  0x22   :  { %32 = dma.hbm_to_vmem [thread:$0]  %s5334_s1, 41984, %s4826_s15, [#allocation6], %s4798_s0, %s4798_s0, %s4799_s7  }
  0x23   :  { %4790 = dma.done.wait [#allocation3], 128  }
  0x24   :  { %4791 = vsyncadd [#allocation3], 4294967168 }
  0x25   :  { %4792 = dma.done.wait [#allocation6], 41984  }
  0x26   :  { %4793 = vsyncadd [#allocation6], 4294925312  ;;  %v5340_v0 = vmov 1.0   ;;  %v58_v1 = vld [vmem:[#allocation5 + $0x80] sm:$0xff]  ;;  %v59_v2 = vld [vmem:[#allocation5 + $0x88] sm:$0xff]  ;;  %vm4802_vm0 = vmmov 0  }
  0x27   :  { %2971 = vmatprep.mubr.f32.mxu0 %v5340_v0  ;;  %3005 = vmatprep.mubr.f32.mxu1 %v5340_v0  ;;  %v90_v3 = vld [vmem:[#allocation5 + $0x180] sm:$0xff]  ;;  %v393_v4 = vmul.f32 %v58_v1, %v58_v1  ;;  %v394_v5 = vmul.f32 %v59_v2, %v59_v2  ;;  %v91_v6 = vld [vmem:[#allocation5 + $0x188] sm:$0xff]  ;;  %v60_v16 = vld [vmem:[#allocation5 + $0x90] sm:$0xff] }
  0x28   :  { %v425_v7 = vmul.f32 %v90_v3, %v90_v3  ;;  %v4859_v8 = vld [vmem:[#allocation5] sm:$0xff]  ;;  %v4861_v9 = vld [vmem:[#allocation5 + $0x8] sm:$0xff]  ;;  %v426_v10 = vmul.f32 %v91_v6, %v91_v6  ;;  %v61_v21 = vld [vmem:[#allocation5 + $0x98] sm:$0xff]  ;;  %v395_v26 = vmul.f32 %v60_v16, %v60_v16 }
  0x29   :  { %v377_v11 = vmul.f32 %v4859_v8, %v4859_v8  ;;  %v378_v12 = vmul.f32 %v4861_v9, %v4861_v9  ;;  %v4009_v13 = vpack.c.bf16 %v4861_v9, %v4859_v8  ;;  %v4869_v14 = vld [vmem:[#allocation5 + $0x100] sm:$0xff]  ;;  %v4871_v15 = vld [vmem:[#allocation5 + $0x108] sm:$0xff]  ;;  %v3675_v17 = vpack.c.bf16 %v394_v5, %v393_v4  ;;  %v92_v22 = vld [vmem:[#allocation5 + $0x190] sm:$0xff] }
  0x2a   :  { %v409_v18 = vmul.f32 %v4869_v14, %v4869_v14  ;;  %v410_v19 = vmul.f32 %v4871_v15, %v4871_v15  ;;  %v93_v23 = vld [vmem:[#allocation5 + $0x198] sm:$0xff]  ;;  %v3707_v24 = vpack.c.bf16 %v426_v10, %v425_v7  ;;  %v396_v27 = vmul.f32 %v61_v21, %v61_v21  ;;  %v44_v28 = vld [vmem:[#allocation5 + $0x10] sm:$0xff]  ;;  %v62_v36 = vld [vmem:[#allocation5 + $0xa0] sm:$0xff] }
  0x2b   :  { %v3677_v25 = vpack.c.bf16 %v378_v12, %v377_v11  ;;  %v45_v29 = vld [vmem:[#allocation5 + $0x18] sm:$0xff]  ;;  %v76_v30 = vld [vmem:[#allocation5 + $0x110] sm:$0xff]  ;;  %3676 = vmatprep.subr.bf16.mxu0 %v3675_v17  ;;  %v427_v32 = vmul.f32 %v92_v22, %v92_v22  ;;  %v428_v33 = vmul.f32 %v93_v23, %v93_v23  ;;  %v379_v34 = vmul.f32 %v44_v28, %v44_v28  ;;  %v63_v37 = vld [vmem:[#allocation5 + $0xa8] sm:$0xff] }
  0x2c   :  { %v3709_v31 = vpack.c.bf16 %v410_v19, %v409_v18  ;;  %v77_v35 = vld [vmem:[#allocation5 + $0x118] sm:$0xff]  ;;  %3708 = vmatprep.subr.bf16.mxu1 %v3707_v24  ;;  %v3679_v38 = vpack.c.bf16 %v396_v27, %v395_v26  ;;  %v380_v39 = vmul.f32 %v45_v29, %v45_v29  ;;  %v411_v40 = vmul.f32 %v76_v30, %v76_v30  ;;  %v94_v41 = vld [vmem:[#allocation5 + $0x1a0] sm:$0xff]  ;;  %v95_v42 = vld [vmem:[#allocation5 + $0x1a8] sm:$0xff] }
  0x2d   :  { %3678 = vmatpush3.bf16.xpose.msra.mxu0 %v3677_v25  ;;  %v3711_v43 = vpack.c.bf16 %v428_v33, %v427_v32  ;;  %v412_v44 = vmul.f32 %v77_v35, %v77_v35  ;;  %v397_v45 = vmul.f32 %v62_v36, %v62_v36  ;;  %v398_v46 = vmul.f32 %v63_v37, %v63_v37  ;;  %v46_v52 = vld [vmem:[#allocation5 + $0x20] sm:$0xff]  ;;  %v47_v53 = vld [vmem:[#allocation5 + $0x28] sm:$0xff]  ;;  %v64_v57 = vld [vmem:[#allocation5 + $0xb0] sm:$0xff] }
  0x2e   :  { %3710 = vmatpush3.bf16.xpose.msra.mxu1 %v3709_v31  ;;  %3680 = vmatprep.subr.bf16.mxu0 %v3679_v38  ;;  %v429_v47 = vmul.f32 %v94_v41, %v94_v41  ;;  %v430_v48 = vmul.f32 %v95_v42, %v95_v42  ;;  %v3681_v49 = vpack.c.bf16 %v380_v39, %v379_v34  ;;  %v78_v54 = vld [vmem:[#allocation5 + $0x120] sm:$0xff]  ;;  %v79_v56 = vld [vmem:[#allocation5 + $0x128] sm:$0xff]  ;;  %v65_v58 = vld [vmem:[#allocation5 + $0xb8] sm:$0xff] }
  0x2f   :  { %3712 = vmatprep.subr.bf16.mxu1 %v3711_v43  ;;  %v3713_v50 = vpack.c.bf16 %v412_v44, %v411_v40  ;;  %v3683_v51 = vpack.c.bf16 %v398_v46, %v397_v45  ;;  %v96_v59 = vld [vmem:[#allocation5 + $0x1b0] sm:$0xff]  ;;  %v97_v60 = vld [vmem:[#allocation5 + $0x1b8] sm:$0xff]  ;;  %v381_v61 = vmul.f32 %v46_v52, %v46_v52  ;;  %v382_v62 = vmul.f32 %v47_v53, %v47_v53  ;;  %v66_v19 = vld [vmem:[#allocation5 + $0xc0] sm:$0xff] }
  0x30   :  { %v3715_v55 = vpack.c.bf16 %v430_v48, %v429_v47  ;;  %v413_v63 = vmul.f32 %v78_v54, %v78_v54  ;;  %v414_v1 = vmul.f32 %v79_v56, %v79_v56  ;;  %v399_v2 = vmul.f32 %v64_v57, %v64_v57  ;;  %v48_v11 = vld [vmem:[#allocation5 + $0x30] sm:$0xff]  ;;  %v49_v12 = vld [vmem:[#allocation5 + $0x38] sm:$0xff]  ;;  %v67_v21 = vld [vmem:[#allocation5 + $0xc8] sm:$0xff] }
  0x31   :  { %v400_v3 = vmul.f32 %v65_v58, %v65_v58  ;;  %v431_v4 = vmul.f32 %v96_v59, %v96_v59  ;;  %v432_v5 = vmul.f32 %v97_v60, %v97_v60  ;;  %v3685_v6 = vpack.c.bf16 %v382_v62, %v381_v61  ;;  %v80_v16 = vld [vmem:[#allocation5 + $0x130] sm:$0xff]  ;;  %v81_v18 = vld [vmem:[#allocation5 + $0x138] sm:$0xff]  ;;  %v98_v22 = vld [vmem:[#allocation5 + $0x1c0] sm:$0xff] }
  0x32   :  { %v3717_v7 = vpack.c.bf16 %v414_v1, %v413_v63  ;;  %v99_v23 = vld [vmem:[#allocation5 + $0x1c8] sm:$0xff]  ;;  %v383_v24 = vmul.f32 %v48_v11, %v48_v11  ;;  %v384_v25 = vmul.f32 %v49_v12, %v49_v12  ;;  %v415_v26 = vmul.f32 %v80_v16, %v80_v16  ;;  %v50_v35 = vld [vmem:[#allocation5 + $0x40] sm:$0xff]  ;;  %v68_v40 = vld [vmem:[#allocation5 + $0xd0] sm:$0xff] }
  0x33   :  { %v3687_v10 = vpack.c.bf16 %v400_v3, %v399_v2  ;;  %v3719_v17 = vpack.c.bf16 %v432_v5, %v431_v4  ;;  %v416_v27 = vmul.f32 %v81_v18, %v81_v18  ;;  %v401_v28 = vmul.f32 %v66_v19, %v66_v19  ;;  %v51_v36 = vld [vmem:[#allocation5 + $0x48] sm:$0xff]  ;;  %v82_v37 = vld [vmem:[#allocation5 + $0x140] sm:$0xff]  ;;  %v69_v41 = vld [vmem:[#allocation5 + $0xd8] sm:$0xff] }
  0x34   :  { %v402_v29 = vmul.f32 %v67_v21, %v67_v21  ;;  %v433_v30 = vmul.f32 %v98_v22, %v98_v22  ;;  %v434_v31 = vmul.f32 %v99_v23, %v99_v23  ;;  %v3689_v32 = vpack.c.bf16 %v384_v25, %v383_v24  ;;  %v83_v39 = vld [vmem:[#allocation5 + $0x148] sm:$0xff]  ;;  %v100_v42 = vld [vmem:[#allocation5 + $0x1d0] sm:$0xff]  ;;  %v101_v43 = vld [vmem:[#allocation5 + $0x1d8] sm:$0xff] }
  0x35   :  { %3682 = vmatpush3.bf16.xpose.msra.mxu0 %v3681_v49  ;;  %v3721_v33 = vpack.c.bf16 %v416_v27, %v415_v26  ;;  %v385_v44 = vmul.f32 %v50_v35, %v50_v35  ;;  %v386_v45 = vmul.f32 %v51_v36, %v51_v36  ;;  %v417_v46 = vmul.f32 %v82_v37, %v82_v37  ;;  %v53_v56 = vld [vmem:[#allocation5 + $0x58] sm:$0xff]  ;;  %v84_v57 = vld [vmem:[#allocation5 + $0x150] sm:$0xff]  ;;  %v70_v60 = vld [vmem:[#allocation5 + $0xe0] sm:$0xff] }
  0x36   :  { %3714 = vmatpush3.bf16.xpose.msra.mxu1 %v3713_v50  ;;  %3684 = vmatprep.subr.bf16.mxu0 %v3683_v51  ;;  %v3691_v34 = vpack.c.bf16 %v402_v29, %v401_v28  ;;  %v3723_v38 = vpack.c.bf16 %v434_v31, %v433_v30  ;;  %v418_v47 = vmul.f32 %v83_v39, %v83_v39  ;;  %v85_v59 = vld [vmem:[#allocation5 + $0x158] sm:$0xff]  ;;  %v71_v61 = vld [vmem:[#allocation5 + $0xe8] sm:$0xff]  ;;  %v102_v62 = vld [vmem:[#allocation5 + $0x1e0] sm:$0xff] }
  0x37   :  { %3716 = vmatprep.subr.bf16.mxu1 %v3715_v55  ;;  %v403_v48 = vmul.f32 %v68_v40, %v68_v40  ;;  %v404_v49 = vmul.f32 %v69_v41, %v69_v41  ;;  %v435_v50 = vmul.f32 %v100_v42, %v100_v42  ;;  %v436_v51 = vmul.f32 %v101_v43, %v101_v43  ;;  %v52_v55 = vld [vmem:[#allocation5 + $0x50] sm:$0xff]  ;;  %v103_v63 = vld [vmem:[#allocation5 + $0x1e8] sm:$0xff]  ;;  %v86_v19 = vld [vmem:[#allocation5 + $0x160] sm:$0xff] }
  0x38   :  { %v3693_v52 = vpack.c.bf16 %v386_v45, %v385_v44  ;;  %v3725_v53 = vpack.c.bf16 %v418_v47, %v417_v46  ;;  %v387_v1 = vmul.f32 %v52_v55, %v52_v55  ;;  %v388_v2 = vmul.f32 %v53_v56, %v53_v56  ;;  %v55_v18 = vld [vmem:[#allocation5 + $0x68] sm:$0xff]  ;;  %v72_v23 = vld [vmem:[#allocation5 + $0xf0] sm:$0xff]  ;;  %v73_v24 = vld [vmem:[#allocation5 + $0xf8] sm:$0xff] }
  0x39   :  { %v3695_v54 = vpack.c.bf16 %v404_v49, %v403_v48  ;;  %v3727_v58 = vpack.c.bf16 %v436_v51, %v435_v50  ;;  %v419_v3 = vmul.f32 %v84_v57, %v84_v57  ;;  %v420_v4 = vmul.f32 %v85_v59, %v85_v59  ;;  %v87_v22 = vld [vmem:[#allocation5 + $0x168] sm:$0xff]  ;;  %v104_v25 = vld [vmem:[#allocation5 + $0x1f0] sm:$0xff]  ;;  %v105_v26 = vld [vmem:[#allocation5 + $0x1f8] sm:$0xff] }
  0x3a   :  { %v405_v5 = vmul.f32 %v70_v60, %v70_v60  ;;  %v3697_v11 = vpack.c.bf16 %v388_v2, %v387_v1  ;;  %v390_v28 = vmul.f32 %v55_v18, %v55_v18  ;;  %v421_v29 = vmul.f32 %v86_v19, %v86_v19  ;;  %v57_v39 = vld [vmem:[#allocation5 + $0x78] sm:$0xff]  ;;  %v88_v40 = vld [vmem:[#allocation5 + $0x170] sm:$0xff]  ;;  %v122_v43 = vld [vmem:[#allocation5 + $0x280] sm:$0xff] }
  0x3b   :  { %v3729_v12 = vpack.c.bf16 %v420_v4, %v419_v3  ;;  %v422_v30 = vmul.f32 %v87_v22, %v87_v22  ;;  %v407_v31 = vmul.f32 %v72_v23, %v72_v23  ;;  %v89_v42 = vld [vmem:[#allocation5 + $0x178] sm:$0xff]  ;;  %v123_v44 = vld [vmem:[#allocation5 + $0x288] sm:$0xff]  ;;  %v154_v45 = vld [vmem:[#allocation5 + $0x380] sm:$0xff]  ;;  %v392_v48 = vmul.f32 %v57_v39, %v57_v39 }
  0x3c   :  { %v155_v46 = vld [vmem:[#allocation5 + $0x388] sm:$0xff]  ;;  %v423_v49 = vmul.f32 %v88_v40, %v88_v40  ;;  %v424_v50 = vmul.f32 %v89_v42, %v89_v42  ;;  %v457_v51 = vmul.f32 %v122_v43, %v122_v43  ;;  %v138_v60 = vld [vmem:[#allocation5 + $0x300] sm:$0xff]  ;;  %v125_v1 = vld [vmem:[#allocation5 + $0x298] sm:$0xff] }
  0x3d   :  { %3686 = vmatpush3.bf16.xpose.msra.mxu0 %v3685_v6  ;;  %v406_v6 = vmul.f32 %v71_v61, %v71_v61  ;;  %v3733_v36 = vpack.c.bf16 %v422_v30, %v421_v29  ;;  %v107_v59 = vld [vmem:[#allocation5 + $0x208] sm:$0xff]  ;;  %v156_v2 = vld [vmem:[#allocation5 + $0x390] sm:$0xff]  ;;  %v157_v3 = vld [vmem:[#allocation5 + $0x398] sm:$0xff] }
  0x3e   :  { %3718 = vmatpush3.bf16.xpose.msra.mxu1 %v3717_v7  ;;  %3688 = vmatprep.subr.bf16.mxu0 %v3687_v10  ;;  %v437_v7 = vmul.f32 %v102_v62, %v102_v62  ;;  %v438_v10 = vmul.f32 %v103_v63, %v103_v63  ;;  %v3737_v56 = vpack.c.bf16 %v424_v50, %v423_v49  ;;  %v139_v62 = vld [vmem:[#allocation5 + $0x308] sm:$0xff]  ;;  %v124_v63 = vld [vmem:[#allocation5 + $0x290] sm:$0xff]  ;;  %v109_v22 = vld [vmem:[#allocation5 + $0x218] sm:$0xff] }
  0x3f   :  { %3720 = vmatprep.subr.bf16.mxu1 %v3719_v17  ;;  %v3699_v16 = vpack.c.bf16 %v406_v6, %v405_v5  ;;  %v54_v17 = vld [vmem:[#allocation5 + $0x60] sm:$0xff]  ;;  %v442_v5 = vmul.f32 %v107_v59, %v107_v59  ;;  %v473_v6 = vmul.f32 %v138_v60, %v138_v60  ;;  %v140_v23 = vld [vmem:[#allocation5 + $0x310] sm:$0xff]  ;;  %v159_v29 = vld [vmem:[#allocation5 + $0x3a8] sm:$0xff] }
  0x40   :  { %v3731_v21 = vpack.c.bf16 %v438_v10, %v437_v7  ;;  %v389_v27 = vmul.f32 %v54_v17, %v54_v17  ;;  %v474_v7 = vmul.f32 %v139_v62, %v139_v62  ;;  %v459_v10 = vmul.f32 %v124_v63, %v124_v63  ;;  %v111_v42 = vld [vmem:[#allocation5 + $0x228] sm:$0xff]  ;;  %v142_v43 = vld [vmem:[#allocation5 + $0x320] sm:$0xff]  ;;  %v161_v49 = vld [vmem:[#allocation5 + $0x3b8] sm:$0xff] }
  0x41   :  { %v113_v62 = vld [vmem:[#allocation5 + $0x238] sm:$0xff]  ;;  %v144_v63 = vld [vmem:[#allocation5 + $0x330] sm:$0xff]  ;;  %v4443_v8 = vld [vmem:[#allocation5 + $0xa0] sm:$0xff] }
  0x42   :  { %v3701_v35 = vpack.c.bf16 %v390_v28, %v389_v27  ;;  %v3773_v18 = vpack.c.bf16 %v474_v7, %v473_v6  ;;  %v127_v27 = vld [vmem:[#allocation5 + $0x2a8] sm:$0xff]  ;;  %v158_v28 = vld [vmem:[#allocation5 + $0x3a0] sm:$0xff] }
  0x43   :  { %v163_v6 = vld [vmem:[#allocation5 + $0x3c8] sm:$0xff] }
  0x44   :  { %v4444_v9 = vld [vmem:[#allocation5 + $0xa8] sm:$0xff] }
  0x45   :  { %3690 = vmatpush3.bf16.xpose.msra.mxu0 %v3689_v32  ;;  %v408_v32 = vmul.f32 %v73_v24, %v73_v24 }
  0x46   :  { %3722 = vmatpush3.bf16.xpose.msra.mxu1 %v3721_v33  ;;  %3692 = vmatprep.subr.bf16.mxu0 %v3691_v34  ;;  %v439_v33 = vmul.f32 %v104_v25, %v104_v25  ;;  %v440_v34 = vmul.f32 %v105_v26, %v105_v26  ;;  %v141_v25 = vld [vmem:[#allocation5 + $0x318] sm:$0xff]  ;;  %v126_v26 = vld [vmem:[#allocation5 + $0x2a0] sm:$0xff] }
  0x47   :  { %3724 = vmatprep.subr.bf16.mxu1 %v3723_v38  ;;  %v3703_v37 = vpack.c.bf16 %v408_v32, %v407_v31  ;;  %v56_v38 = vld [vmem:[#allocation5 + $0x70] sm:$0xff]  ;;  %v444_v31 = vmul.f32 %v109_v22, %v109_v22  ;;  %v475_v32 = vmul.f32 %v140_v23, %v140_v23 }
  0x48   :  { %v3735_v41 = vpack.c.bf16 %v440_v34, %v439_v33  ;;  %v391_v47 = vmul.f32 %v56_v38, %v56_v38  ;;  %v476_v33 = vmul.f32 %v141_v25, %v141_v25  ;;  %v461_v34 = vmul.f32 %v126_v26, %v126_v26  ;;  %v115_v25 = vld [vmem:[#allocation5 + $0x248] sm:$0xff]  ;;  %v146_v26 = vld [vmem:[#allocation5 + $0x340] sm:$0xff] }
  0x4a   :  { %v3705_v55 = vpack.c.bf16 %v392_v48, %v391_v47  ;;  %v3777_v39 = vpack.c.bf16 %v476_v33, %v475_v32  ;;  %v129_v47 = vld [vmem:[#allocation5 + $0x2b8] sm:$0xff]  ;;  %v160_v48 = vld [vmem:[#allocation5 + $0x3b0] sm:$0xff] }
  0x4b   :  { %v165_v32 = vld [vmem:[#allocation5 + $0x3d8] sm:$0xff] }
  0x4d   :  { %3694 = vmatpush3.bf16.xpose.msra.mxu0 %v3693_v52  ;;  %v458_v52 = vmul.f32 %v123_v44, %v123_v44 }
  0x4e   :  { %3726 = vmatpush3.bf16.xpose.msra.mxu1 %v3725_v53  ;;  %3696 = vmatprep.subr.bf16.mxu0 %v3695_v54  ;;  %v489_v53 = vmul.f32 %v154_v45, %v154_v45  ;;  %v490_v54 = vmul.f32 %v155_v46, %v155_v46  ;;  %v143_v45 = vld [vmem:[#allocation5 + $0x328] sm:$0xff]  ;;  %v128_v46 = vld [vmem:[#allocation5 + $0x2b0] sm:$0xff] }
  0x4f   :  { %3728 = vmatprep.subr.bf16.mxu1 %v3727_v58  ;;  %v3739_v57 = vpack.c.bf16 %v458_v52, %v457_v51  ;;  %v106_v58 = vld [vmem:[#allocation5 + $0x200] sm:$0xff]  ;;  %v446_v51 = vmul.f32 %v111_v42, %v111_v42  ;;  %v477_v52 = vmul.f32 %v142_v43, %v142_v43 }
  0x50   :  { %v3771_v61 = vpack.c.bf16 %v490_v54, %v489_v53  ;;  %v441_v4 = vmul.f32 %v106_v58, %v106_v58  ;;  %v478_v53 = vmul.f32 %v143_v45, %v143_v45  ;;  %v463_v54 = vmul.f32 %v128_v46, %v128_v46  ;;  %v117_v45 = vld [vmem:[#allocation5 + $0x258] sm:$0xff]  ;;  %v148_v46 = vld [vmem:[#allocation5 + $0x350] sm:$0xff] }
  0x52   :  { %v3741_v17 = vpack.c.bf16 %v442_v5, %v441_v4  ;;  %v3781_v59 = vpack.c.bf16 %v478_v53, %v477_v52  ;;  %v131_v4 = vld [vmem:[#allocation5 + $0x2c8] sm:$0xff]  ;;  %v162_v5 = vld [vmem:[#allocation5 + $0x3c0] sm:$0xff]  ;;  %v41_v53 = vld [vmem:[#allocation2] sm:$0xff] }
  0x53   :  { %v167_v52 = vld [vmem:[#allocation5 + $0x3e8] sm:$0xff] }
  0x55   :  { %3698 = vmatpush3.bf16.xpose.msra.mxu0 %v3697_v11  ;;  %v460_v11 = vmul.f32 %v125_v1, %v125_v1 }
  0x56   :  { %3730 = vmatpush3.bf16.xpose.msra.mxu1 %v3729_v12  ;;  %3700 = vmatprep.subr.bf16.mxu0 %v3699_v16  ;;  %v491_v12 = vmul.f32 %v156_v2, %v156_v2  ;;  %v492_v16 = vmul.f32 %v157_v3, %v157_v3  ;;  %v145_v2 = vld [vmem:[#allocation5 + $0x338] sm:$0xff]  ;;  %v130_v3 = vld [vmem:[#allocation5 + $0x2c0] sm:$0xff] }
  0x57   :  { %3732 = vmatprep.subr.bf16.mxu1 %v3731_v21  ;;  %v3743_v19 = vpack.c.bf16 %v460_v11, %v459_v10  ;;  %v108_v21 = vld [vmem:[#allocation5 + $0x210] sm:$0xff]  ;;  %v448_v10 = vmul.f32 %v113_v62, %v113_v62  ;;  %v479_v11 = vmul.f32 %v144_v63, %v144_v63  ;;  %v502_v62 = vmul.f32 %v167_v52, %v167_v52 }
  0x58   :  { %v3775_v24 = vpack.c.bf16 %v492_v16, %v491_v12  ;;  %v443_v30 = vmul.f32 %v108_v21, %v108_v21  ;;  %v480_v12 = vmul.f32 %v145_v2, %v145_v2  ;;  %v465_v16 = vmul.f32 %v130_v3, %v130_v3  ;;  %v118_v3 = vld [vmem:[#allocation5 + $0x260] sm:$0xff] }
  0x5a   :  { %v3745_v38 = vpack.c.bf16 %v444_v31, %v443_v30  ;;  %v3785_v22 = vpack.c.bf16 %v480_v12, %v479_v11  ;;  %v133_v30 = vld [vmem:[#allocation5 + $0x2d8] sm:$0xff]  ;;  %v164_v31 = vld [vmem:[#allocation5 + $0x3d0] sm:$0xff] }
  0x5b   :  { %v137_v11 = vld [vmem:[#allocation5 + $0x2f8] sm:$0xff]  ;;  %v168_v12 = vld [vmem:[#allocation5 + $0x3f0] sm:$0xff] }
  0x5d   :  { %3702 = vmatpush3.bf16.xpose.msra.mxu0 %v3701_v35  ;;  %v462_v35 = vmul.f32 %v127_v27, %v127_v27 }
  0x5e   :  { %3734 = vmatpush3.bf16.xpose.msra.mxu1 %v3733_v36  ;;  %3704 = vmatprep.subr.bf16.mxu0 %v3703_v37  ;;  %v493_v36 = vmul.f32 %v158_v28, %v158_v28  ;;  %v494_v37 = vmul.f32 %v159_v29, %v159_v29  ;;  %v147_v28 = vld [vmem:[#allocation5 + $0x348] sm:$0xff]  ;;  %v132_v29 = vld [vmem:[#allocation5 + $0x2d0] sm:$0xff] }
  0x5f   :  { %3736 = vmatprep.subr.bf16.mxu1 %v3735_v41  ;;  %v3747_v40 = vpack.c.bf16 %v462_v35, %v461_v34  ;;  %v110_v41 = vld [vmem:[#allocation5 + $0x220] sm:$0xff]  ;;  %v450_v34 = vmul.f32 %v115_v25, %v115_v25  ;;  %v481_v35 = vmul.f32 %v146_v26, %v146_v26 }
  0x60   :  { %v3779_v44 = vpack.c.bf16 %v494_v37, %v493_v36  ;;  %v445_v50 = vmul.f32 %v110_v41, %v110_v41  ;;  %v482_v36 = vmul.f32 %v147_v28, %v147_v28  ;;  %v467_v37 = vmul.f32 %v132_v29, %v132_v29  ;;  %v120_v29 = vld [vmem:[#allocation5 + $0x270] sm:$0xff] }
  0x62   :  { %v3749_v58 = vpack.c.bf16 %v446_v51, %v445_v50  ;;  %v3789_v42 = vpack.c.bf16 %v482_v36, %v481_v35  ;;  %v135_v50 = vld [vmem:[#allocation5 + $0x2e8] sm:$0xff]  ;;  %v166_v51 = vld [vmem:[#allocation5 + $0x3e0] sm:$0xff] }
  0x63   :  { %v187_v35 = vld [vmem:[#allocation5 + $0x488] sm:$0xff]  ;;  %v218_v36 = vld [vmem:[#allocation5 + $0x580] sm:$0xff] }
  0x65   :  { %3706 = vmatpush3.bf16.xpose.msra.mxu0 %v3705_v55  ;;  %v464_v55 = vmul.f32 %v129_v47, %v129_v47 }
  0x66   :  { %3738 = vmatpush3.bf16.xpose.msra.mxu1 %v3737_v56  ;;  %3740 = vmatprep.subr.bf16.mxu0 %v3739_v57  ;;  %v495_v56 = vmul.f32 %v160_v48, %v160_v48  ;;  %v496_v57 = vmul.f32 %v161_v49, %v161_v49  ;;  %v149_v48 = vld [vmem:[#allocation5 + $0x358] sm:$0xff]  ;;  %v134_v49 = vld [vmem:[#allocation5 + $0x2e0] sm:$0xff] }
  0x67   :  { %3772 = vmatprep.subr.bf16.mxu1 %v3771_v61  ;;  %v3751_v60 = vpack.c.bf16 %v464_v55, %v463_v54  ;;  %v112_v61 = vld [vmem:[#allocation5 + $0x230] sm:$0xff]  ;;  %v452_v55 = vmul.f32 %v117_v45, %v117_v45 }
  0x68   :  { %v3783_v1 = vpack.c.bf16 %v496_v57, %v495_v56  ;;  %v447_v7 = vmul.f32 %v112_v61, %v112_v61  ;;  %v483_v56 = vmul.f32 %v148_v46, %v148_v46  ;;  %v371_v57 = vmul.f32 %v41_v53, %v41_v53  ;;  %v203_v53 = vld [vmem:[#allocation5 + $0x508] sm:$0xff] }
  0x69   :  { %v501_v61 = vmul.f32 %v166_v51, %v166_v51  ;;  %v202_v51 = vld [vmem:[#allocation5 + $0x500] sm:$0xff] }
  0x6a   :  { %v3753_v21 = vpack.c.bf16 %v448_v10, %v447_v7  ;;  %372 = vadd.xlane.f32.xlu0 %v371_v57  ;;  %v151_v7 = vld [vmem:[#allocation5 + $0x368] sm:$0xff]  ;;  %v136_v10 = vld [vmem:[#allocation5 + $0x2f0] sm:$0xff]  ;;  %v221_v57 = vld [vmem:[#allocation5 + $0x598] sm:$0xff] }
  0x6c   :  { %2972 = vmatmul.mubr.f32.vlgmr.msra.gmra.mrb[0].mxu0 %v5340_v0 }
  0x6d   :  { %3006 = vmatmul.mubr.f32.vlgmr.msra.gmra.mrb[0].mxu1 %v5340_v0  ;;  %3742 = vmatpush3.bf16.xpose.msra.mxu0 %v3741_v17  ;;  %v466_v17 = vmul.f32 %v131_v4, %v131_v4  ;;  %v119_v4 = vld [vmem:[#allocation5 + $0x268] sm:$0xff] }
  0x6e   :  { %3774 = vmatpush3.bf16.xpose.msra.mxu1 %v3773_v18  ;;  %3744 = vmatprep.subr.bf16.mxu0 %v3743_v19  ;;  %v497_v18 = vmul.f32 %v162_v5, %v162_v5  ;;  %v498_v19 = vmul.f32 %v163_v6, %v163_v6  ;;  %v150_v5 = vld [vmem:[#allocation5 + $0x360] sm:$0xff]  ;;  %v3795_v6 = vpack.c.bf16 %v502_v62, %v501_v61 }
  0x6f   :  { %3776 = vmatprep.subr.bf16.mxu1 %v3775_v24  ;;  %3039 = vmatprep.mubr.f32.mxu0 %v5340_v0  ;;  %v3755_v23 = vpack.c.bf16 %v466_v17, %v465_v16  ;;  %v114_v24 = vld [vmem:[#allocation5 + $0x240] sm:$0xff]  ;;  %v169_v16 = vld [vmem:[#allocation5 + $0x3f8] sm:$0xff]  ;;  %v453_v17 = vmul.f32 %v118_v3, %v118_v3  ;;  %v538_v61 = vmul.f32 %v203_v53, %v203_v53 }
  0x70   :  { %3073 = vmatprep.mubr.f32.mxu1 %v5340_v0  ;;  %v3787_v27 = vpack.c.bf16 %v498_v19, %v497_v18  ;;  %v449_v33 = vmul.f32 %v114_v24, %v114_v24  ;;  %v454_v18 = vmul.f32 %v119_v4, %v119_v4  ;;  %v485_v19 = vmul.f32 %v150_v5, %v150_v5  ;;  %v177_v53 = vld [vmem:[#allocation5 + $0x438] sm:$0xff] }
  0x71   :  { %v503_v24 = vmul.f32 %v168_v12, %v168_v12  ;;  %v504_v25 = vmul.f32 %v169_v16, %v169_v16  ;;  %v205_v12 = vld [vmem:[#allocation5 + $0x518] sm:$0xff]  ;;  %v190_v16 = vld [vmem:[#allocation5 + $0x4a0] sm:$0xff] }
  0x72   :  { %v3757_v41 = vpack.c.bf16 %v450_v34, %v449_v33  ;;  %v3765_v26 = vpack.c.bf16 %v454_v18, %v453_v17  ;;  %v153_v33 = vld [vmem:[#allocation5 + $0x378] sm:$0xff]  ;;  %v186_v34 = vld [vmem:[#allocation5 + $0x480] sm:$0xff]  ;;  %v191_v17 = vld [vmem:[#allocation5 + $0x4a8] sm:$0xff] }
  0x73   :  { %v222_v18 = vld [vmem:[#allocation5 + $0x5a0] sm:$0xff] }
  0x75   :  { %3746 = vmatpush3.bf16.xpose.msra.mxu0 %v3745_v38  ;;  %v468_v38 = vmul.f32 %v133_v30, %v133_v30  ;;  %v121_v30 = vld [vmem:[#allocation5 + $0x278] sm:$0xff] }
  0x76   :  { %3778 = vmatpush3.bf16.xpose.msra.mxu1 %v3777_v39  ;;  %3748 = vmatprep.subr.bf16.mxu0 %v3747_v40  ;;  %v499_v39 = vmul.f32 %v164_v31, %v164_v31  ;;  %v500_v40 = vmul.f32 %v165_v32, %v165_v32  ;;  %v152_v31 = vld [vmem:[#allocation5 + $0x370] sm:$0xff]  ;;  %v3799_v32 = vpack.c.bf16 %v504_v25, %v503_v24 }
  0x77   :  { %3780 = vmatprep.subr.bf16.mxu1 %v3779_v44  ;;  %v3759_v43 = vpack.c.bf16 %v468_v38, %v467_v37  ;;  %v116_v44 = vld [vmem:[#allocation5 + $0x250] sm:$0xff]  ;;  %v219_v37 = vld [vmem:[#allocation5 + $0x588] sm:$0xff]  ;;  %v455_v38 = vmul.f32 %v120_v29, %v120_v29  ;;  %v540_v24 = vmul.f32 %v205_v12, %v205_v12  ;;  %v525_v25 = vmul.f32 %v190_v16, %v190_v16  ;;  %v210_v16 = vld [vmem:[#allocation5 + $0x540] sm:$0xff] }
  0x78   :  { %v3791_v47 = vpack.c.bf16 %v500_v40, %v499_v39  ;;  %v451_v54 = vmul.f32 %v116_v44, %v116_v44  ;;  %v456_v39 = vmul.f32 %v121_v30, %v121_v30  ;;  %v487_v40 = vmul.f32 %v152_v31, %v152_v31  ;;  %v179_v12 = vld [vmem:[#allocation5 + $0x448] sm:$0xff] }
  0x79   :  { %v553_v44 = vmul.f32 %v218_v36, %v218_v36  ;;  %v554_v45 = vmul.f32 %v219_v37, %v219_v37  ;;  %v207_v36 = vld [vmem:[#allocation5 + $0x528] sm:$0xff]  ;;  %v192_v37 = vld [vmem:[#allocation5 + $0x4b0] sm:$0xff] }
  0x7a   :  { %v3761_v63 = vpack.c.bf16 %v452_v55, %v451_v54  ;;  %v3769_v46 = vpack.c.bf16 %v456_v39, %v455_v38  ;;  %v188_v54 = vld [vmem:[#allocation5 + $0x490] sm:$0xff]  ;;  %v189_v55 = vld [vmem:[#allocation5 + $0x498] sm:$0xff] }
  0x7b   :  { %v3835_v52 = vpack.c.bf16 %v554_v45, %v553_v44  ;;  %v523_v62 = vmul.f32 %v188_v54, %v188_v54  ;;  %v193_v38 = vld [vmem:[#allocation5 + $0x4b8] sm:$0xff]  ;;  %v224_v39 = vld [vmem:[#allocation5 + $0x5b0] sm:$0xff]  ;;  %v542_v44 = vmul.f32 %v207_v36, %v207_v36  ;;  %v527_v45 = vmul.f32 %v192_v37, %v192_v37 }
  0x7c   :  { %v208_v54 = vld [vmem:[#allocation5 + $0x530] sm:$0xff]  ;;  %v181_v36 = vld [vmem:[#allocation5 + $0x458] sm:$0xff] }
  0x7d   :  { %3750 = vmatpush3.bf16.xpose.msra.mxu0 %v3749_v58  ;;  %v484_v58 = vmul.f32 %v149_v48, %v149_v48  ;;  %v212_v37 = vld [vmem:[#allocation5 + $0x550] sm:$0xff] }
  0x7e   :  { %3782 = vmatpush3.bf16.xpose.msra.mxu1 %v3781_v59  ;;  %3752 = vmatprep.subr.bf16.mxu0 %v3751_v60  ;;  %v469_v59 = vmul.f32 %v134_v49, %v134_v49  ;;  %v470_v60 = vmul.f32 %v135_v50, %v135_v50  ;;  %v170_v49 = vld [vmem:[#allocation5 + $0x400] sm:$0xff]  ;;  %v171_v50 = vld [vmem:[#allocation5 + $0x408] sm:$0xff] }
  0x7f   :  { %3784 = vmatprep.subr.bf16.mxu1 %v3783_v1  ;;  %v3793_v1 = vpack.c.bf16 %v484_v58, %v483_v56  ;;  %v220_v56 = vld [vmem:[#allocation5 + $0x590] sm:$0xff]  ;;  %v505_v58 = vmul.f32 %v170_v49, %v170_v49 }
  0x80   :  { %v3763_v2 = vpack.c.bf16 %v470_v60, %v469_v59  ;;  %v506_v59 = vmul.f32 %v171_v50, %v171_v50  ;;  %v537_v60 = vmul.f32 %v202_v51, %v202_v51 }
  0x82   :  { %v3805_v3 = vpack.c.bf16 %v506_v59, %v505_v58  ;;  %v3837_v4 = vpack.c.bf16 %v538_v61, %v537_v60  ;;  %v195_v58 = vld [vmem:[#allocation5 + $0x4c8] sm:$0xff]  ;;  %v226_v59 = vld [vmem:[#allocation5 + $0x5c0] sm:$0xff] }
  0x83   :  { %v227_v60 = vld [vmem:[#allocation5 + $0x5c8] sm:$0xff] }
  0x85   :  { %3754 = vmatpush3.bf16.xpose.msra.mxu0 %v3753_v21  ;;  %v486_v21 = vmul.f32 %v151_v7, %v151_v7  ;;  %v173_v7 = vld [vmem:[#allocation5 + $0x418] sm:$0xff] }
  0x86   :  { %3786 = vmatpush3.bf16.xpose.msra.mxu1 %v3785_v22  ;;  %3756 = vmatprep.subr.bf16.mxu0 %v3755_v23  ;;  %v471_v22 = vmul.f32 %v136_v10, %v136_v10  ;;  %v472_v23 = vmul.f32 %v137_v11, %v137_v11  ;;  %v204_v10 = vld [vmem:[#allocation5 + $0x510] sm:$0xff] }
  0x87   :  { %3788 = vmatprep.subr.bf16.mxu1 %v3787_v27  ;;  %v3797_v27 = vpack.c.bf16 %v486_v21, %v485_v19  ;;  %v223_v19 = vld [vmem:[#allocation5 + $0x5a8] sm:$0xff] }
  0x88   :  { %v3767_v28 = vpack.c.bf16 %v472_v23, %v471_v22  ;;  %v508_v22 = vmul.f32 %v173_v7, %v173_v7  ;;  %v539_v23 = vmul.f32 %v204_v10, %v204_v10 }
  0x8a   :  { %v3841_v30 = vpack.c.bf16 %v540_v24, %v539_v23  ;;  %v229_v23 = vld [vmem:[#allocation5 + $0x5d8] sm:$0xff] }
  0x8d   :  { %3758 = vmatpush3.bf16.xpose.msra.mxu0 %v3757_v41  ;;  %v488_v41 = vmul.f32 %v153_v33, %v153_v33  ;;  %v175_v33 = vld [vmem:[#allocation5 + $0x428] sm:$0xff] }
  0x8e   :  { %3790 = vmatpush3.bf16.xpose.msra.mxu1 %v3789_v42  ;;  %3760 = vmatprep.subr.bf16.mxu0 %v3759_v43  ;;  %v521_v42 = vmul.f32 %v186_v34, %v186_v34  ;;  %v522_v43 = vmul.f32 %v187_v35, %v187_v35  ;;  %v206_v34 = vld [vmem:[#allocation5 + $0x520] sm:$0xff] }
  0x8f   :  { %3792 = vmatprep.subr.bf16.mxu1 %v3791_v47  ;;  %v3801_v47 = vpack.c.bf16 %v488_v41, %v487_v40  ;;  %v225_v40 = vld [vmem:[#allocation5 + $0x5b8] sm:$0xff] }
  0x90   :  { %v3803_v48 = vpack.c.bf16 %v522_v43, %v521_v42  ;;  %v510_v42 = vmul.f32 %v175_v33, %v175_v33  ;;  %v541_v43 = vmul.f32 %v206_v34, %v206_v34 }
  0x92   :  { %v3845_v50 = vpack.c.bf16 %v542_v44, %v541_v43  ;;  %v231_v43 = vld [vmem:[#allocation5 + $0x5e8] sm:$0xff] }
  0x95   :  { %3762 = vmatpush3.bf16.xpose.msra.mxu0 %v3761_v63  ;;  %v524_v63 = vmul.f32 %v189_v55, %v189_v55 }
  0x96   :  { %3794 = vmatpush3.bf16.xpose.msra.mxu1 %v3793_v1  ;;  %3764 = vmatprep.subr.bf16.mxu0 %v3763_v2  ;;  %v555_v1 = vmul.f32 %v220_v56, %v220_v56  ;;  %v556_v2 = vmul.f32 %v221_v57, %v221_v57  ;;  %v209_v56 = vld [vmem:[#allocation5 + $0x538] sm:$0xff]  ;;  %v194_v57 = vld [vmem:[#allocation5 + $0x4c0] sm:$0xff] }
  0x97   :  { %3796 = vmatprep.subr.bf16.mxu1 %v3795_v6  ;;  %v3807_v5 = vpack.c.bf16 %v524_v63, %v523_v62  ;;  %v172_v6 = vld [vmem:[#allocation5 + $0x410] sm:$0xff]  ;;  %v512_v62 = vmul.f32 %v177_v53, %v177_v53  ;;  %v543_v63 = vmul.f32 %v208_v54, %v208_v54 }
  0x98   :  { %v3839_v11 = vpack.c.bf16 %v556_v2, %v555_v1  ;;  %v507_v21 = vmul.f32 %v172_v6, %v172_v6  ;;  %v544_v1 = vmul.f32 %v209_v56, %v209_v56  ;;  %v529_v2 = vmul.f32 %v194_v57, %v194_v57  ;;  %v183_v56 = vld [vmem:[#allocation5 + $0x468] sm:$0xff]  ;;  %v214_v57 = vld [vmem:[#allocation5 + $0x560] sm:$0xff] }
  0x9a   :  { %v3809_v29 = vpack.c.bf16 %v508_v22, %v507_v21  ;;  %v3849_v7 = vpack.c.bf16 %v544_v1, %v543_v63  ;;  %v197_v21 = vld [vmem:[#allocation5 + $0x4d8] sm:$0xff]  ;;  %v228_v22 = vld [vmem:[#allocation5 + $0x5d0] sm:$0xff] }
  0x9b   :  { %v233_v63 = vld [vmem:[#allocation5 + $0x5f8] sm:$0xff] }
  0x9d   :  { %3766 = vmatpush3.bf16.xpose.msra.mxu0 %v3765_v26  ;;  %v526_v26 = vmul.f32 %v191_v17, %v191_v17 }
  0x9e   :  { %3798 = vmatpush3.bf16.xpose.msra.mxu1 %v3797_v27  ;;  %3768 = vmatprep.subr.bf16.mxu0 %v3767_v28  ;;  %v557_v27 = vmul.f32 %v222_v18, %v222_v18  ;;  %v558_v28 = vmul.f32 %v223_v19, %v223_v19  ;;  %v211_v18 = vld [vmem:[#allocation5 + $0x548] sm:$0xff]  ;;  %v196_v19 = vld [vmem:[#allocation5 + $0x4d0] sm:$0xff] }
  0x9f   :  { %3800 = vmatprep.subr.bf16.mxu1 %v3799_v32  ;;  %v3811_v31 = vpack.c.bf16 %v526_v26, %v525_v25  ;;  %v174_v32 = vld [vmem:[#allocation5 + $0x420] sm:$0xff]  ;;  %v514_v25 = vmul.f32 %v179_v12, %v179_v12  ;;  %v545_v26 = vmul.f32 %v210_v16, %v210_v16 }
  0xa0   :  { %v3843_v35 = vpack.c.bf16 %v558_v28, %v557_v27  ;;  %v509_v41 = vmul.f32 %v174_v32, %v174_v32  ;;  %v546_v27 = vmul.f32 %v211_v18, %v211_v18  ;;  %v531_v28 = vmul.f32 %v196_v19, %v196_v19  ;;  %v185_v18 = vld [vmem:[#allocation5 + $0x478] sm:$0xff]  ;;  %v216_v19 = vld [vmem:[#allocation5 + $0x570] sm:$0xff] }
  0xa2   :  { %v3813_v49 = vpack.c.bf16 %v510_v42, %v509_v41  ;;  %v3853_v33 = vpack.c.bf16 %v546_v27, %v545_v26  ;;  %v199_v41 = vld [vmem:[#allocation5 + $0x4e8] sm:$0xff]  ;;  %v230_v42 = vld [vmem:[#allocation5 + $0x5e0] sm:$0xff] }
  0xa3   :  { %v283_v26 = vld [vmem:[#allocation5 + $0x788] sm:$0xff] }
  0xa5   :  { %3770 = vmatpush3.bf16.xpose.msra.mxu0 %v3769_v46  ;;  %v528_v46 = vmul.f32 %v193_v38, %v193_v38 }
  0xa6   :  { %3802 = vmatpush3.bf16.xpose.msra.mxu1 %v3801_v47  ;;  %3804 = vmatprep.subr.bf16.mxu0 %v3803_v48  ;;  %v559_v47 = vmul.f32 %v224_v39, %v224_v39  ;;  %v560_v48 = vmul.f32 %v225_v40, %v225_v40  ;;  %v213_v39 = vld [vmem:[#allocation5 + $0x558] sm:$0xff]  ;;  %v198_v40 = vld [vmem:[#allocation5 + $0x4e0] sm:$0xff] }
  0xa7   :  { %3836 = vmatprep.subr.bf16.mxu1 %v3835_v52  ;;  %v3815_v51 = vpack.c.bf16 %v528_v46, %v527_v45  ;;  %v176_v52 = vld [vmem:[#allocation5 + $0x430] sm:$0xff]  ;;  %v516_v45 = vmul.f32 %v181_v36, %v181_v36  ;;  %v547_v46 = vmul.f32 %v212_v37, %v212_v37 }
  0xa8   :  { %v3847_v55 = vpack.c.bf16 %v560_v48, %v559_v47  ;;  %v511_v61 = vmul.f32 %v176_v52, %v176_v52  ;;  %v548_v47 = vmul.f32 %v213_v39, %v213_v39  ;;  %v533_v48 = vmul.f32 %v198_v40, %v198_v40  ;;  %v235_v39 = vld [vmem:[#allocation5 + $0x608] sm:$0xff]  ;;  %v266_v40 = vld [vmem:[#allocation5 + $0x700] sm:$0xff] }
  0xaa   :  { %v3817_v6 = vpack.c.bf16 %v512_v62, %v511_v61  ;;  %v3857_v53 = vpack.c.bf16 %v548_v47, %v547_v46  ;;  %v201_v61 = vld [vmem:[#allocation5 + $0x4f8] sm:$0xff]  ;;  %v232_v62 = vld [vmem:[#allocation5 + $0x5f0] sm:$0xff] }
  0xab   :  { %v285_v46 = vld [vmem:[#allocation5 + $0x798] sm:$0xff] }
  0xac   :  { %3040 = vmatmul.mubr.f32.vlgmr.msra.gmra.mrb[2].mxu0 %v5340_v0 }
  0xad   :  { %3074 = vmatmul.mubr.f32.vlgmr.msra.gmra.mrb[2].mxu1 %v5340_v0  ;;  %3806 = vmatpush3.bf16.xpose.msra.mxu0 %v3805_v3  ;;  %v530_v3 = vmul.f32 %v195_v58, %v195_v58 }
  0xae   :  { %3838 = vmatpush3.bf16.xpose.msra.mxu1 %v3837_v4  ;;  %3808 = vmatprep.subr.bf16.mxu0 %v3807_v5  ;;  %v561_v4 = vmul.f32 %v226_v59, %v226_v59  ;;  %v562_v5 = vmul.f32 %v227_v60, %v227_v60  ;;  %v215_v59 = vld [vmem:[#allocation5 + $0x568] sm:$0xff]  ;;  %v200_v60 = vld [vmem:[#allocation5 + $0x4f0] sm:$0xff] }
  0xaf   :  { %3840 = vmatprep.subr.bf16.mxu1 %v3839_v11  ;;  %3107 = vmatprep.mubr.f32.mxu0 %v5340_v0  ;;  %v3819_v10 = vpack.c.bf16 %v530_v3, %v529_v2  ;;  %v178_v11 = vld [vmem:[#allocation5 + $0x440] sm:$0xff]  ;;  %v518_v2 = vmul.f32 %v183_v56, %v183_v56  ;;  %v549_v3 = vmul.f32 %v214_v57, %v214_v57 }
  0xb0   :  { %3141 = vmatprep.mubr.f32.mxu1 %v5340_v0  ;;  %v3851_v17 = vpack.c.bf16 %v562_v5, %v561_v4  ;;  %v513_v24 = vmul.f32 %v178_v11, %v178_v11  ;;  %v550_v4 = vmul.f32 %v215_v59, %v215_v59  ;;  %v535_v5 = vmul.f32 %v200_v60, %v200_v60  ;;  %v237_v59 = vld [vmem:[#allocation5 + $0x618] sm:$0xff]  ;;  %v268_v60 = vld [vmem:[#allocation5 + $0x710] sm:$0xff] }
  0xb2   :  { %v3821_v32 = vpack.c.bf16 %v514_v25, %v513_v24  ;;  %v3861_v12 = vpack.c.bf16 %v550_v4, %v549_v3  ;;  %v251_v24 = vld [vmem:[#allocation5 + $0x688] sm:$0xff]  ;;  %v282_v25 = vld [vmem:[#allocation5 + $0x780] sm:$0xff] }
  0xb3   :  { %v287_v3 = vld [vmem:[#allocation5 + $0x7a8] sm:$0xff] }
  0xb5   :  { %3810 = vmatpush3.bf16.xpose.msra.mxu0 %v3809_v29  ;;  %v532_v29 = vmul.f32 %v197_v21, %v197_v21 }
  0xb6   :  { %3842 = vmatpush3.bf16.xpose.msra.mxu1 %v3841_v30  ;;  %3812 = vmatprep.subr.bf16.mxu0 %v3811_v31  ;;  %v563_v30 = vmul.f32 %v228_v22, %v228_v22  ;;  %v564_v31 = vmul.f32 %v229_v23, %v229_v23  ;;  %v217_v22 = vld [vmem:[#allocation5 + $0x578] sm:$0xff]  ;;  %v250_v23 = vld [vmem:[#allocation5 + $0x680] sm:$0xff] }
  0xb7   :  { %3844 = vmatprep.subr.bf16.mxu1 %v3843_v35  ;;  %v3823_v34 = vpack.c.bf16 %v532_v29, %v531_v28  ;;  %v180_v35 = vld [vmem:[#allocation5 + $0x450] sm:$0xff]  ;;  %v520_v28 = vmul.f32 %v185_v18, %v185_v18  ;;  %v551_v29 = vmul.f32 %v216_v19, %v216_v19 }
  0xb8   :  { %v3855_v38 = vpack.c.bf16 %v564_v31, %v563_v30  ;;  %v515_v44 = vmul.f32 %v180_v35, %v180_v35  ;;  %v552_v30 = vmul.f32 %v217_v22, %v217_v22  ;;  %v585_v31 = vmul.f32 %v250_v23, %v250_v23  ;;  %v239_v22 = vld [vmem:[#allocation5 + $0x628] sm:$0xff]  ;;  %v270_v23 = vld [vmem:[#allocation5 + $0x720] sm:$0xff] }
  0xba   :  { %v3825_v52 = vpack.c.bf16 %v516_v45, %v515_v44  ;;  %v3865_v36 = vpack.c.bf16 %v552_v30, %v551_v29  ;;  %v253_v44 = vld [vmem:[#allocation5 + $0x698] sm:$0xff]  ;;  %v284_v45 = vld [vmem:[#allocation5 + $0x790] sm:$0xff] }
  0xbb   :  { %v289_v29 = vld [vmem:[#allocation5 + $0x7b8] sm:$0xff] }
  0xbd   :  { %3814 = vmatpush3.bf16.xpose.msra.mxu0 %v3813_v49  ;;  %v534_v49 = vmul.f32 %v199_v41, %v199_v41 }
  0xbe   :  { %3846 = vmatpush3.bf16.xpose.msra.mxu1 %v3845_v50  ;;  %3816 = vmatprep.subr.bf16.mxu0 %v3815_v51  ;;  %v565_v50 = vmul.f32 %v230_v42, %v230_v42  ;;  %v566_v51 = vmul.f32 %v231_v43, %v231_v43  ;;  %v267_v42 = vld [vmem:[#allocation5 + $0x708] sm:$0xff]  ;;  %v252_v43 = vld [vmem:[#allocation5 + $0x690] sm:$0xff] }
  0xbf   :  { %3848 = vmatprep.subr.bf16.mxu1 %v3847_v55  ;;  %v3827_v54 = vpack.c.bf16 %v534_v49, %v533_v48  ;;  %v182_v55 = vld [vmem:[#allocation5 + $0x460] sm:$0xff]  ;;  %v570_v48 = vmul.f32 %v235_v39, %v235_v39  ;;  %v601_v49 = vmul.f32 %v266_v40, %v266_v40 }
  0xc0   :  { %v3859_v58 = vpack.c.bf16 %v566_v51, %v565_v50  ;;  %v517_v1 = vmul.f32 %v182_v55, %v182_v55  ;;  %v602_v50 = vmul.f32 %v267_v42, %v267_v42  ;;  %v587_v51 = vmul.f32 %v252_v43, %v252_v43  ;;  %v241_v42 = vld [vmem:[#allocation5 + $0x638] sm:$0xff]  ;;  %v272_v43 = vld [vmem:[#allocation5 + $0x730] sm:$0xff] }
  0xc2   :  { %v3829_v11 = vpack.c.bf16 %v518_v2, %v517_v1  ;;  %v3901_v56 = vpack.c.bf16 %v602_v50, %v601_v49  ;;  %v255_v1 = vld [vmem:[#allocation5 + $0x6a8] sm:$0xff]  ;;  %v286_v2 = vld [vmem:[#allocation5 + $0x7a0] sm:$0xff] }
  0xc3   :  { %v291_v49 = vld [vmem:[#allocation5 + $0x7c8] sm:$0xff] }
  0xc5   :  { %3818 = vmatpush3.bf16.xpose.msra.mxu0 %v3817_v6  ;;  %v536_v6 = vmul.f32 %v201_v61, %v201_v61 }
  0xc6   :  { %3850 = vmatpush3.bf16.xpose.msra.mxu1 %v3849_v7  ;;  %3820 = vmatprep.subr.bf16.mxu0 %v3819_v10  ;;  %v567_v7 = vmul.f32 %v232_v62, %v232_v62  ;;  %v568_v10 = vmul.f32 %v233_v63, %v233_v63  ;;  %v269_v62 = vld [vmem:[#allocation5 + $0x718] sm:$0xff]  ;;  %v254_v63 = vld [vmem:[#allocation5 + $0x6a0] sm:$0xff] }
  0xc7   :  { %3852 = vmatprep.subr.bf16.mxu1 %v3851_v17  ;;  %v3831_v16 = vpack.c.bf16 %v536_v6, %v535_v5  ;;  %v184_v17 = vld [vmem:[#allocation5 + $0x470] sm:$0xff]  ;;  %v572_v5 = vmul.f32 %v237_v59, %v237_v59  ;;  %v603_v6 = vmul.f32 %v268_v60, %v268_v60 }
  0xc8   :  { %v3863_v21 = vpack.c.bf16 %v568_v10, %v567_v7  ;;  %v519_v27 = vmul.f32 %v184_v17, %v184_v17  ;;  %v604_v7 = vmul.f32 %v269_v62, %v269_v62  ;;  %v589_v10 = vmul.f32 %v254_v63, %v254_v63  ;;  %v243_v62 = vld [vmem:[#allocation5 + $0x648] sm:$0xff]  ;;  %v274_v63 = vld [vmem:[#allocation5 + $0x740] sm:$0xff] }
  0xca   :  { %v3833_v35 = vpack.c.bf16 %v520_v28, %v519_v27  ;;  %v3905_v18 = vpack.c.bf16 %v604_v7, %v603_v6  ;;  %v257_v27 = vld [vmem:[#allocation5 + $0x6b8] sm:$0xff]  ;;  %v288_v28 = vld [vmem:[#allocation5 + $0x7b0] sm:$0xff] }
  0xcb   :  { %v293_v6 = vld [vmem:[#allocation5 + $0x7d8] sm:$0xff] }
  0xcd   :  { %3822 = vmatpush3.bf16.xpose.msra.mxu0 %v3821_v32  ;;  %v586_v32 = vmul.f32 %v251_v24, %v251_v24 }
  0xce   :  { %3854 = vmatpush3.bf16.xpose.msra.mxu1 %v3853_v33  ;;  %3824 = vmatprep.subr.bf16.mxu0 %v3823_v34  ;;  %v617_v33 = vmul.f32 %v282_v25, %v282_v25  ;;  %v618_v34 = vmul.f32 %v283_v26, %v283_v26  ;;  %v271_v25 = vld [vmem:[#allocation5 + $0x728] sm:$0xff]  ;;  %v256_v26 = vld [vmem:[#allocation5 + $0x6b0] sm:$0xff] }
  0xcf   :  { %3856 = vmatprep.subr.bf16.mxu1 %v3855_v38  ;;  %v3867_v37 = vpack.c.bf16 %v586_v32, %v585_v31  ;;  %v234_v38 = vld [vmem:[#allocation5 + $0x600] sm:$0xff]  ;;  %v574_v31 = vmul.f32 %v239_v22, %v239_v22  ;;  %v605_v32 = vmul.f32 %v270_v23, %v270_v23 }
  0xd0   :  { %v3899_v41 = vpack.c.bf16 %v618_v34, %v617_v33  ;;  %v569_v47 = vmul.f32 %v234_v38, %v234_v38  ;;  %v606_v33 = vmul.f32 %v271_v25, %v271_v25  ;;  %v591_v34 = vmul.f32 %v256_v26, %v256_v26  ;;  %v245_v25 = vld [vmem:[#allocation5 + $0x658] sm:$0xff]  ;;  %v276_v26 = vld [vmem:[#allocation5 + $0x750] sm:$0xff] }
  0xd2   :  { %v3869_v55 = vpack.c.bf16 %v570_v48, %v569_v47  ;;  %v3909_v39 = vpack.c.bf16 %v606_v33, %v605_v32  ;;  %v259_v47 = vld [vmem:[#allocation5 + $0x6c8] sm:$0xff]  ;;  %v290_v48 = vld [vmem:[#allocation5 + $0x7c0] sm:$0xff] }
  0xd3   :  { %v295_v32 = vld [vmem:[#allocation5 + $0x7e8] sm:$0xff] }
  0xd5   :  { %3826 = vmatpush3.bf16.xpose.msra.mxu0 %v3825_v52  ;;  %v588_v52 = vmul.f32 %v253_v44, %v253_v44 }
  0xd6   :  { %3858 = vmatpush3.bf16.xpose.msra.mxu1 %v3857_v53  ;;  %3828 = vmatprep.subr.bf16.mxu0 %v3827_v54  ;;  %v619_v53 = vmul.f32 %v284_v45, %v284_v45  ;;  %v620_v54 = vmul.f32 %v285_v46, %v285_v46  ;;  %v273_v45 = vld [vmem:[#allocation5 + $0x738] sm:$0xff]  ;;  %v258_v46 = vld [vmem:[#allocation5 + $0x6c0] sm:$0xff] }
  0xd7   :  { %3860 = vmatprep.subr.bf16.mxu1 %v3859_v58  ;;  %v3871_v57 = vpack.c.bf16 %v588_v52, %v587_v51  ;;  %v236_v58 = vld [vmem:[#allocation5 + $0x610] sm:$0xff]  ;;  %v576_v51 = vmul.f32 %v241_v42, %v241_v42  ;;  %v607_v52 = vmul.f32 %v272_v43, %v272_v43 }
  0xd8   :  { %v3903_v61 = vpack.c.bf16 %v620_v54, %v619_v53  ;;  %v571_v4 = vmul.f32 %v236_v58, %v236_v58  ;;  %v608_v53 = vmul.f32 %v273_v45, %v273_v45  ;;  %v593_v54 = vmul.f32 %v258_v46, %v258_v46  ;;  %v247_v45 = vld [vmem:[#allocation5 + $0x668] sm:$0xff]  ;;  %v278_v46 = vld [vmem:[#allocation5 + $0x760] sm:$0xff] }
  0xda   :  { %v3873_v17 = vpack.c.bf16 %v572_v5, %v571_v4  ;;  %v3913_v59 = vpack.c.bf16 %v608_v53, %v607_v52  ;;  %v261_v4 = vld [vmem:[#allocation5 + $0x6d8] sm:$0xff]  ;;  %v292_v5 = vld [vmem:[#allocation5 + $0x7d0] sm:$0xff] }
  0xdb   :  { %v297_v52 = vld [vmem:[#allocation5 + $0x7f8] sm:$0xff] }
  0xdd   :  { %3830 = vmatpush3.bf16.xpose.msra.mxu0 %v3829_v11  ;;  %v590_v11 = vmul.f32 %v255_v1, %v255_v1 }
  0xde   :  { %3862 = vmatpush3.bf16.xpose.msra.mxu1 %v3861_v12  ;;  %3832 = vmatprep.subr.bf16.mxu0 %v3831_v16  ;;  %v621_v12 = vmul.f32 %v286_v2, %v286_v2  ;;  %v622_v16 = vmul.f32 %v287_v3, %v287_v3  ;;  %v275_v2 = vld [vmem:[#allocation5 + $0x748] sm:$0xff]  ;;  %v260_v3 = vld [vmem:[#allocation5 + $0x6d0] sm:$0xff] }
  0xdf   :  { %3864 = vmatprep.subr.bf16.mxu1 %v3863_v21  ;;  %v3875_v19 = vpack.c.bf16 %v590_v11, %v589_v10  ;;  %v238_v21 = vld [vmem:[#allocation5 + $0x620] sm:$0xff]  ;;  %v578_v10 = vmul.f32 %v243_v62, %v243_v62  ;;  %v609_v11 = vmul.f32 %v274_v63, %v274_v63 }
  0xe0   :  { %v3907_v24 = vpack.c.bf16 %v622_v16, %v621_v12  ;;  %v573_v30 = vmul.f32 %v238_v21, %v238_v21  ;;  %v610_v12 = vmul.f32 %v275_v2, %v275_v2  ;;  %v595_v16 = vmul.f32 %v260_v3, %v260_v3  ;;  %v249_v2 = vld [vmem:[#allocation5 + $0x678] sm:$0xff]  ;;  %v280_v3 = vld [vmem:[#allocation5 + $0x770] sm:$0xff] }
  0xe2   :  { %v3877_v38 = vpack.c.bf16 %v574_v31, %v573_v30  ;;  %v3917_v22 = vpack.c.bf16 %v610_v12, %v609_v11  ;;  %v263_v30 = vld [vmem:[#allocation5 + $0x6e8] sm:$0xff]  ;;  %v294_v31 = vld [vmem:[#allocation5 + $0x7e0] sm:$0xff] }
  0xe3   :  { %v347_v11 = vld [vmem:[#allocation5 + $0x988] sm:$0xff] }
  0xe5   :  { %3834 = vmatpush3.bf16.xpose.msra.mxu0 %v3833_v35  ;;  %v592_v35 = vmul.f32 %v257_v27, %v257_v27 }
  0xe6   :  { %3866 = vmatpush3.bf16.xpose.msra.mxu1 %v3865_v36  ;;  %3868 = vmatprep.subr.bf16.mxu0 %v3867_v37  ;;  %v623_v36 = vmul.f32 %v288_v28, %v288_v28  ;;  %v624_v37 = vmul.f32 %v289_v29, %v289_v29  ;;  %v277_v28 = vld [vmem:[#allocation5 + $0x758] sm:$0xff]  ;;  %v262_v29 = vld [vmem:[#allocation5 + $0x6e0] sm:$0xff] }
  0xe7   :  { %3900 = vmatprep.subr.bf16.mxu1 %v3899_v41  ;;  %v3879_v40 = vpack.c.bf16 %v592_v35, %v591_v34  ;;  %v240_v41 = vld [vmem:[#allocation5 + $0x630] sm:$0xff]  ;;  %v580_v34 = vmul.f32 %v245_v25, %v245_v25  ;;  %v611_v35 = vmul.f32 %v276_v26, %v276_v26 }
  0xe8   :  { %v3911_v44 = vpack.c.bf16 %v624_v37, %v623_v36  ;;  %v575_v50 = vmul.f32 %v240_v41, %v240_v41  ;;  %v612_v36 = vmul.f32 %v277_v28, %v277_v28  ;;  %v597_v37 = vmul.f32 %v262_v29, %v262_v29  ;;  %v4891_v28 = vld [vmem:[#allocation5 + $0x808] sm:$0xff]  ;;  %v330_v29 = vld [vmem:[#allocation5 + $0x900] sm:$0xff] }
  0xea   :  { %v3881_v58 = vpack.c.bf16 %v576_v51, %v575_v50  ;;  %v3921_v42 = vpack.c.bf16 %v612_v36, %v611_v35  ;;  %v265_v50 = vld [vmem:[#allocation5 + $0x6f8] sm:$0xff]  ;;  %v296_v51 = vld [vmem:[#allocation5 + $0x7f0] sm:$0xff] }
  0xeb   :  { %v349_v35 = vld [vmem:[#allocation5 + $0x998] sm:$0xff] }
  0xec   :  { %3108 = vmatmul.mubr.f32.vlgmr.msra.gmra.mrb[4].mxu0 %v5340_v0 }
  0xed   :  { %3142 = vmatmul.mubr.f32.vlgmr.msra.gmra.mrb[4].mxu1 %v5340_v0  ;;  %3870 = vmatpush3.bf16.xpose.msra.mxu0 %v3869_v55  ;;  %v594_v55 = vmul.f32 %v259_v47, %v259_v47 }
  0xee   :  { %3902 = vmatpush3.bf16.xpose.msra.mxu1 %v3901_v56  ;;  %3872 = vmatprep.subr.bf16.mxu0 %v3871_v57  ;;  %v625_v56 = vmul.f32 %v290_v48, %v290_v48  ;;  %v626_v57 = vmul.f32 %v291_v49, %v291_v49  ;;  %v279_v48 = vld [vmem:[#allocation5 + $0x768] sm:$0xff]  ;;  %v264_v49 = vld [vmem:[#allocation5 + $0x6f0] sm:$0xff] }
  0xef   :  { %3904 = vmatprep.subr.bf16.mxu1 %v3903_v61  ;;  %3175 = vmatprep.mubr.f32.mxu0 %v5340_v0  ;;  %v3883_v60 = vpack.c.bf16 %v594_v55, %v593_v54  ;;  %v242_v61 = vld [vmem:[#allocation5 + $0x640] sm:$0xff]  ;;  %v582_v54 = vmul.f32 %v247_v45, %v247_v45  ;;  %v613_v55 = vmul.f32 %v278_v46, %v278_v46 }
  0xf0   :  { %3209 = vmatprep.mubr.f32.mxu1 %v5340_v0  ;;  %v3915_v1 = vpack.c.bf16 %v626_v57, %v625_v56  ;;  %v577_v7 = vmul.f32 %v242_v61, %v242_v61  ;;  %v614_v56 = vmul.f32 %v279_v48, %v279_v48  ;;  %v599_v57 = vmul.f32 %v264_v49, %v264_v49  ;;  %v4905_v48 = vld [vmem:[#allocation5 + $0x818] sm:$0xff]  ;;  %v332_v49 = vld [vmem:[#allocation5 + $0x910] sm:$0xff] }
  0xf2   :  { %v3885_v21 = vpack.c.bf16 %v578_v10, %v577_v7  ;;  %v3925_v62 = vpack.c.bf16 %v614_v56, %v613_v55  ;;  %v315_v7 = vld [vmem:[#allocation5 + $0x888] sm:$0xff]  ;;  %v346_v10 = vld [vmem:[#allocation5 + $0x980] sm:$0xff] }
  0xf3   :  { %v351_v55 = vld [vmem:[#allocation5 + $0x9a8] sm:$0xff] }
  0xf5   :  { %3874 = vmatpush3.bf16.xpose.msra.mxu0 %v3873_v17  ;;  %v596_v17 = vmul.f32 %v261_v4, %v261_v4 }
  0xf6   :  { %3906 = vmatpush3.bf16.xpose.msra.mxu1 %v3905_v18  ;;  %3876 = vmatprep.subr.bf16.mxu0 %v3875_v19  ;;  %v627_v18 = vmul.f32 %v292_v5, %v292_v5  ;;  %v628_v19 = vmul.f32 %v293_v6, %v293_v6  ;;  %v281_v5 = vld [vmem:[#allocation5 + $0x778] sm:$0xff]  ;;  %v314_v6 = vld [vmem:[#allocation5 + $0x880] sm:$0xff] }
  0xf7   :  { %3908 = vmatprep.subr.bf16.mxu1 %v3907_v24  ;;  %v3887_v23 = vpack.c.bf16 %v596_v17, %v595_v16  ;;  %v244_v24 = vld [vmem:[#allocation5 + $0x650] sm:$0xff]  ;;  %v584_v16 = vmul.f32 %v249_v2, %v249_v2  ;;  %v615_v17 = vmul.f32 %v280_v3, %v280_v3 }
  0xf8   :  { %v3919_v27 = vpack.c.bf16 %v628_v19, %v627_v18  ;;  %v579_v33 = vmul.f32 %v244_v24, %v244_v24  ;;  %v616_v18 = vmul.f32 %v281_v5, %v281_v5  ;;  %v649_v19 = vmul.f32 %v314_v6, %v314_v6  ;;  %v4925_v5 = vld [vmem:[#allocation5 + $0x828] sm:$0xff]  ;;  %v334_v6 = vld [vmem:[#allocation5 + $0x920] sm:$0xff] }
  0xfa   :  { %v3889_v41 = vpack.c.bf16 %v580_v34, %v579_v33  ;;  %v3929_v25 = vpack.c.bf16 %v616_v18, %v615_v17  ;;  %v4895_v33 = vld [vmem:[#allocation5 + $0x898] sm:$0xff]  ;;  %v348_v34 = vld [vmem:[#allocation5 + $0x990] sm:$0xff] }
  0xfb   :  { %v353_v17 = vld [vmem:[#allocation5 + $0x9b8] sm:$0xff] }
  0xfd   :  { %3878 = vmatpush3.bf16.xpose.msra.mxu0 %v3877_v38  ;;  %v598_v38 = vmul.f32 %v263_v30, %v263_v30 }
  0xfe   :  { %3910 = vmatpush3.bf16.xpose.msra.mxu1 %v3909_v39  ;;  %3880 = vmatprep.subr.bf16.mxu0 %v3879_v40  ;;  %v629_v39 = vmul.f32 %v294_v31, %v294_v31  ;;  %v630_v40 = vmul.f32 %v295_v32, %v295_v32  ;;  %v331_v31 = vld [vmem:[#allocation5 + $0x908] sm:$0xff]  ;;  %v4893_v32 = vld [vmem:[#allocation5 + $0x890] sm:$0xff] }
  0xff   :  { %3912 = vmatprep.subr.bf16.mxu1 %v3911_v44  ;;  %v3891_v43 = vpack.c.bf16 %v598_v38, %v597_v37  ;;  %v246_v44 = vld [vmem:[#allocation5 + $0x660] sm:$0xff]  ;;  %v634_v37 = vmul.f32 %v4891_v28, %v4891_v28  ;;  %v665_v38 = vmul.f32 %v330_v29, %v330_v29 }
 0x100   :  { %v3923_v47 = vpack.c.bf16 %v630_v40, %v629_v39  ;;  %v581_v53 = vmul.f32 %v246_v44, %v246_v44  ;;  %v666_v39 = vmul.f32 %v331_v31, %v331_v31  ;;  %v651_v40 = vmul.f32 %v4893_v32, %v4893_v32  ;;  %v4939_v31 = vld [vmem:[#allocation5 + $0x830] sm:$0xff] }
 0x102   :  { %v3893_v61 = vpack.c.bf16 %v582_v54, %v581_v53  ;;  %v3965_v45 = vpack.c.bf16 %v666_v39, %v665_v38  ;;  %v4909_v53 = vld [vmem:[#allocation5 + $0x8a8] sm:$0xff]  ;;  %v350_v54 = vld [vmem:[#allocation5 + $0x9a0] sm:$0xff] }
 0x103   :  { %v4943_v38 = vld [vmem:[#allocation5 + $0x8c0] sm:$0xff]  ;;  %v4945_v39 = vld [vmem:[#allocation5 + $0x8c8] sm:$0xff] }
 0x105   :  { %3882 = vmatpush3.bf16.xpose.msra.mxu0 %v3881_v58  ;;  %v600_v58 = vmul.f32 %v265_v50, %v265_v50 }
 0x106   :  { %3914 = vmatpush3.bf16.xpose.msra.mxu1 %v3913_v59  ;;  %3884 = vmatprep.subr.bf16.mxu0 %v3883_v60  ;;  %v631_v59 = vmul.f32 %v296_v51, %v296_v51  ;;  %v632_v60 = vmul.f32 %v297_v52, %v297_v52  ;;  %v333_v51 = vld [vmem:[#allocation5 + $0x918] sm:$0xff]  ;;  %v4907_v52 = vld [vmem:[#allocation5 + $0x8a0] sm:$0xff] }
 0x107   :  { %3916 = vmatprep.subr.bf16.mxu1 %v3915_v1  ;;  %v3895_v63 = vpack.c.bf16 %v600_v58, %v599_v57  ;;  %v248_v1 = vld [vmem:[#allocation5 + $0x670] sm:$0xff]  ;;  %v636_v57 = vmul.f32 %v4905_v48, %v4905_v48  ;;  %v667_v58 = vmul.f32 %v332_v49, %v332_v49  ;;  %v658_v49 = vmul.f32 %v4945_v39, %v4945_v39 }
 0x108   :  { %v3927_v4 = vpack.c.bf16 %v632_v60, %v631_v59  ;;  %v583_v12 = vmul.f32 %v248_v1, %v248_v1  ;;  %v668_v59 = vmul.f32 %v333_v51, %v333_v51  ;;  %v653_v60 = vmul.f32 %v4907_v52, %v4907_v52 }
 0x10a   :  { %v3897_v24 = vpack.c.bf16 %v584_v16, %v583_v12  ;;  %v3969_v2 = vpack.c.bf16 %v668_v59, %v667_v58  ;;  %v4929_v12 = vld [vmem:[#allocation5 + $0x8b8] sm:$0xff]  ;;  %v352_v16 = vld [vmem:[#allocation5 + $0x9b0] sm:$0xff] }
 0x10d   :  { %3886 = vmatpush3.bf16.xpose.msra.mxu0 %v3885_v21  ;;  %v650_v21 = vmul.f32 %v315_v7, %v315_v7 }
 0x10e   :  { %3918 = vmatpush3.bf16.xpose.msra.mxu1 %v3917_v22  ;;  %3888 = vmatprep.subr.bf16.mxu0 %v3887_v23  ;;  %v681_v22 = vmul.f32 %v346_v10, %v346_v10  ;;  %v682_v23 = vmul.f32 %v347_v11, %v347_v11  ;;  %v335_v10 = vld [vmem:[#allocation5 + $0x928] sm:$0xff]  ;;  %v4927_v11 = vld [vmem:[#allocation5 + $0x8b0] sm:$0xff] }
 0x10f   :  { %3920 = vmatprep.subr.bf16.mxu1 %v3919_v27  ;;  %v3931_v26 = vpack.c.bf16 %v650_v21, %v649_v19  ;;  %v298_v27 = vld [vmem:[#allocation5 + $0x800] sm:$0xff]  ;;  %v638_v19 = vmul.f32 %v4925_v5, %v4925_v5  ;;  %v669_v21 = vmul.f32 %v334_v6, %v334_v6  ;;  %v4969_v6 = vld [vmem:[#allocation5 + $0x8d8] sm:$0xff] }
 0x110   :  { %v3963_v30 = vpack.c.bf16 %v682_v23, %v681_v22  ;;  %v633_v36 = vmul.f32 %v298_v27, %v298_v27  ;;  %v670_v22 = vmul.f32 %v335_v10, %v335_v10  ;;  %v655_v23 = vmul.f32 %v4927_v11, %v4927_v11  ;;  %v357_v10 = vld [vmem:[#allocation5 + $0x9d8] sm:$0xff] }
 0x112   :  { %v3933_v44 = vpack.c.bf16 %v634_v37, %v633_v36  ;;  %v3973_v29 = vpack.c.bf16 %v670_v22, %v669_v21  ;;  %v337_v37 = vld [vmem:[#allocation5 + $0x938] sm:$0xff]  ;;  %v660_v22 = vmul.f32 %v4969_v6, %v4969_v6 }
 0x115   :  { %3890 = vmatpush3.bf16.xpose.msra.mxu0 %v3889_v41  ;;  %v652_v41 = vmul.f32 %v4895_v33, %v4895_v33 }
 0x116   :  { %3922 = vmatpush3.bf16.xpose.msra.mxu1 %v3921_v42  ;;  %3892 = vmatprep.subr.bf16.mxu0 %v3891_v43  ;;  %v683_v42 = vmul.f32 %v348_v34, %v348_v34  ;;  %v684_v43 = vmul.f32 %v349_v35, %v349_v35  ;;  %v4941_v34 = vld [vmem:[#allocation5 + $0x838] sm:$0xff]  ;;  %v336_v35 = vld [vmem:[#allocation5 + $0x930] sm:$0xff] }
 0x117   :  { %3924 = vmatprep.subr.bf16.mxu1 %v3923_v47  ;;  %v3935_v46 = vpack.c.bf16 %v652_v41, %v651_v40  ;;  %v4903_v47 = vld [vmem:[#allocation5 + $0x810] sm:$0xff]  ;;  %v354_v40 = vld [vmem:[#allocation5 + $0x9c0] sm:$0xff]  ;;  %v355_v41 = vld [vmem:[#allocation5 + $0x9c8] sm:$0xff] }
 0x118   :  { %v3967_v50 = vpack.c.bf16 %v684_v43, %v683_v42  ;;  %v635_v56 = vmul.f32 %v4903_v47, %v4903_v47  ;;  %v639_v42 = vmul.f32 %v4939_v31, %v4939_v31  ;;  %v640_v43 = vmul.f32 %v4941_v34, %v4941_v34 }
 0x119   :  { %v689_v51 = vmul.f32 %v354_v40, %v354_v40  ;;  %v4983_v40 = vld [vmem:[#allocation5 + $0x8e0] sm:$0xff] }
 0x11a   :  { %v3937_v1 = vpack.c.bf16 %v636_v57, %v635_v56  ;;  %v3945_v58 = vpack.c.bf16 %v640_v43, %v639_v42  ;;  %v358_v42 = vld [vmem:[#allocation5 + $0x9e0] sm:$0xff]  ;;  %v359_v43 = vld [vmem:[#allocation5 + $0x9e8] sm:$0xff] }
 0x11d   :  { %3894 = vmatpush3.bf16.xpose.msra.mxu0 %v3893_v61  ;;  %v654_v61 = vmul.f32 %v4909_v53, %v4909_v53 }
 0x11e   :  { %3926 = vmatpush3.bf16.xpose.msra.mxu1 %v3925_v62  ;;  %3896 = vmatprep.subr.bf16.mxu0 %v3895_v63  ;;  %v685_v62 = vmul.f32 %v350_v54, %v350_v54  ;;  %v686_v63 = vmul.f32 %v351_v55, %v351_v55  ;;  %v690_v54 = vmul.f32 %v355_v41, %v355_v41  ;;  %v4985_v41 = vld [vmem:[#allocation5 + $0x8e8] sm:$0xff] }
 0x11f   :  { %3928 = vmatprep.subr.bf16.mxu1 %v3927_v4  ;;  %v3939_v3 = vpack.c.bf16 %v654_v61, %v653_v60  ;;  %v4923_v4 = vld [vmem:[#allocation5 + $0x820] sm:$0xff] }
 0x120   :  { %v3971_v7 = vpack.c.bf16 %v686_v63, %v685_v62  ;;  %v637_v18 = vmul.f32 %v4923_v4, %v4923_v4  ;;  %v4963_v61 = vld [vmem:[#allocation5 + $0x840] sm:$0xff]  ;;  %v4965_v62 = vld [vmem:[#allocation5 + $0x848] sm:$0xff] }
 0x121   :  { %v338_v63 = vld [vmem:[#allocation5 + $0x940] sm:$0xff] }
 0x122   :  { %v3941_v27 = vpack.c.bf16 %v638_v19, %v637_v18  ;;  %v673_v18 = vmul.f32 %v338_v63, %v338_v63 }
 0x125   :  { %3898 = vmatpush3.bf16.xpose.msra.mxu0 %v3897_v24  ;;  %v656_v24 = vmul.f32 %v4929_v12, %v4929_v12 }
 0x126   :  { %3930 = vmatpush3.bf16.xpose.msra.mxu1 %v3929_v25  ;;  %3932 = vmatprep.subr.bf16.mxu0 %v3931_v26  ;;  %v687_v25 = vmul.f32 %v352_v16, %v352_v16  ;;  %v688_v26 = vmul.f32 %v353_v17, %v353_v17  ;;  %v641_v16 = vmul.f32 %v4963_v61, %v4963_v61 }
 0x127   :  { %3964 = vmatprep.subr.bf16.mxu1 %v3963_v30  ;;  %v3943_v30 = vpack.c.bf16 %v656_v24, %v655_v23  ;;  %v642_v17 = vmul.f32 %v4965_v62, %v4965_v62  ;;  %v692_v24 = vmul.f32 %v357_v10, %v357_v10  ;;  %v342_v10 = vld [vmem:[#allocation5 + $0x960] sm:$0xff] }
 0x128   :  { %v3975_v36 = vpack.c.bf16 %v688_v26, %v687_v25 }
 0x129   :  { %v3949_v25 = vpack.c.bf16 %v642_v17, %v641_v16  ;;  %v343_v17 = vld [vmem:[#allocation5 + $0x968] sm:$0xff] }
 0x12c   :  { %3176 = vmatmul.mubr.f32.vlgmr.msra.gmra.mrb[6].mxu0 %v5340_v0 }
 0x12d   :  { %3210 = vmatmul.mubr.f32.vlgmr.msra.gmra.mrb[6].mxu1 %v5340_v0  ;;  %3934 = vmatpush3.bf16.xpose.msra.mxu0 %v3933_v44  ;;  %v671_v44 = vmul.f32 %v336_v35, %v336_v35  ;;  %v340_v35 = vld [vmem:[#allocation5 + $0x950] sm:$0xff] }
 0x12e   :  { %3966 = vmatpush3.bf16.xpose.msra.mxu1 %v3965_v45  ;;  %3936 = vmatprep.subr.bf16.mxu0 %v3935_v46  ;;  %v672_v45 = vmul.f32 %v337_v37, %v337_v37  ;;  %v657_v46 = vmul.f32 %v4943_v38, %v4943_v38  ;;  %v341_v37 = vld [vmem:[#allocation5 + $0x958] sm:$0xff] }
 0x12f   :  { %3968 = vmatprep.subr.bf16.mxu1 %v3967_v50  ;;  %3243 = vmatprep.mubr.f32.mxu0 %v5340_v0 }
 0x130   :  { %3277 = vmatprep.mubr.f32.mxu1 %v5340_v0  ;;  %v3977_v59 = vpack.c.bf16 %v672_v45, %v671_v44  ;;  %v3947_v60 = vpack.c.bf16 %v658_v49, %v657_v46  ;;  %v675_v46 = vmul.f32 %v340_v35, %v340_v35  ;;  %v676_v49 = vmul.f32 %v341_v37, %v341_v37 }
 0x132   :  { %v3985_v63 = vpack.c.bf16 %v676_v49, %v675_v46  ;;  %v5011_v46 = vld [vmem:[#allocation5 + $0x870] sm:$0xff]  ;;  %v5013_v49 = vld [vmem:[#allocation5 + $0x878] sm:$0xff] }
 0x135   :  { %3938 = vmatpush3.bf16.xpose.msra.mxu0 %v3937_v1  ;;  %v3979_v1 = vpack.c.bf16 %v690_v54, %v689_v51  ;;  %v661_v51 = vmul.f32 %v4983_v40, %v4983_v40  ;;  %v662_v54 = vmul.f32 %v4985_v41, %v4985_v41 }
 0x136   :  { %3970 = vmatpush3.bf16.xpose.msra.mxu1 %v3969_v2  ;;  %3940 = vmatprep.subr.bf16.mxu0 %v3939_v3  ;;  %v339_v2 = vld [vmem:[#allocation5 + $0x948] sm:$0xff]  ;;  %v4967_v3 = vld [vmem:[#allocation5 + $0x8d0] sm:$0xff] }
 0x137   :  { %3972 = vmatprep.subr.bf16.mxu1 %v3971_v7  ;;  %v356_v7 = vld [vmem:[#allocation5 + $0x9d0] sm:$0xff]  ;;  %v674_v19 = vmul.f32 %v339_v2, %v339_v2  ;;  %v659_v21 = vmul.f32 %v4967_v3, %v4967_v3  ;;  %v4995_v2 = vld [vmem:[#allocation5 + $0x860] sm:$0xff] }
 0x138   :  { %v691_v23 = vmul.f32 %v356_v7, %v356_v7  ;;  %v4997_v7 = vld [vmem:[#allocation5 + $0x868] sm:$0xff] }
 0x139   :  { %v3981_v26 = vpack.c.bf16 %v674_v19, %v673_v18  ;;  %v4999_v18 = vld [vmem:[#allocation5 + $0x8f0] sm:$0xff]  ;;  %v5001_v19 = vld [vmem:[#allocation5 + $0x8f8] sm:$0xff] }
 0x13a   :  { %v664_v35 = vmul.f32 %v5001_v19, %v5001_v19 }
 0x13d   :  { %3942 = vmatpush3.bf16.xpose.msra.mxu0 %v3941_v27  ;;  %v3951_v27 = vpack.c.bf16 %v660_v22, %v659_v21  ;;  %v360_v21 = vld [vmem:[#allocation5 + $0x9f0] sm:$0xff]  ;;  %v361_v22 = vld [vmem:[#allocation5 + $0x9f8] sm:$0xff] }
 0x13e   :  { %3974 = vmatpush3.bf16.xpose.msra.mxu1 %v3973_v29  ;;  %3944 = vmatprep.subr.bf16.mxu0 %v3943_v30  ;;  %v4979_v29 = vld [vmem:[#allocation5 + $0x850] sm:$0xff]  ;;  %v4981_v30 = vld [vmem:[#allocation5 + $0x858] sm:$0xff]  ;;  %v696_v37 = vmul.f32 %v361_v22, %v361_v22  ;;  %v5021_v22 = vld [vmem:[#allocation5 + $0xa08] sm:$0xff] }
 0x13f   :  { %v4955_v50 = vpop.f32.mrb[0].mxu0  ;;  %3976 = vmatprep.subr.bf16.mxu1 %v3975_v36  ;;  %v3983_v36 = vpack.c.bf16 %v692_v24, %v691_v23  ;;  %v643_v44 = vmul.f32 %v4979_v29, %v4979_v29  ;;  %v644_v45 = vmul.f32 %v4981_v30, %v4981_v30  ;;  %v645_v23 = vmul.f32 %v4995_v2, %v4995_v2 }
 0x140   :  { %v4957_v55 = vpop.f32.mrb[1].mxu0  ;;  %v4959_v56 = vpop.f32.mrb[0].mxu1  ;;  %v646_v24 = vmul.f32 %v4997_v7, %v4997_v7 }
 0x141   :  { %v4961_v57 = vpop.f32.mrb[1].mxu1 }
 0x145   :  { %3946 = vmatpush3.bf16.xpose.msra.mxu0 %v3945_v58  ;;  %v693_v58 = vmul.f32 %v358_v42, %v358_v42  ;;  %v373_v42 = vpop.xlane.xlu0 %372 }
 0x146   :  { %3978 = vmatpush3.bf16.xpose.msra.mxu1 %v3977_v59  ;;  %3948 = vmatprep.subr.bf16.mxu0 %v3947_v60  ;;  %v694_v59 = vmul.f32 %v359_v43, %v359_v43  ;;  %v3953_v60 = vpack.c.bf16 %v644_v45, %v643_v44  ;;  %v3957_v43 = vpack.c.bf16 %v646_v24, %v645_v23  ;;  %v4436_v23 = vld [vmem:[#allocation5 + $0x80] sm:$0xff]  ;;  %v4437_v24 = vld [vmem:[#allocation5 + $0x88] sm:$0xff] }
 0x147   :  { %3980 = vmatprep.subr.bf16.mxu1 %v3979_v1  ;;  %v3955_v1 = vpack.c.bf16 %v662_v54, %v661_v51  ;;  %v344_v54 = vld [vmem:[#allocation5 + $0x970] sm:$0xff] }
 0x148   :  { %v3987_v16 = vpack.c.bf16 %v694_v59, %v693_v58  ;;  %v345_v58 = vld [vmem:[#allocation5 + $0x978] sm:$0xff]  ;;  %v374_v59 = vmax.f32 %v373_v42, 1e-24  ;;  %v5028_v42 = vld [vmem:[#allocation5 + $0xa10] sm:$0xff] }
 0x14a   :  { %4350 = vrsqrt.f32 %v374_v59  ;;  %v699_v59 = vmul.f32 %v5028_v42, %v5028_v42 }
 0x14d   :  { %3950 = vmatpush3.bf16.xpose.msra.mxu0 %v3949_v25  ;;  %v677_v25 = vmul.f32 %v342_v10, %v342_v10  ;;  %v680_v10 = vmul.f32 %v345_v58, %v345_v58 }
 0x14e   :  { %3982 = vmatpush3.bf16.xpose.msra.mxu1 %v3981_v26  ;;  %3952 = vmatprep.subr.bf16.mxu0 %v3951_v27  ;;  %v678_v26 = vmul.f32 %v343_v17, %v343_v17  ;;  %v663_v27 = vmul.f32 %v4999_v18, %v4999_v18 }
 0x14f   :  { %3984 = vmatprep.subr.bf16.mxu1 %v3983_v36  ;;  %v695_v36 = vmul.f32 %v360_v21, %v360_v21  ;;  %v5019_v21 = vld [vmem:[#allocation5 + $0xa00] sm:$0xff] }
 0x150   :  { %v3989_v44 = vpack.c.bf16 %v678_v26, %v677_v25  ;;  %v3959_v45 = vpack.c.bf16 %v664_v35, %v663_v27  ;;  %v4007_v25 = vpack.c.bf16 %v4437_v24, %v4436_v23  ;;  %v697_v26 = vmul.f32 %v5019_v21, %v5019_v21  ;;  %v5047_v23 = vld [vmem:[#allocation5 + $0xa20] sm:$0xff]  ;;  %v5049_v24 = vld [vmem:[#allocation5 + $0xa28] sm:$0xff] }
 0x151   :  { %v3991_v51 = vpack.c.bf16 %v696_v37, %v695_v36  ;;  %v698_v27 = vmul.f32 %v5021_v22, %v5021_v22  ;;  %v5338_v35 = vmov 0.0|0.0  }
 0x153   :  { %v3996_v37 = vpack.c.bf16 %v698_v27, %v697_v26  ;;  %v702_v26 = vmul.f32 %v5049_v24, %v5049_v24 }
 0x154   :  { %v4351_v36 = vpop.eup %4350 }
 0x155   :  { %3954 = vmatpush3.bf16.xpose.msra.mxu0 %v3953_v60  ;;  %v647_v60 = vmul.f32 %v5011_v46, %v5011_v46 }
 0x156   :  { %3986 = vmatpush3.bf16.xpose.msra.mxu1 %v3985_v63  ;;  %3956 = vmatprep.subr.bf16.mxu0 %v3955_v1  ;;  %v648_v63 = vmul.f32 %v5013_v49, %v5013_v49  ;;  %v679_v1 = vmul.f32 %v344_v54, %v344_v54  ;;  %v4440_v54 = vld [vmem:[#allocation2] sm:$0xff] }
 0x157   :  { %3988 = vmatprep.subr.bf16.mxu1 %v3987_v16  ;;  %v5033_v58 = vmul.f32 %v4440_v54, %v4351_v36  ;;  %v4445_v36 = vld [vmem:[#allocation5 + $0x20] sm:$0xff]  ;;  %v4447_v54 = vld [vmem:[#allocation5 + $0xb0] sm:$0xff] }
 0x158   :  { %v3961_v16 = vpack.c.bf16 %v648_v63, %v647_v60  ;;  %v3993_v17 = vpack.c.bf16 %v680_v10, %v679_v1  ;;  %v5337_v63 = vmov 0.0   ;;  %v4441_v10 = vld [vmem:[#allocation5 + $0x10] sm:$0xff] }
 0x15d   :  { %3958 = vmatpush3.bf16.xpose.msra.mxu0 %v3957_v43  ;;  %v5030_v43 = vld [vmem:[#allocation5 + $0xa18] sm:$0xff] }
 0x15e   :  { %3990 = vmatpush3.bf16.xpose.msra.mxu1 %v3989_v44  ;;  %3960 = vmatprep.subr.bf16.mxu0 %v3959_v45  ;;  %v4438_v44 = vld [vmem:[#allocation5 + $0x90] sm:$0xff]  ;;  %v4439_v45 = vld [vmem:[#allocation5 + $0x98] sm:$0xff]  ;;  %v700_v60 = vmul.f32 %v5030_v43, %v5030_v43 }
 0x15f   :  { %3992 = vmatprep.subr.bf16.mxu1 %v3991_v51  ;;  %v4011_v51 = vpack.c.bf16 %v4439_v45, %v4438_v44  ;;  %v5056_v45 = vld [vmem:[#allocation5 + $0xa30] sm:$0xff] }
 0x160   :  { %v3999_v1 = vpack.c.bf16 %v700_v60, %v699_v59  ;;  %v4448_v59 = vld [vmem:[#allocation5 + $0xb8] sm:$0xff] }
 0x161   :  { %v4019_v60 = vpack.c.bf16 %v4448_v59, %v4447_v54  ;;  %v4453_v59 = vld [vmem:[#allocation5 + $0xc0] sm:$0xff] }
 0x165   :  { %3962 = vmatpush3.bf16.xpose.msra.mxu0 %v3961_v16  ;;  %v4442_v16 = vld [vmem:[#allocation5 + $0x18] sm:$0xff] }
 0x166   :  { %3994 = vmatpush3.bf16.xpose.msra.mxu1 %v3993_v17  ;;  %3995 = vmatprep.subr.bf16.mxu0 %v5338_v35  ;;  %v4013_v17 = vpack.c.bf16 %v4442_v16, %v4441_v10 }
 0x167   :  { %4008 = vmatprep.subr.bf16.mxu1 %v4007_v25  ;;  %v701_v25 = vmul.f32 %v5047_v23, %v5047_v23 }
 0x169   :  { %v4002_v27 = vpack.c.bf16 %v702_v26, %v701_v25  ;;  %v4449_v25 = vld [vmem:[#allocation5 + $0x30] sm:$0xff]  ;;  %v4450_v26 = vld [vmem:[#allocation5 + $0x38] sm:$0xff] }
 0x16c   :  { %3244 = vmatmul.mubr.f32.vlgmr.msra.gmra.mrb[8].mxu0 %v5340_v0 }
 0x16d   :  { %3278 = vmatmul.mubr.f32.vlgmr.msra.gmra.mrb[8].mxu1 %v5340_v0  ;;  %3997 = vmatpush3.bf16.xpose.msra.mxu0 %v3996_v37  ;;  %v4446_v37 = vld [vmem:[#allocation5 + $0x28] sm:$0xff]  ;;  %v4457_v0 = vld [vmem:[#allocation5 + $0x190] sm:$0xff] }
 0x16e   :  { %4010 = vmatpush3.bf16.xpose.msra.mxu1 %v4009_v13  ;;  %3998 = vmatprep.subr.bf16.mxu0 %v5338_v35  ;;  %v4015_v13 = vpack.c.bf16 %v4444_v9, %v4443_v8  ;;  %v4017_v44 = vpack.c.bf16 %v4446_v37, %v4445_v36  ;;  %v4451_v36 = vld [vmem:[#allocation5 + $0x180] sm:$0xff]  ;;  %v4452_v37 = vld [vmem:[#allocation5 + $0x188] sm:$0xff] }
 0x16f   :  { %4012 = vmatprep.subr.bf16.mxu1 %v4011_v51  ;;  %3653 = vmatprep.mubr.msk.f32.mxu0 %vm4802_vm0, %v5337_v63  ;;  %v5058_v51 = vld [vmem:[#allocation5 + $0xa38] sm:$0x3f]  ;;  %v4039_v54 = vpack.c.bf16 %v4452_v37, %v4451_v36  ;;  %v4466_v37 = vld [vmem:[#allocation5 + $0x1a8] sm:$0xff] }
 0x170   :  { %3320 = vmatprep.mubr.f32.mxu1 %v5033_v58  ;;  %5342 = vst [vmem:[#allocation11_spill] sm:$0xff] %v5058_v51  ;;  %v704_v10 = vmul.f32 %v5058_v51, %v5058_v51  ;;  %v4464_v36 = vld [vmem:[#allocation5 + $0x58] sm:$0xff] }
 0x175   :  { %4000 = vmatpush3.bf16.xpose.msra.mxu0 %v3999_v1  ;;  %v703_v1 = vmul.f32 %v5056_v45, %v5056_v45 }
 0x176   :  { %4014 = vmatpush3.bf16.xpose.msra.mxu1 %v4013_v17  ;;  %4001 = vmatprep.subr.bf16.mxu0 %v5338_v35 }
 0x177   :  { %4016 = vmatprep.subr.bf16.mxu1 %v4015_v13  ;;  %v4005_v13 = vpack.c.bf16 %v704_v10, %v703_v1  ;;  %v4459_v1 = vld [vmem:[#allocation5 + $0xd0] sm:$0xff]  ;;  %v4460_v10 = vld [vmem:[#allocation5 + $0xd8] sm:$0xff] }
 0x178   :  { %v4027_v51 = vpack.c.bf16 %v4460_v10, %v4459_v1  ;;  %v4471_v1 = vld [vmem:[#allocation5 + $0x60] sm:$0xff]  ;;  %v4472_v10 = vld [vmem:[#allocation5 + $0x68] sm:$0xff] }
 0x17d   :  { %4003 = vmatpush3.bf16.xpose.msra.mxu0 %v4002_v27  ;;  %v4021_v27 = vpack.c.bf16 %v4450_v26, %v4449_v25  ;;  %v5345_v25 = vmov 1.0   ;;  %v5346_v26 = vpack.c.bf16 %v4871_v15, %v4869_v14  ;;  %v4804_v14 = vmov 0   ;;  %v370_v15 = vld [vmem:[%s5335_s2] sm:$0xff]  ;;  %s4805_s2 = smov [#allocation7]  }
 0x17e   :  { %4018 = vmatpush3.bf16.xpose.msra.mxu1 %v4017_v44  ;;  %4004 = vmatprep.subr.bf16.mxu0 %v5338_v35  ;;  %v4454_v44 = vld [vmem:[#allocation5 + $0xc8] sm:$0xff]  ;;  %s2908_s11 = sshll.u32 %s4805_s2, 4  ;;  %s2909_s11 = int_to_ptr.vmem [resolvable:$true] %s2908_s11 }
 0x17f   :  { %v5065_v16 = vpop.f32.mrb[2].mxu0  ;;  %4020 = vmatprep.subr.bf16.mxu1 %v4019_v60  ;;  %v4023_v63 = vpack.c.bf16 %v4454_v44, %v4453_v59  ;;  %v4455_v60 = vld [vmem:[#allocation5 + $0x40] sm:$0xff]  ;;  %v4456_v35 = vld [vmem:[#allocation5 + $0x48] sm:$0xff]  ;;  %4349 = vset.pattern.permute.xlu0 %v4804_v14  ;;  %s4768_s12 = scalar_lea.vmem %s2909_s11, 2688  ;;  %p4773_p3 = scmp.lt.s32.totalorder %s2909_s11, %s2909_s11 }
 0x180   :  { %v5067_v17 = vpop.f32.mrb[3].mxu0  ;;  %v5069_v8 = vpop.f32.mrb[2].mxu1  ;;  %v4025_v20 = vpack.c.bf16 %v4456_v35, %v4455_v60  ;;  %v4467_v59 = vld [vmem:[#allocation5 + $0xe0] sm:$0xff]  ;;  %v4468_v44 = vld [vmem:[#allocation5 + $0xe8] sm:$0xff]  ;;  %2815 = vperm.xlu0 %4349, %v370_v15   ;;  %p4769_p2 = scmp.ne.s32.totalorder %s2909_s11, %s4768_s12  ;;  %p4774_p4 = scmp.lt.s32.totalorder %s4768_s12, %s4768_s12 }
 0x181   :  { %5343 = vst [vmem:[#allocation12_spill] sm:$0xff] %v5069_v8  ;;  %v5071_v9 = vpop.f32.mrb[3].mxu1  ;;  %v4458_v8 = vld [vmem:[#allocation5 + $0x198] sm:$0xff]  ;;  %v4031_v60 = vpack.c.bf16 %v4468_v44, %v4467_v59  ;;  %v4482_v14 = vld [vmem:[#allocation5 + $0x1c8] sm:$0xff] }
 0x182   :  { %5344 = vst [vmem:[#allocation13_spill] sm:$0xff] %v5071_v9  ;;  %v4043_v9 = vpack.c.bf16 %v4458_v8, %v4457_v0  ;;  %v4465_v8 = vld [vmem:[#allocation5 + $0x1a0] sm:$0xff]  ;;  %v4480_v59 = vld [vmem:[#allocation5 + $0x78] sm:$0xff]  ;;  %p4775_p5 = por %p4774_p4, %p4773_p3 }
 0x184   :  { %p4776_p6 = pnand %p4775_p5, %p4769_p2 }
 0x185   :  { %4006 = vmatpush3.bf16.xpose.msra.mxu0 %v4005_v13  ;;  %v4462_v13 = vld [vmem:[#allocation5 + $0x118] sm:$0xff] }
 0x186   :  { %4022 = vmatpush3.bf16.xpose.msra.mxu1 %v4021_v27  ;;  %4040 = vmatprep.subr.bf16.mxu0 %v4039_v54  ;;  %v4463_v27 = vld [vmem:[#allocation5 + $0x50] sm:$0xff]  ;;  %v4047_v54 = vpack.c.bf16 %v4466_v37, %v4465_v8  ;;  %v4478_v8 = vld [vmem:[#allocation5 + $0x138] sm:$0xff] }
 0x187   :  { %4024 = vmatprep.subr.bf16.mxu1 %v4023_v63  ;;  %v4461_v63 = vld [vmem:[#allocation5 + $0x110] sm:$0xff]  ;;  %v4029_v0 = vpack.c.bf16 %v4464_v36, %v4463_v27  ;;  %v4476_v27 = vld [vmem:[#allocation5 + $0xf8] sm:$0xff] }
 0x188   :  { %v4045_v35 = vpack.c.bf16 %v4462_v13, %v4461_v63  ;;  %v4474_v63 = vld [vmem:[#allocation5 + $0x1b8] sm:$0xff] }
 0x18c   :  { %3654 = vmatmul.mubr.f32.vlgmr.msra.gmra.mrb[10].mxu0 %v5345_v25  ;;  %v4033_v25 = vpack.c.bf16 %v4472_v10, %v4471_v1  ;;  %v4486_v10 = vld [vmem:[#allocation5 + $0x148] sm:$0xff] }
 0x18d   :  { %4042 = vmatpush3.bf16.xpose.msra.mxu0 %v5346_v26  ;;  %3354 = vmatprep.mubr.f32.mxu0 %v5033_v58  ;;  %v4473_v26 = vld [vmem:[#allocation5 + $0x1b0] sm:$0xff] }
 0x18e   :  { %4026 = vmatpush3.bf16.xpose.msra.mxu1 %v4025_v20  ;;  %4044 = vmatprep.subr.bf16.mxu0 %v4043_v9  ;;  %v4469_v20 = vld [vmem:[#allocation5 + $0x120] sm:$0xff]  ;;  %v4051_v13 = vpack.c.bf16 %v4474_v63, %v4473_v26  ;;  %v4488_v63 = vld [vmem:[#allocation5 + $0x208] sm:$0xff] }
 0x18f   :  { %4028 = vmatprep.subr.bf16.mxu1 %v4027_v51  ;;  %v4470_v51 = vld [vmem:[#allocation5 + $0x128] sm:$0xff]  ;;  %v4487_v26 = vld [vmem:[#allocation5 + $0x200] sm:$0xff] }
 0x190   :  { %v4049_v9 = vpack.c.bf16 %v4470_v51, %v4469_v20  ;;  %v4483_v20 = vld [vmem:[#allocation5 + $0x280] sm:$0xff]  ;;  %v4484_v51 = vld [vmem:[#allocation5 + $0x288] sm:$0xff] }
 0x191   :  { %v4071_v1 = vpack.c.bf16 %v4484_v51, %v4483_v20  ;;  %v4497_v20 = vld [vmem:[#allocation5 + $0x1e0] sm:$0xff]  ;;  %v4498_v51 = vld [vmem:[#allocation5 + $0x1e8] sm:$0xff] }
 0x195   :  { %4046 = vmatpush3.bf16.xpose.msra.mxu0 %v4045_v35  ;;  %v4475_v35 = vld [vmem:[#allocation5 + $0xf0] sm:$0xff] }
 0x196   :  { %4030 = vmatpush3.bf16.xpose.msra.mxu1 %v4029_v0  ;;  %4048 = vmatprep.subr.bf16.mxu0 %v4047_v54  ;;  %v4035_v36 = vpack.c.bf16 %v4476_v27, %v4475_v35  ;;  %v4477_v0 = vld [vmem:[#allocation5 + $0x130] sm:$0xff]  ;;  %v4490_v27 = vld [vmem:[#allocation5 + $0x1d8] sm:$0xff] }
 0x197   :  { %4032 = vmatprep.subr.bf16.mxu1 %v4031_v60  ;;  %v4053_v37 = vpack.c.bf16 %v4478_v8, %v4477_v0  ;;  %v4479_v54 = vld [vmem:[#allocation5 + $0x70] sm:$0xff]  ;;  %v4481_v60 = vld [vmem:[#allocation5 + $0x1c0] sm:$0xff]  ;;  %v4492_v8 = vld [vmem:[#allocation5 + $0x298] sm:$0xff] }
 0x198   :  { %v4037_v44 = vpack.c.bf16 %v4480_v59, %v4479_v54  ;;  %v4055_v15 = vpack.c.bf16 %v4482_v14, %v4481_v60  ;;  %v4489_v35 = vld [vmem:[#allocation5 + $0x1d0] sm:$0xff]  ;;  %v4494_v59 = vld [vmem:[#allocation5 + $0x158] sm:$0xff] }
 0x199   :  { %v4491_v0 = vld [vmem:[#allocation5 + $0x290] sm:$0xff]  ;;  %v4496_v14 = vld [vmem:[#allocation5 + $0x218] sm:$0xff] }
 0x19a   :  { %v4075_v54 = vpack.c.bf16 %v4492_v8, %v4491_v0  ;;  %v4495_v60 = vld [vmem:[#allocation5 + $0x210] sm:$0xff]  ;;  %v4506_v8 = vld [vmem:[#allocation5 + $0x1f8] sm:$0xff] }
 0x19b   :  { %v4505_v0 = vld [vmem:[#allocation5 + $0x1f0] sm:$0xff] }
 0x19d   :  { %4050 = vmatpush3.bf16.xpose.msra.mxu0 %v4049_v9  ;;  %v4485_v9 = vld [vmem:[#allocation5 + $0x140] sm:$0xff] }
 0x19e   :  { %4034 = vmatpush3.bf16.xpose.msra.mxu1 %v4033_v25  ;;  %4052 = vmatprep.subr.bf16.mxu0 %v4051_v13  ;;  %v4057_v25 = vpack.c.bf16 %v4486_v10, %v4485_v9  ;;  %v4073_v13 = vpack.c.bf16 %v4488_v63, %v4487_v26  ;;  %v4499_v9 = vld [vmem:[#allocation5 + $0x2a0] sm:$0xff]  ;;  %v4500_v10 = vld [vmem:[#allocation5 + $0x2a8] sm:$0xff] }
 0x19f   :  { %4036 = vmatprep.subr.bf16.mxu1 %v4035_v36  ;;  %v4059_v36 = vpack.c.bf16 %v4490_v27, %v4489_v35  ;;  %v4079_v26 = vpack.c.bf16 %v4500_v10, %v4499_v9  ;;  %v4502_v63 = vld [vmem:[#allocation5 + $0x168] sm:$0xff]  ;;  %v4503_v35 = vld [vmem:[#allocation5 + $0x220] sm:$0xff]  ;;  %v4511_v10 = vld [vmem:[#allocation5 + $0x230] sm:$0xff] }
 0x1a0   :  { %v4504_v27 = vld [vmem:[#allocation5 + $0x228] sm:$0xff] }
 0x1a5   :  { %4054 = vmatpush3.bf16.xpose.msra.mxu0 %v4053_v37  ;;  %v4493_v37 = vld [vmem:[#allocation5 + $0x150] sm:$0xff] }
 0x1a6   :  { %4038 = vmatpush3.bf16.xpose.msra.mxu1 %v4037_v44  ;;  %4056 = vmatprep.subr.bf16.mxu0 %v4055_v15  ;;  %v4061_v44 = vpack.c.bf16 %v4494_v59, %v4493_v37  ;;  %v4077_v15 = vpack.c.bf16 %v4496_v14, %v4495_v60  ;;  %v4507_v37 = vld [vmem:[#allocation5 + $0x2b0] sm:$0xff]  ;;  %v4508_v59 = vld [vmem:[#allocation5 + $0x2b8] sm:$0xff] }
 0x1a7   :  { %4072 = vmatprep.subr.bf16.mxu1 %v4071_v1  ;;  %v4063_v1 = vpack.c.bf16 %v4498_v51, %v4497_v20  ;;  %v4083_v60 = vpack.c.bf16 %v4508_v59, %v4507_v37  ;;  %v4509_v51 = vld [vmem:[#allocation5 + $0x170] sm:$0xff]  ;;  %v4519_v59 = vld [vmem:[#allocation5 + $0x240] sm:$0xff] }
 0x1ad   :  { %3321 = vmatmul.mubr.f32.vlgmr.msra.gmra.mrb[10].mxu1 %v5033_v58  ;;  %4058 = vmatpush3.bf16.xpose.msra.mxu0 %v4057_v25  ;;  %v4501_v25 = vld [vmem:[#allocation5 + $0x160] sm:$0xff] }
 0x1ae   :  { %4074 = vmatpush3.bf16.xpose.msra.mxu1 %v4073_v13  ;;  %3388 = vmatprep.mubr.f32.mxu1 %v5033_v58  ;;  %v4065_v13 = vpack.c.bf16 %v4502_v63, %v4501_v25  ;;  %v4513_v63 = vld [vmem:[#allocation5 + $0x380] sm:$0xff] }
 0x1af   :  { %4060 = vmatprep.subr.bf16.mxu0 %v4059_v36  ;;  %4076 = vmatprep.subr.bf16.mxu1 %v4075_v54  ;;  %v4081_v36 = vpack.c.bf16 %v4504_v27, %v4503_v35  ;;  %v4067_v54 = vpack.c.bf16 %v4506_v8, %v4505_v0  ;;  %v4514_v35 = vld [vmem:[#allocation5 + $0x388] sm:$0xff]  ;;  %v4515_v27 = vld [vmem:[#allocation5 + $0x2c0] sm:$0xff] }
 0x1b0   :  { %v4517_v8 = vld [vmem:[#allocation5 + $0x300] sm:$0xff] }
 0x1b5   :  { %4062 = vmatpush3.bf16.xpose.msra.mxu0 %v4061_v44 }
 0x1b6   :  { %4078 = vmatpush3.bf16.xpose.msra.mxu1 %v4077_v15  ;;  %4064 = vmatprep.subr.bf16.mxu0 %v4063_v1  ;;  %v4510_v1 = vld [vmem:[#allocation5 + $0x178] sm:$0xff] }
 0x1b7   :  { %4080 = vmatprep.subr.bf16.mxu1 %v4079_v26  ;;  %v4069_v9 = vpack.c.bf16 %v4510_v1, %v4509_v51  ;;  %v4512_v26 = vld [vmem:[#allocation5 + $0x238] sm:$0xff]  ;;  %v4521_v51 = vld [vmem:[#allocation5 + $0x390] sm:$0xff] }
 0x1b8   :  { %v4085_v25 = vpack.c.bf16 %v4512_v26, %v4511_v10  ;;  %v4522_v1 = vld [vmem:[#allocation5 + $0x398] sm:$0xff]  ;;  %v4523_v10 = vld [vmem:[#allocation5 + $0x2d0] sm:$0xff] }
 0x1b9   :  { %v4524_v26 = vld [vmem:[#allocation5 + $0x2d8] sm:$0xff] }
 0x1bd   :  { %4066 = vmatpush3.bf16.xpose.msra.mxu0 %v4065_v13  ;;  %v4103_v13 = vpack.c.bf16 %v4514_v35, %v4513_v63  ;;  %v4527_v35 = vld [vmem:[#allocation5 + $0x250] sm:$0xff] }
 0x1be   :  { %4082 = vmatpush3.bf16.xpose.msra.mxu1 %v4081_v36  ;;  %4068 = vmatprep.subr.bf16.mxu0 %v4067_v54  ;;  %v4516_v36 = vld [vmem:[#allocation5 + $0x2c8] sm:$0xff] }
 0x1bf   :  { %v5083_v14 = vpop.f32.mrb[4].mxu0  ;;  %4084 = vmatprep.subr.bf16.mxu1 %v4083_v60  ;;  %v4087_v0 = vpack.c.bf16 %v4516_v36, %v4515_v27  ;;  %v4518_v54 = vld [vmem:[#allocation5 + $0x308] sm:$0xff]  ;;  %v4529_v36 = vld [vmem:[#allocation5 + $0x3a0] sm:$0xff] }
 0x1c0   :  { %v5085_v44 = vpop.f32.mrb[5].mxu0  ;;  %v5087_v15 = vpop.f32.mrb[4].mxu1  ;;  %v4105_v37 = vpack.c.bf16 %v4518_v54, %v4517_v8  ;;  %v4520_v60 = vld [vmem:[#allocation5 + $0x248] sm:$0xff]  ;;  %v4531_v54 = vld [vmem:[#allocation5 + $0x2e0] sm:$0xff] }
 0x1c1   :  { %5347 = vst [vmem:[#allocation14_spill] sm:$0xff] %v5085_v44  ;;  %5348 = vst [vmem:[#allocation15_spill] sm:$0xff] %v5087_v15  ;;  %v5089_v20 = vpop.f32.mrb[5].mxu1  ;;  %v4107_v15 = vpack.c.bf16 %v4522_v1, %v4521_v51  ;;  %v4091_v44 = vpack.c.bf16 %v4524_v26, %v4523_v10  ;;  %v4536_v51 = vld [vmem:[#allocation5 + $0x268] sm:$0xff]  ;;  %v4537_v10 = vld [vmem:[#allocation5 + $0x3b0] sm:$0xff] }
 0x1c2   :  { %5349 = vst [vmem:[#allocation16_spill] sm:$0xff] %v5089_v20  ;;  %v4089_v20 = vpack.c.bf16 %v4520_v60, %v4519_v59  ;;  %v4532_v59 = vld [vmem:[#allocation5 + $0x2e8] sm:$0xff]  ;;  %v4538_v26 = vld [vmem:[#allocation5 + $0x3b8] sm:$0xff] }
 0x1c3   :  { %v4095_v60 = vpack.c.bf16 %v4532_v59, %v4531_v54  ;;  %v4545_v59 = vld [vmem:[#allocation5 + $0x3c0] sm:$0xff] }
 0x1c5   :  { %4070 = vmatpush3.bf16.xpose.msra.mxu0 %v4069_v9  ;;  %v4525_v9 = vld [vmem:[#allocation5 + $0x310] sm:$0xff] }
 0x1c6   :  { %4086 = vmatpush3.bf16.xpose.msra.mxu1 %v4085_v25  ;;  %4104 = vmatprep.subr.bf16.mxu0 %v4103_v13  ;;  %v4526_v25 = vld [vmem:[#allocation5 + $0x318] sm:$0xff] }
 0x1c7   :  { %4088 = vmatprep.subr.bf16.mxu1 %v4087_v0  ;;  %v4109_v63 = vpack.c.bf16 %v4526_v25, %v4525_v9  ;;  %v4528_v13 = vld [vmem:[#allocation5 + $0x258] sm:$0xff]  ;;  %v4530_v0 = vld [vmem:[#allocation5 + $0x3a8] sm:$0xff]  ;;  %v4115_v9 = vpack.c.bf16 %v4538_v26, %v4537_v10  ;;  %v4539_v25 = vld [vmem:[#allocation5 + $0x2f0] sm:$0xff] }
 0x1c8   :  { %v4093_v27 = vpack.c.bf16 %v4528_v13, %v4527_v35  ;;  %v4111_v8 = vpack.c.bf16 %v4530_v0, %v4529_v36  ;;  %v4540_v35 = vld [vmem:[#allocation5 + $0x2f8] sm:$0xff]  ;;  %v4543_v0 = vld [vmem:[#allocation5 + $0x270] sm:$0xff]  ;;  %v4551_v26 = vld [vmem:[#allocation5 + $0x400] sm:$0xff] }
 0x1c9   :  { %v4099_v13 = vpack.c.bf16 %v4540_v35, %v4539_v25  ;;  %v4553_v35 = vld [vmem:[#allocation5 + $0x3d0] sm:$0xff] }
 0x1cc   :  { %3355 = vmatmul.mubr.f32.vlgmr.msra.gmra.mrb[12].mxu0 %v5033_v58 }
 0x1cd   :  { %4106 = vmatpush3.bf16.xpose.msra.mxu0 %v4105_v37  ;;  %3422 = vmatprep.mubr.f32.mxu0 %v5033_v58  ;;  %v4533_v37 = vld [vmem:[#allocation5 + $0x320] sm:$0xff] }
 0x1ce   :  { %4090 = vmatpush3.bf16.xpose.msra.mxu1 %v4089_v20  ;;  %4108 = vmatprep.subr.bf16.mxu0 %v4107_v15  ;;  %v4534_v20 = vld [vmem:[#allocation5 + $0x328] sm:$0xff] }
 0x1cf   :  { %4092 = vmatprep.subr.bf16.mxu1 %v4091_v44  ;;  %v4113_v15 = vpack.c.bf16 %v4534_v20, %v4533_v37  ;;  %v4535_v44 = vld [vmem:[#allocation5 + $0x260] sm:$0xff] }
 0x1d0   :  { %v4097_v1 = vpack.c.bf16 %v4536_v51, %v4535_v44  ;;  %v4547_v20 = vld [vmem:[#allocation5 + $0x480] sm:$0xff]  ;;  %v4548_v44 = vld [vmem:[#allocation5 + $0x488] sm:$0xff] }
 0x1d1   :  { %v4135_v51 = vpack.c.bf16 %v4548_v44, %v4547_v20  ;;  %v4561_v44 = vld [vmem:[#allocation5 + $0x3e0] sm:$0xff] }
 0x1d5   :  { %4110 = vmatpush3.bf16.xpose.msra.mxu0 %v4109_v63  ;;  %v4541_v63 = vld [vmem:[#allocation5 + $0x330] sm:$0xff] }
 0x1d6   :  { %4094 = vmatpush3.bf16.xpose.msra.mxu1 %v4093_v27  ;;  %4112 = vmatprep.subr.bf16.mxu0 %v4111_v8  ;;  %v4542_v27 = vld [vmem:[#allocation5 + $0x338] sm:$0xff] }
 0x1d7   :  { %4096 = vmatprep.subr.bf16.mxu1 %v4095_v60  ;;  %v4117_v36 = vpack.c.bf16 %v4542_v27, %v4541_v63  ;;  %v4544_v8 = vld [vmem:[#allocation5 + $0x278] sm:$0xff]  ;;  %v4546_v60 = vld [vmem:[#allocation5 + $0x3c8] sm:$0xff]  ;;  %v4555_v27 = vld [vmem:[#allocation5 + $0x490] sm:$0xff] }
 0x1d8   :  { %v4101_v54 = vpack.c.bf16 %v4544_v8, %v4543_v0  ;;  %v4119_v37 = vpack.c.bf16 %v4546_v60, %v4545_v59  ;;  %v4556_v0 = vld [vmem:[#allocation5 + $0x498] sm:$0xff]  ;;  %v4559_v60 = vld [vmem:[#allocation5 + $0x410] sm:$0xff] }
 0x1d9   :  { %v4139_v8 = vpack.c.bf16 %v4556_v0, %v4555_v27  ;;  %v4569_v0 = vld [vmem:[#allocation5 + $0x3f0] sm:$0xff] }
 0x1dd   :  { %4114 = vmatpush3.bf16.xpose.msra.mxu0 %v4113_v15  ;;  %v4549_v15 = vld [vmem:[#allocation5 + $0x340] sm:$0xff] }
 0x1de   :  { %4098 = vmatpush3.bf16.xpose.msra.mxu1 %v4097_v1  ;;  %4116 = vmatprep.subr.bf16.mxu0 %v4115_v9  ;;  %v4550_v1 = vld [vmem:[#allocation5 + $0x348] sm:$0xff] }
 0x1df   :  { %4100 = vmatprep.subr.bf16.mxu1 %v4099_v13  ;;  %v4121_v10 = vpack.c.bf16 %v4550_v1, %v4549_v15  ;;  %v4552_v9 = vld [vmem:[#allocation5 + $0x408] sm:$0xff]  ;;  %v4554_v13 = vld [vmem:[#allocation5 + $0x3d8] sm:$0xff]  ;;  %v4563_v1 = vld [vmem:[#allocation5 + $0x4a0] sm:$0xff] }
 0x1e0   :  { %v4137_v25 = vpack.c.bf16 %v4552_v9, %v4551_v26  ;;  %v4123_v63 = vpack.c.bf16 %v4554_v13, %v4553_v35  ;;  %v4564_v26 = vld [vmem:[#allocation5 + $0x4a8] sm:$0xff]  ;;  %v4567_v13 = vld [vmem:[#allocation5 + $0x420] sm:$0xff] }
 0x1e1   :  { %v4143_v9 = vpack.c.bf16 %v4564_v26, %v4563_v1  ;;  %v4574_v1 = vld [vmem:[#allocation5 + $0x378] sm:$0xff] }
 0x1e5   :  { %4118 = vmatpush3.bf16.xpose.msra.mxu0 %v4117_v36  ;;  %v4557_v36 = vld [vmem:[#allocation5 + $0x350] sm:$0xff] }
 0x1e6   :  { %4102 = vmatpush3.bf16.xpose.msra.mxu1 %v4101_v54  ;;  %4120 = vmatprep.subr.bf16.mxu0 %v4119_v37  ;;  %v4558_v54 = vld [vmem:[#allocation5 + $0x358] sm:$0xff] }
 0x1e7   :  { %4136 = vmatprep.subr.bf16.mxu1 %v4135_v51  ;;  %v4125_v59 = vpack.c.bf16 %v4558_v54, %v4557_v36  ;;  %v4560_v37 = vld [vmem:[#allocation5 + $0x418] sm:$0xff]  ;;  %v4562_v51 = vld [vmem:[#allocation5 + $0x3e8] sm:$0xff]  ;;  %v4571_v54 = vld [vmem:[#allocation5 + $0x4b0] sm:$0xff] }
 0x1e8   :  { %v4141_v20 = vpack.c.bf16 %v4560_v37, %v4559_v60  ;;  %v4127_v15 = vpack.c.bf16 %v4562_v51, %v4561_v44  ;;  %v4572_v60 = vld [vmem:[#allocation5 + $0x4b8] sm:$0xff] }
 0x1e9   :  { %v4147_v37 = vpack.c.bf16 %v4572_v60, %v4571_v54  ;;  %v4582_v54 = vld [vmem:[#allocation5 + $0x508] sm:$0xff] }
 0x1ed   :  { %3389 = vmatmul.mubr.f32.vlgmr.msra.gmra.mrb[12].mxu1 %v5033_v58  ;;  %4122 = vmatpush3.bf16.xpose.msra.mxu0 %v4121_v10  ;;  %v4565_v10 = vld [vmem:[#allocation5 + $0x360] sm:$0xff] }
 0x1ee   :  { %4138 = vmatpush3.bf16.xpose.msra.mxu1 %v4137_v25  ;;  %3456 = vmatprep.mubr.f32.mxu1 %v5033_v58  ;;  %v4566_v25 = vld [vmem:[#allocation5 + $0x368] sm:$0xff] }
 0x1ef   :  { %4124 = vmatprep.subr.bf16.mxu0 %v4123_v63  ;;  %4140 = vmatprep.subr.bf16.mxu1 %v4139_v8  ;;  %v4129_v35 = vpack.c.bf16 %v4566_v25, %v4565_v10  ;;  %v4568_v63 = vld [vmem:[#allocation5 + $0x428] sm:$0xff]  ;;  %v4570_v8 = vld [vmem:[#allocation5 + $0x3f8] sm:$0xff] }
 0x1f0   :  { %v4145_v27 = vpack.c.bf16 %v4568_v63, %v4567_v13  ;;  %v4131_v36 = vpack.c.bf16 %v4570_v8, %v4569_v0  ;;  %v4576_v10 = vld [vmem:[#allocation5 + $0x438] sm:$0xff]  ;;  %v4577_v13 = vld [vmem:[#allocation5 + $0x580] sm:$0xff]  ;;  %v4578_v63 = vld [vmem:[#allocation5 + $0x588] sm:$0xff] }
 0x1f1   :  { %v4580_v0 = vld [vmem:[#allocation5 + $0x4c8] sm:$0xff] }
 0x1f5   :  { %4126 = vmatpush3.bf16.xpose.msra.mxu0 %v4125_v59 }
 0x1f6   :  { %4142 = vmatpush3.bf16.xpose.msra.mxu1 %v4141_v20  ;;  %4128 = vmatprep.subr.bf16.mxu0 %v4127_v15  ;;  %v4573_v15 = vld [vmem:[#allocation5 + $0x370] sm:$0xff] }
 0x1f7   :  { %4144 = vmatprep.subr.bf16.mxu1 %v4143_v9  ;;  %v4133_v26 = vpack.c.bf16 %v4574_v1, %v4573_v15  ;;  %v4575_v9 = vld [vmem:[#allocation5 + $0x430] sm:$0xff]  ;;  %v4586_v1 = vld [vmem:[#allocation5 + $0x598] sm:$0xff] }
 0x1f8   :  { %v4149_v25 = vpack.c.bf16 %v4576_v10, %v4575_v9  ;;  %v4585_v15 = vld [vmem:[#allocation5 + $0x590] sm:$0xff]  ;;  %v4588_v10 = vld [vmem:[#allocation5 + $0x4d8] sm:$0xff] }
 0x1f9   :  { %v4587_v9 = vld [vmem:[#allocation5 + $0x4d0] sm:$0xff] }
 0x1fd   :  { %4130 = vmatpush3.bf16.xpose.msra.mxu0 %v4129_v35  ;;  %v4167_v35 = vpack.c.bf16 %v4578_v63, %v4577_v13  ;;  %v4591_v63 = vld [vmem:[#allocation5 + $0x450] sm:$0xff] }
 0x1fe   :  { %4146 = vmatpush3.bf16.xpose.msra.mxu1 %v4145_v27  ;;  %4132 = vmatprep.subr.bf16.mxu0 %v4131_v36  ;;  %v4579_v27 = vld [vmem:[#allocation5 + $0x4c0] sm:$0xff] }
 0x1ff   :  { %v5095_v44 = vpop.f32.mrb[6].mxu0  ;;  %4148 = vmatprep.subr.bf16.mxu1 %v4147_v37  ;;  %v4151_v8 = vpack.c.bf16 %v4580_v0, %v4579_v27  ;;  %v4581_v36 = vld [vmem:[#allocation5 + $0x500] sm:$0xff]  ;;  %v4594_v0 = vld [vmem:[#allocation5 + $0x5a8] sm:$0xff] }
 0x200   :  { %5350 = vst [vmem:[#allocation17_spill] sm:$0xff] %v5095_v44  ;;  %v5097_v59 = vpop.f32.mrb[7].mxu0  ;;  %v5099_v20 = vpop.f32.mrb[6].mxu1  ;;  %v4169_v60 = vpack.c.bf16 %v4582_v54, %v4581_v36  ;;  %v4583_v37 = vld [vmem:[#allocation5 + $0x440] sm:$0xff]  ;;  %v4155_v44 = vpack.c.bf16 %v4588_v10, %v4587_v9  ;;  %v4596_v54 = vld [vmem:[#allocation5 + $0x4e8] sm:$0xff]  ;;  %v4601_v9 = vld [vmem:[#allocation5 + $0x5b0] sm:$0xff] }
 0x201   :  { %5351 = vst [vmem:[#allocation18_spill] sm:$0xff] %v5097_v59  ;;  %5352 = vst [vmem:[#allocation19_spill] sm:$0xff] %v5099_v20  ;;  %v5101_v51 = vpop.f32.mrb[7].mxu1  ;;  %v4171_v59 = vpack.c.bf16 %v4586_v1, %v4585_v15  ;;  %v4593_v27 = vld [vmem:[#allocation5 + $0x5a0] sm:$0xff]  ;;  %v4600_v15 = vld [vmem:[#allocation5 + $0x468] sm:$0xff] }
 0x202   :  { %5353 = vst [vmem:[#allocation20_spill] sm:$0xff] %v5101_v51  ;;  %v4584_v51 = vld [vmem:[#allocation5 + $0x448] sm:$0xff]  ;;  %v4595_v36 = vld [vmem:[#allocation5 + $0x4e0] sm:$0xff]  ;;  %v4602_v10 = vld [vmem:[#allocation5 + $0x5b8] sm:$0xff] }
 0x203   :  { %v4153_v20 = vpack.c.bf16 %v4584_v51, %v4583_v37  ;;  %v4159_v37 = vpack.c.bf16 %v4596_v54, %v4595_v36  ;;  %v4609_v54 = vld [vmem:[#allocation5 + $0x5c0] sm:$0xff] }
 0x205   :  { %4134 = vmatpush3.bf16.xpose.msra.mxu0 %v4133_v26  ;;  %v4589_v26 = vld [vmem:[#allocation5 + $0x510] sm:$0xff] }
 0x206   :  { %4150 = vmatpush3.bf16.xpose.msra.mxu1 %v4149_v25  ;;  %4168 = vmatprep.subr.bf16.mxu0 %v4167_v35  ;;  %v4590_v25 = vld [vmem:[#allocation5 + $0x518] sm:$0xff] }
 0x207   :  { %4152 = vmatprep.subr.bf16.mxu1 %v4151_v8  ;;  %v4173_v13 = vpack.c.bf16 %v4590_v25, %v4589_v26  ;;  %v4592_v35 = vld [vmem:[#allocation5 + $0x458] sm:$0xff]  ;;  %v4175_v8 = vpack.c.bf16 %v4594_v0, %v4593_v27  ;;  %v4179_v26 = vpack.c.bf16 %v4602_v10, %v4601_v9  ;;  %v4603_v25 = vld [vmem:[#allocation5 + $0x4f0] sm:$0xff]  ;;  %v4615_v10 = vld [vmem:[#allocation5 + $0x600] sm:$0xff] }
 0x208   :  { %v4157_v51 = vpack.c.bf16 %v4592_v35, %v4591_v63  ;;  %v4604_v63 = vld [vmem:[#allocation5 + $0x4f8] sm:$0xff]  ;;  %v4607_v0 = vld [vmem:[#allocation5 + $0x470] sm:$0xff] }
 0x209   :  { %v4163_v35 = vpack.c.bf16 %v4604_v63, %v4603_v25  ;;  %v4617_v63 = vld [vmem:[#allocation5 + $0x5d0] sm:$0xff] }
 0x20c   :  { %3423 = vmatmul.mubr.f32.vlgmr.msra.gmra.mrb[14].mxu0 %v5033_v58 }
 0x20d   :  { %4170 = vmatpush3.bf16.xpose.msra.mxu0 %v4169_v60  ;;  %3490 = vmatprep.mubr.f32.mxu0 %v5033_v58  ;;  %v4597_v60 = vld [vmem:[#allocation5 + $0x520] sm:$0xff] }
 0x20e   :  { %4154 = vmatpush3.bf16.xpose.msra.mxu1 %v4153_v20  ;;  %4172 = vmatprep.subr.bf16.mxu0 %v4171_v59  ;;  %v4598_v20 = vld [vmem:[#allocation5 + $0x528] sm:$0xff] }
 0x20f   :  { %4156 = vmatprep.subr.bf16.mxu1 %v4155_v44  ;;  %v4177_v59 = vpack.c.bf16 %v4598_v20, %v4597_v60  ;;  %v4599_v44 = vld [vmem:[#allocation5 + $0x460] sm:$0xff] }
 0x210   :  { %v4161_v1 = vpack.c.bf16 %v4600_v15, %v4599_v44  ;;  %v4611_v20 = vld [vmem:[#allocation5 + $0x680] sm:$0xff]  ;;  %v4612_v44 = vld [vmem:[#allocation5 + $0x688] sm:$0xff] }
 0x211   :  { %v4199_v15 = vpack.c.bf16 %v4612_v44, %v4611_v20  ;;  %v4625_v44 = vld [vmem:[#allocation5 + $0x5e0] sm:$0xff] }
 0x215   :  { %4174 = vmatpush3.bf16.xpose.msra.mxu0 %v4173_v13  ;;  %v4605_v13 = vld [vmem:[#allocation5 + $0x530] sm:$0xff] }
 0x216   :  { %4158 = vmatpush3.bf16.xpose.msra.mxu1 %v4157_v51  ;;  %4176 = vmatprep.subr.bf16.mxu0 %v4175_v8  ;;  %v4606_v51 = vld [vmem:[#allocation5 + $0x538] sm:$0xff] }
 0x217   :  { %4160 = vmatprep.subr.bf16.mxu1 %v4159_v37  ;;  %v4181_v27 = vpack.c.bf16 %v4606_v51, %v4605_v13  ;;  %v4608_v8 = vld [vmem:[#allocation5 + $0x478] sm:$0xff]  ;;  %v4610_v37 = vld [vmem:[#allocation5 + $0x5c8] sm:$0xff]  ;;  %v4619_v51 = vld [vmem:[#allocation5 + $0x690] sm:$0xff] }
 0x218   :  { %v4165_v36 = vpack.c.bf16 %v4608_v8, %v4607_v0  ;;  %v4183_v60 = vpack.c.bf16 %v4610_v37, %v4609_v54  ;;  %v4620_v0 = vld [vmem:[#allocation5 + $0x698] sm:$0xff]  ;;  %v4623_v37 = vld [vmem:[#allocation5 + $0x610] sm:$0xff] }
 0x219   :  { %v4203_v8 = vpack.c.bf16 %v4620_v0, %v4619_v51  ;;  %v4633_v0 = vld [vmem:[#allocation5 + $0x5f0] sm:$0xff] }
 0x21d   :  { %4178 = vmatpush3.bf16.xpose.msra.mxu0 %v4177_v59  ;;  %v4613_v59 = vld [vmem:[#allocation5 + $0x540] sm:$0xff] }
 0x21e   :  { %4162 = vmatpush3.bf16.xpose.msra.mxu1 %v4161_v1  ;;  %4180 = vmatprep.subr.bf16.mxu0 %v4179_v26  ;;  %v4614_v1 = vld [vmem:[#allocation5 + $0x548] sm:$0xff] }
 0x21f   :  { %4164 = vmatprep.subr.bf16.mxu1 %v4163_v35  ;;  %v4185_v9 = vpack.c.bf16 %v4614_v1, %v4613_v59  ;;  %v4616_v26 = vld [vmem:[#allocation5 + $0x608] sm:$0xff]  ;;  %v4618_v35 = vld [vmem:[#allocation5 + $0x5d8] sm:$0xff]  ;;  %v4627_v1 = vld [vmem:[#allocation5 + $0x6a0] sm:$0xff] }
 0x220   :  { %v4201_v25 = vpack.c.bf16 %v4616_v26, %v4615_v10  ;;  %v4187_v13 = vpack.c.bf16 %v4618_v35, %v4617_v63  ;;  %v4628_v10 = vld [vmem:[#allocation5 + $0x6a8] sm:$0xff]  ;;  %v4631_v35 = vld [vmem:[#allocation5 + $0x620] sm:$0xff] }
 0x221   :  { %v4207_v26 = vpack.c.bf16 %v4628_v10, %v4627_v1  ;;  %v4638_v1 = vld [vmem:[#allocation5 + $0x578] sm:$0xff] }
 0x225   :  { %4182 = vmatpush3.bf16.xpose.msra.mxu0 %v4181_v27  ;;  %v4621_v27 = vld [vmem:[#allocation5 + $0x550] sm:$0xff] }
 0x226   :  { %4166 = vmatpush3.bf16.xpose.msra.mxu1 %v4165_v36  ;;  %4184 = vmatprep.subr.bf16.mxu0 %v4183_v60  ;;  %v4622_v36 = vld [vmem:[#allocation5 + $0x558] sm:$0xff] }
 0x227   :  { %4200 = vmatprep.subr.bf16.mxu1 %v4199_v15  ;;  %v4189_v54 = vpack.c.bf16 %v4622_v36, %v4621_v27  ;;  %v4624_v60 = vld [vmem:[#allocation5 + $0x618] sm:$0xff]  ;;  %v4626_v15 = vld [vmem:[#allocation5 + $0x5e8] sm:$0xff]  ;;  %v4635_v36 = vld [vmem:[#allocation5 + $0x6b0] sm:$0xff] }
 0x228   :  { %v4205_v20 = vpack.c.bf16 %v4624_v60, %v4623_v37  ;;  %v4191_v59 = vpack.c.bf16 %v4626_v15, %v4625_v44  ;;  %v4636_v37 = vld [vmem:[#allocation5 + $0x6b8] sm:$0xff] }
 0x229   :  { %v4211_v60 = vpack.c.bf16 %v4636_v37, %v4635_v36  ;;  %v4646_v36 = vld [vmem:[#allocation5 + $0x708] sm:$0xff] }
 0x22d   :  { %3457 = vmatmul.mubr.f32.vlgmr.msra.gmra.mrb[14].mxu1 %v5033_v58  ;;  %4186 = vmatpush3.bf16.xpose.msra.mxu0 %v4185_v9  ;;  %v4629_v9 = vld [vmem:[#allocation5 + $0x560] sm:$0xff] }
 0x22e   :  { %4202 = vmatpush3.bf16.xpose.msra.mxu1 %v4201_v25  ;;  %3524 = vmatprep.mubr.f32.mxu1 %v5033_v58  ;;  %v4630_v25 = vld [vmem:[#allocation5 + $0x568] sm:$0xff] }
 0x22f   :  { %4188 = vmatprep.subr.bf16.mxu0 %v4187_v13  ;;  %4204 = vmatprep.subr.bf16.mxu1 %v4203_v8  ;;  %v4193_v63 = vpack.c.bf16 %v4630_v25, %v4629_v9  ;;  %v4632_v13 = vld [vmem:[#allocation5 + $0x628] sm:$0xff]  ;;  %v4634_v8 = vld [vmem:[#allocation5 + $0x5f8] sm:$0xff] }
 0x230   :  { %v4209_v51 = vpack.c.bf16 %v4632_v13, %v4631_v35  ;;  %v4195_v27 = vpack.c.bf16 %v4634_v8, %v4633_v0  ;;  %v4640_v9 = vld [vmem:[#allocation5 + $0x638] sm:$0xff]  ;;  %v4641_v35 = vld [vmem:[#allocation5 + $0x780] sm:$0xff]  ;;  %v4642_v13 = vld [vmem:[#allocation5 + $0x788] sm:$0xff] }
 0x231   :  { %v4644_v0 = vld [vmem:[#allocation5 + $0x6c8] sm:$0xff] }
 0x235   :  { %4190 = vmatpush3.bf16.xpose.msra.mxu0 %v4189_v54 }
 0x236   :  { %4206 = vmatpush3.bf16.xpose.msra.mxu1 %v4205_v20  ;;  %4192 = vmatprep.subr.bf16.mxu0 %v4191_v59  ;;  %v4637_v59 = vld [vmem:[#allocation5 + $0x570] sm:$0xff] }
 0x237   :  { %4208 = vmatprep.subr.bf16.mxu1 %v4207_v26  ;;  %v4197_v10 = vpack.c.bf16 %v4638_v1, %v4637_v59  ;;  %v4639_v26 = vld [vmem:[#allocation5 + $0x630] sm:$0xff]  ;;  %v4650_v1 = vld [vmem:[#allocation5 + $0x798] sm:$0xff] }
 0x238   :  { %v4213_v25 = vpack.c.bf16 %v4640_v9, %v4639_v26  ;;  %v4649_v59 = vld [vmem:[#allocation5 + $0x790] sm:$0xff]  ;;  %v4652_v9 = vld [vmem:[#allocation5 + $0x6d8] sm:$0xff] }
 0x239   :  { %v4651_v26 = vld [vmem:[#allocation5 + $0x6d0] sm:$0xff] }
 0x23d   :  { %4194 = vmatpush3.bf16.xpose.msra.mxu0 %v4193_v63  ;;  %v4231_v63 = vpack.c.bf16 %v4642_v13, %v4641_v35  ;;  %v4655_v13 = vld [vmem:[#allocation5 + $0x650] sm:$0xff] }
 0x23e   :  { %4210 = vmatpush3.bf16.xpose.msra.mxu1 %v4209_v51  ;;  %4196 = vmatprep.subr.bf16.mxu0 %v4195_v27  ;;  %v4643_v51 = vld [vmem:[#allocation5 + $0x6c0] sm:$0xff] }
 0x23f   :  { %v5107_v44 = vpop.f32.mrb[8].mxu0  ;;  %4212 = vmatprep.subr.bf16.mxu1 %v4211_v60  ;;  %v4215_v8 = vpack.c.bf16 %v4644_v0, %v4643_v51  ;;  %v4645_v27 = vld [vmem:[#allocation5 + $0x700] sm:$0xff]  ;;  %v4658_v0 = vld [vmem:[#allocation5 + $0x7a8] sm:$0xff] }
 0x240   :  { %5354 = vst [vmem:[#allocation21_spill] sm:$0xff] %v5107_v44  ;;  %v5109_v54 = vpop.f32.mrb[9].mxu0  ;;  %v5111_v20 = vpop.f32.mrb[8].mxu1  ;;  %v4233_v37 = vpack.c.bf16 %v4646_v36, %v4645_v27  ;;  %v4647_v60 = vld [vmem:[#allocation5 + $0x640] sm:$0xff]  ;;  %v4219_v44 = vpack.c.bf16 %v4652_v9, %v4651_v26  ;;  %v4660_v36 = vld [vmem:[#allocation5 + $0x6e8] sm:$0xff]  ;;  %v4665_v26 = vld [vmem:[#allocation5 + $0x7b0] sm:$0xff] }
 0x241   :  { %5355 = vst [vmem:[#allocation22_spill] sm:$0xff] %v5109_v54  ;;  %5356 = vst [vmem:[#allocation23_spill] sm:$0xff] %v5111_v20  ;;  %v5113_v15 = vpop.f32.mrb[9].mxu1  ;;  %v4235_v54 = vpack.c.bf16 %v4650_v1, %v4649_v59  ;;  %v4657_v51 = vld [vmem:[#allocation5 + $0x7a0] sm:$0xff]  ;;  %v4664_v59 = vld [vmem:[#allocation5 + $0x668] sm:$0xff] }
 0x242   :  { %5357 = vst [vmem:[#allocation24_spill] sm:$0xff] %v5113_v15  ;;  %v4648_v15 = vld [vmem:[#allocation5 + $0x648] sm:$0xff]  ;;  %v4659_v27 = vld [vmem:[#allocation5 + $0x6e0] sm:$0xff]  ;;  %v4666_v9 = vld [vmem:[#allocation5 + $0x7b8] sm:$0xff] }
 0x243   :  { %v4217_v20 = vpack.c.bf16 %v4648_v15, %v4647_v60  ;;  %v4223_v60 = vpack.c.bf16 %v4660_v36, %v4659_v27  ;;  %v4671_v27 = vld [vmem:[#allocation5 + $0x670] sm:$0xff]  ;;  %v4672_v36 = vld [vmem:[#allocation5 + $0x678] sm:$0xff] }
 0x245   :  { %4198 = vmatpush3.bf16.xpose.msra.mxu0 %v4197_v10  ;;  %v4653_v10 = vld [vmem:[#allocation5 + $0x710] sm:$0xff] }
 0x246   :  { %4214 = vmatpush3.bf16.xpose.msra.mxu1 %v4213_v25  ;;  %4232 = vmatprep.subr.bf16.mxu0 %v4231_v63  ;;  %v4654_v25 = vld [vmem:[#allocation5 + $0x718] sm:$0xff] }
 0x247   :  { %4216 = vmatprep.subr.bf16.mxu1 %v4215_v8  ;;  %v4237_v35 = vpack.c.bf16 %v4654_v25, %v4653_v10  ;;  %v4656_v63 = vld [vmem:[#allocation5 + $0x658] sm:$0xff]  ;;  %v4239_v8 = vpack.c.bf16 %v4658_v0, %v4657_v51  ;;  %v4243_v10 = vpack.c.bf16 %v4666_v9, %v4665_v26  ;;  %v4667_v25 = vld [vmem:[#allocation5 + $0x6f0] sm:$0xff]  ;;  %v4676_v26 = vld [vmem:[#allocation5 + $0x888] sm:$0xff] }
 0x248   :  { %v4221_v15 = vpack.c.bf16 %v4656_v63, %v4655_v13  ;;  %v4668_v13 = vld [vmem:[#allocation5 + $0x6f8] sm:$0xff] }
 0x249   :  { %v4227_v63 = vpack.c.bf16 %v4668_v13, %v4667_v25  ;;  %v4670_v0 = vld [vmem:[#allocation5 + $0x738] sm:$0xff]  ;;  %v4679_v25 = vld [vmem:[#allocation5 + $0x800] sm:$0xff] }
 0x24a   :  { %v4265_v13 = vpack.c.bf16 %v4891_v28, %v4679_v25  ;;  %v4683_v28 = vld [vmem:[#allocation5 + $0x758] sm:$0xff] }
 0x24c   :  { %3491 = vmatmul.mubr.f32.vlgmr.msra.gmra.mrb[16].mxu0 %v5033_v58 }
 0x24d   :  { %4234 = vmatpush3.bf16.xpose.msra.mxu0 %v4233_v37  ;;  %3558 = vmatprep.mubr.f32.mxu0 %v5033_v58  ;;  %v4661_v37 = vld [vmem:[#allocation5 + $0x720] sm:$0xff] }
 0x24e   :  { %4218 = vmatpush3.bf16.xpose.msra.mxu1 %v4217_v20  ;;  %4236 = vmatprep.subr.bf16.mxu0 %v4235_v54  ;;  %v4662_v20 = vld [vmem:[#allocation5 + $0x728] sm:$0xff] }
 0x24f   :  { %4220 = vmatprep.subr.bf16.mxu1 %v4219_v44  ;;  %v4241_v54 = vpack.c.bf16 %v4662_v20, %v4661_v37  ;;  %v4663_v44 = vld [vmem:[#allocation5 + $0x660] sm:$0xff]  ;;  %v4674_v20 = vld [vmem:[#allocation5 + $0x7c8] sm:$0xff] }
 0x250   :  { %v4225_v1 = vpack.c.bf16 %v4664_v59, %v4663_v44  ;;  %v4673_v37 = vld [vmem:[#allocation5 + $0x7c0] sm:$0xff] }
 0x251   :  { %v4247_v44 = vpack.c.bf16 %v4674_v20, %v4673_v37  ;;  %v4675_v59 = vld [vmem:[#allocation5 + $0x880] sm:$0xff]  ;;  %v4269_v37 = vpack.c.bf16 %v4905_v48, %v4903_v47  ;;  %v4273_v47 = vpack.c.bf16 %v4925_v5, %v4923_v4  ;;  %v4688_v48 = vld [vmem:[#allocation5 + $0x7f0] sm:$0xff] }
 0x252   :  { %v4263_v9 = vpack.c.bf16 %v4676_v26, %v4675_v59  ;;  %v4686_v59 = vld [vmem:[#allocation5 + $0x760] sm:$0xff]  ;;  %v4687_v26 = vld [vmem:[#allocation5 + $0x768] sm:$0xff] }
 0x255   :  { %4238 = vmatpush3.bf16.xpose.msra.mxu0 %v4237_v35 }
 0x256   :  { %4222 = vmatpush3.bf16.xpose.msra.mxu1 %v4221_v15  ;;  %4240 = vmatprep.subr.bf16.mxu0 %v4239_v8  ;;  %v4669_v15 = vld [vmem:[#allocation5 + $0x730] sm:$0xff] }
 0x257   :  { %4224 = vmatprep.subr.bf16.mxu1 %v4223_v60  ;;  %v4245_v8 = vpack.c.bf16 %v4670_v0, %v4669_v15  ;;  %v4229_v60 = vpack.c.bf16 %v4672_v36, %v4671_v27  ;;  %v4267_v0 = vpack.c.bf16 %v4895_v33, %v4893_v32  ;;  %v1531_v27 = vmax.f32 %v4957_v55, 1e-24  ;;  %v4682_v36 = vld [vmem:[#allocation5 + $0x750] sm:$0xff]  ;;  %v4684_v32 = vld [vmem:[#allocation5 + $0x7e0] sm:$0xff]  ;;  %v4685_v33 = vld [vmem:[#allocation5 + $0x7e8] sm:$0xff] }
 0x258   :  { %v4255_v20 = vpack.c.bf16 %v4685_v33, %v4684_v32 }
 0x25d   :  { %4242 = vmatpush3.bf16.xpose.msra.mxu0 %v4241_v54  ;;  %v4677_v54 = vld [vmem:[#allocation5 + $0x740] sm:$0xff] }
 0x25e   :  { %4226 = vmatpush3.bf16.xpose.msra.mxu1 %v4225_v1  ;;  %4244 = vmatprep.subr.bf16.mxu0 %v4243_v10  ;;  %v4678_v1 = vld [vmem:[#allocation5 + $0x748] sm:$0xff] }
 0x25f   :  { %v5117_v51 = vpop.f32.mrb[10].mxu0  ;;  %4228 = vmatprep.subr.bf16.mxu1 %v4227_v63  ;;  %v4249_v10 = vpack.c.bf16 %v4678_v1, %v4677_v54  ;;  %v4680_v63 = vld [vmem:[#allocation5 + $0x7d0] sm:$0xff]  ;;  %v4689_v54 = vld [vmem:[#allocation5 + $0x7f8] sm:$0xff] }
 0x260   :  { %v3655_v35 = vpop.f32.mrb[11].mxu0  ;;  %v4259_v1 = vpack.c.bf16 %v4689_v54, %v4688_v48  ;;  %v4283_v54 = vpack.c.bf16 %v4969_v6, %v4967_v3  ;;  %v4285_v3 = vpack.c.bf16 %v4981_v30, %v4979_v29  ;;  %v4700_v6 = vld [vmem:[#allocation5 + $0x9a0] sm:$0xff] }
 0x261   :  { %v4681_v35 = vld [vmem:[#allocation5 + $0x7d8] sm:$0xff] }
 0x262   :  { %v4251_v15 = vpack.c.bf16 %v4681_v35, %v4680_v63 }
 0x265   :  { %4246 = vmatpush3.bf16.xpose.msra.mxu0 %v4245_v8  ;;  %v1530_v8 = vmax.f32 %v4955_v50, 1e-24  ;;  %v4271_v50 = vpack.c.bf16 %v4909_v53, %v4907_v52  ;;  %v4275_v52 = vpack.c.bf16 %v4929_v12, %v4927_v11  ;;  %v4277_v11 = vpack.c.bf16 %v4941_v34, %v4939_v31  ;;  %v4692_v12 = vld [vmem:[#allocation5 + $0x980] sm:$0xff] }
 0x266   :  { %4230 = vmatpush3.bf16.xpose.msra.mxu1 %v4229_v60  ;;  %4248 = vmatprep.subr.bf16.mxu0 %v4247_v44  ;;  %v4253_v60 = vpack.c.bf16 %v4683_v28, %v4682_v36  ;;  %v1486_v44 = vlaneseq  ;;  %v4693_v36 = vld [vmem:[#allocation5 + $0x988] sm:$0xff] }
 0x267   :  { %4264 = vmatprep.subr.bf16.mxu1 %v4263_v9  ;;  %4352 = vrsqrt.f32 %v1530_v8  ;;  %v4257_v9 = vpack.c.bf16 %v4687_v26, %v4686_v59  ;;  %v4295_v28 = vpack.c.bf16 %v4693_v36, %v4692_v12  ;;  %v4695_v59 = vld [vmem:[#allocation5 + $0x908] sm:$0xff] }
 0x268   :  { %4354 = vrsqrt.f32 %v1531_v27  ;;  %v2353_v55 = vshrl.u32 %v1486_v44, 7 }
 0x26d   :  { %3525 = vmatmul.mubr.f32.vlgmr.msra.gmra.mrb[16].mxu1 %v5033_v58  ;;  %4250 = vmatpush3.bf16.xpose.msra.mxu0 %v4249_v10  ;;  %v5133_v10 = vsub.s32 0, %v2353_v55  ;;  %v4694_v55 = vld [vmem:[#allocation5 + $0x900] sm:$0xff] }
 0x26e   :  { %4266 = vmatpush3.bf16.xpose.msra.mxu1 %v4265_v13  ;;  %3592 = vmatprep.mubr.f32.mxu1 %v5033_v58  ;;  %v4297_v26 = vpack.c.bf16 %v4695_v59, %v4694_v55 }
 0x26f   :  { %4252 = vmatprep.subr.bf16.mxu0 %v4251_v15  ;;  %4268 = vmatprep.subr.bf16.mxu1 %v4267_v0  ;;  %v4690_v15 = vld [vmem:[#allocation5 + $0x770] sm:$0xff]  ;;  %v4691_v0 = vld [vmem:[#allocation5 + $0x778] sm:$0xff] }
 0x270   :  { %v4261_v8 = vpack.c.bf16 %v4691_v0, %v4690_v15  ;;  %v4289_v15 = vpack.c.bf16 %v4997_v7, %v4995_v2  ;;  %v4702_v0 = vld [vmem:[#allocation5 + $0x920] sm:$0xff] }
 0x271   :  { %v4353_v53 = vpop.eup %4352 }
 0x272   :  { %v4355_v25 = vpop.eup %4354  ;;  %v2355_v13 = vrot.slane %v4353_v53, %v5133_v10 }
 0x273   :  { %v2359_v35 = vrot.slane %v4355_v25, %v5133_v10  ;;  %v4701_v25 = vld [vmem:[#allocation5 + $0x9a8] sm:$0xff] }
 0x275   :  { %4254 = vmatpush3.bf16.xpose.msra.mxu0 %v4253_v60 }
 0x276   :  { %4270 = vmatpush3.bf16.xpose.msra.mxu1 %v4269_v37  ;;  %4256 = vmatprep.subr.bf16.mxu0 %v4255_v20  ;;  %v4279_v37 = vpack.c.bf16 %v4945_v39, %v4943_v38  ;;  %v4696_v38 = vld [vmem:[#allocation5 + $0x990] sm:$0xff]  ;;  %v4697_v39 = vld [vmem:[#allocation5 + $0x998] sm:$0xff] }
 0x277   :  { %4272 = vmatprep.subr.bf16.mxu1 %v4271_v50  ;;  %v4299_v48 = vpack.c.bf16 %v4697_v39, %v4696_v38 }
 0x27d   :  { %4258 = vmatpush3.bf16.xpose.msra.mxu0 %v4257_v9 }
 0x27e   :  { %4274 = vmatpush3.bf16.xpose.msra.mxu1 %v4273_v47  ;;  %4260 = vmatprep.subr.bf16.mxu0 %v4259_v1  ;;  %v4281_v47 = vpack.c.bf16 %v4965_v62, %v4963_v61  ;;  %v1532_v1 = vmax.f32 %v4959_v56, 1e-24  ;;  %v4698_v61 = vld [vmem:[#allocation5 + $0x910] sm:$0xff]  ;;  %v4699_v62 = vld [vmem:[#allocation5 + $0x918] sm:$0xff]  ;;  %v4287_v56 = vpack.c.bf16 %v4985_v41, %v4983_v40 }
 0x27f   :  { %4276 = vmatprep.subr.bf16.mxu1 %v4275_v52  ;;  %v1533_v52 = vmax.f32 %v4961_v57, 1e-24  ;;  %v4301_v53 = vpack.c.bf16 %v4699_v62, %v4698_v61  ;;  %v5164_v57 = vand.u32 127, %v1486_v44 }
 0x280   :  { %v1638_v63 = vpop.f32.mrb[10].mxu1 }
 0x281   :  { %v5139_v4 = vmul.f32 %v2355_v13, %v1638_v63  ;;  %v1640_v5 = vpop.f32.mrb[11].mxu1  ;;  %v4303_v13 = vpack.c.bf16 %v4701_v25, %v4700_v6  ;;  %v1488_v36 = vadd.s32 128, %v5164_v57  ;;  %v4706_v6 = vld [vmem:[#allocation5 + $0x930] sm:$0xff]  ;;  %v4707_v25 = vld [vmem:[#allocation5 + $0x938] sm:$0xff] }
 0x282   :  { %v5141_v27 = vmul.f32 %v2359_v35, %v1640_v5 }
 0x283   :  { %v2457_v60 = vmul.f32 %v5139_v4, %v5139_v4  ;;  %v2688_v2 = vmul.f32 0.87758255, %v5139_v4  ;;  %vm2751_vm6 = vcmp.gt.f32.partialorder %v5139_v4, -0.87758255 }
 0x284   :  { %v2458_v32 = vmul.f32 %v5141_v27, %v5141_v27  ;;  %vm2752_vm8 = vcmp.gt.f32.partialorder %v5141_v27, -0.87758255 }
 0x285   :  { %v2478_v33 = vsub.f32 1.0, %v2457_v60  ;;  %4262 = vmatpush3.bf16.xpose.msra.mxu0 %v4261_v8  ;;  %v4703_v8 = vld [vmem:[#allocation5 + $0x928] sm:$0xff] }
 0x286   :  { %v2479_v20 = vsub.f32 1.0, %v2458_v32  ;;  %4278 = vmatpush3.bf16.xpose.msra.mxu1 %v4277_v11  ;;  %4296 = vmatprep.subr.bf16.mxu0 %v4295_v28  ;;  %v4305_v11 = vpack.c.bf16 %v4703_v8, %v4702_v0  ;;  %v5169_v28 = vpop.permute.xlu0 %2815  ;;  %v4705_v32 = vld [vmem:[#allocation5 + $0x9b8] sm:$0xff]  ;;  %v5358_v8 = vmov 0.0|0.0  }
 0x287   :  { %v2499_v50 = vmax.f32 %v2478_v33, 0.0  ;;  %4280 = vmatprep.subr.bf16.mxu1 %v4279_v37  ;;  %v4704_v37 = vld [vmem:[#allocation5 + $0x9b0] sm:$0xff]  ;;  %vm2817_vm5 = vcmp.eq.s32.totalorder %v5164_v57, %v5169_v28  ;;  %vm2818_vm7 = vcmp.eq.s32.totalorder %v1488_v36, %v5169_v28  ;;  %v4713_v36 = vld [vmem:[#allocation5 + $0x9d8] sm:$0xff] }
 0x288   :  { %v2500_v31 = vmax.f32 %v2479_v20, 0.0  ;;  %v4307_v33 = vpack.c.bf16 %v4705_v32, %v4704_v37  ;;  %v5359_v37 = vmov 0.0   ;;  %v4714_v32 = vld [vmem:[#allocation5 + $0x950] sm:$0xff] }
 0x289   :  { %v2520_v34 = vmin.f32 %v2499_v50, 1.0  ;;  %v2689_v50 = vmul.f32 0.87758255, %v5141_v27 }
 0x28a   :  { %v2521_v9 = vmin.f32 %v2500_v31, 1.0 }
 0x28b   :  { %4356 = vrsqrt.f32 %v2520_v34  ;;  %vm2543_vm1 = vcmp.eq.f32.partialorder %v2520_v34, inf  ;;  %v2546_v29 = vand.u32 2147483648, %v2520_v34  ;;  %vm2545_vm2 = vcmp.eq.f32.partialorder %v2520_v34, 0.0 }
 0x28c   :  { %4358 = vrsqrt.f32 %v2521_v9  ;;  %3559 = vmatmul.mubr.f32.vlgmr.msra.gmra.mrb[18].mxu0 %v5033_v58  ;;  %vm2550_vm3 = vcmp.eq.f32.partialorder %v2521_v9, inf  ;;  %v2553_v41 = vand.u32 2147483648, %v2521_v9  ;;  %vm2552_vm4 = vcmp.eq.f32.partialorder %v2521_v9, 0.0 }
 0x28d   :  { %4298 = vmatpush3.bf16.xpose.msra.mxu0 %v4297_v26  ;;  %3626 = vmatprep.mubr.f32.mxu0 %v5033_v58  ;;  %4360 = vrsqrt.f32 %v1532_v1  ;;  %v2918_v26 = vadd.f32 -0.23971277, %v5139_v4 }
 0x28e   :  { %4282 = vmatpush3.bf16.xpose.msra.mxu1 %v4281_v47  ;;  %4300 = vmatprep.subr.bf16.mxu0 %v4299_v48  ;;  %4362 = vrsqrt.f32 %v1533_v52  ;;  %v2919_v47 = vadd.f32 -0.23971277, %v5141_v27 }
 0x28f   :  { %4284 = vmatprep.subr.bf16.mxu1 %v4283_v54 }
 0x295   :  { %v4357_v63 = vpop.eup %4356  ;;  %4302 = vmatpush3.bf16.xpose.msra.mxu0 %v4301_v53 }
 0x296   :  { %v4359_v35 = vpop.eup %4358  ;;  %v2542_v5 = vmul.f32 %v4357_v63, %v2520_v34  ;;  %4286 = vmatpush3.bf16.xpose.msra.mxu1 %v4285_v3  ;;  %4304 = vmatprep.subr.bf16.mxu0 %v4303_v13  ;;  %v4309_v13 = vpack.c.bf16 %v4707_v25, %v4706_v6  ;;  %v4708_v63 = vld [vmem:[#allocation5 + $0x9c0] sm:$0xff]  ;;  %v4720_v6 = vld [vmem:[#allocation5 + $0x9f0] sm:$0xff]  ;;  %v4721_v25 = vld [vmem:[#allocation5 + $0x9f8] sm:$0xff] }
 0x297   :  { %v2549_v30 = vmul.f32 %v4359_v35, %v2521_v9  ;;  %4288 = vmatprep.subr.bf16.mxu1 %v4287_v56  ;;  %v4361_v20 = vpop.eup %4360  ;;  %v4293_v56 = vpack.c.bf16 %v5013_v49, %v5011_v46  ;;  %v4709_v35 = vld [vmem:[#allocation5 + $0x9c8] sm:$0xff] }
 0x298   :  { %v2544_v40 = vsel %vm2543_vm1, %v2520_v34, %v2542_v5  ;;  %v4291_v34 = vpack.c.bf16 %v5001_v19, %v4999_v18  ;;  %v4363_v55 = vpop.eup %4362  ;;  %v2363_v18 = vrot.slane %v4361_v20, %v5133_v10  ;;  %v4711_v46 = vld [vmem:[#allocation5 + $0x948] sm:$0xff]  ;;  %v4716_v20 = vld [vmem:[#allocation5 + $0x9e0] sm:$0xff] }
 0x299   :  { %v2547_v44 = vsel %vm2545_vm2, %v2546_v29, %v2544_v40  ;;  %v2551_v12 = vsel %vm2550_vm3, %v2521_v9, %v2549_v30  ;;  %v2367_v54 = vrot.slane %v4363_v55, %v5133_v10 }
 0x29a   :  { %v2709_v7 = vmul.f32 0.47942555, %v2547_v44  ;;  %v2554_v60 = vsel %vm2552_vm4, %v2553_v41, %v2551_v12  ;;  %v4710_v41 = vld [vmem:[#allocation5 + $0x940] sm:$0xff]  ;;  %v4328_v44 = vpack.c.bf16 %v5021_v22, %v5019_v21  ;;  %v4712_v12 = vld [vmem:[#allocation5 + $0x9d0] sm:$0xff]  ;;  %v4715_v21 = vld [vmem:[#allocation5 + $0x958] sm:$0xff] }
 0x29b   :  { %v2710_v31 = vmul.f32 0.47942555, %v2554_v60  ;;  %v4313_v49 = vpack.c.bf16 %v4711_v46, %v4710_v41  ;;  %v1535_v60 = vmax.f32 %v5067_v17, 1e-24  ;;  %v4317_v22 = vpack.c.bf16 %v4715_v21, %v4714_v32 }
 0x29c   :  { %v2730_v59 = vsub.f32 %v2688_v2, %v2709_v7  ;;  %v4315_v2 = vpack.c.bf16 %v4713_v36, %v4712_v12  ;;  %v1534_v7 = vmax.f32 %v5065_v16, 1e-24  ;;  %v1489_v17 = vadd.s32 256, %v5164_v57  ;;  %v4723_v12 = vld [vmem:[#allocation5 + $0x978] sm:$0xff] }
 0x29d   :  { %v2731_v9 = vsub.f32 %v2689_v50, %v2710_v31  ;;  %4306 = vmatpush3.bf16.xpose.msra.mxu0 %v4305_v11  ;;  %v4717_v50 = vld [vmem:[#allocation5 + $0x9e8] sm:$0xff] }
 0x29e   :  { %v2793_v38 = vsel %vm2751_vm6, %v2730_v59, %v2918_v26  ;;  %4290 = vmatpush3.bf16.xpose.msra.mxu1 %v4289_v15  ;;  %4308 = vmatprep.subr.bf16.mxu0 %v4307_v33  ;;  %v4331_v33 = vpack.c.bf16 %v5030_v43, %v5028_v42  ;;  %v4319_v31 = vpack.c.bf16 %v4717_v50, %v4716_v20  ;;  %v1490_v43 = vadd.s32 384, %v5164_v57  ;;  %v5361_v20 = vld [vmem:[#allocation12_spill] sm:$0xff] }
 0x29f   :  { %v2794_v19 = vsel %vm2752_vm8, %v2731_v9, %v2919_v47  ;;  %v2838_v39 = vsel %vm2817_vm5, %v2793_v38, %v5139_v4  ;;  %v1709_v48 = vpop.f32.mrb[12].mxu0  ;;  %4292 = vmatprep.subr.bf16.mxu1 %v4291_v34  ;;  %vm2819_vm13 = vcmp.eq.s32.totalorder %v1489_v17, %v5169_v28  ;;  %v1536_v50 = vmax.f32 %v5361_v20, 1e-24 }
 0x2a0   :  { %v2839_v1 = vsel %vm2818_vm7, %v2794_v19, %v5141_v27  ;;  %v2859_v52 = vmul.f32 30.0, %v2838_v39  ;;  %v5186_v61 = vmul.f32 %v2363_v18, %v1709_v48  ;;  %v1711_v62 = vpop.f32.mrb[13].mxu0  ;;  %v4311_v27 = vpack.c.bf16 %v4709_v35, %v4708_v63  ;;  %v4718_v48 = vld [vmem:[#allocation5 + $0x960] sm:$0xff] }
 0x2a1   :  { %v2860_v53 = vmul.f32 30.0, %v2839_v1  ;;  %v5188_v3 = vmul.f32 %v2367_v54, %v1711_v62  ;;  %v4719_v54 = vld [vmem:[#allocation5 + $0x968] sm:$0xff]  ;;  %vm2820_vm15 = vcmp.eq.s32.totalorder %v1490_v43, %v5169_v28  ;;  %v1491_v17 = vadd.s32 512, %v5164_v57 }
 0x2a2   :  { %2880 = vst [vmem:[#allocation7] sm:$0xff] %v2859_v52  ;;  %v2459_v4 = vmul.f32 %v5186_v61, %v5186_v61  ;;  %v2690_v18 = vmul.f32 0.87758255, %v5186_v61  ;;  %v4321_v1 = vpack.c.bf16 %v4719_v54, %v4718_v48  ;;  %vm2753_vm14 = vcmp.gt.f32.partialorder %v5186_v61, -0.87758255 }
 0x2a3   :  { %2881 = vst [vmem:[#allocation7 + $0x8] sm:$0xff] %v2860_v53  ;;  %v2460_v5 = vmul.f32 %v5188_v3, %v5188_v3  ;;  %v2691_v52 = vmul.f32 0.87758255, %v5188_v3  ;;  %v4334_v53 = vpack.c.bf16 %v5049_v24, %v5047_v23  ;;  %v1492_v43 = vadd.s32 640, %v5164_v57 }
 0x2a4   :  { %v2480_v15 = vsub.f32 1.0, %v2459_v4  ;;  %vm2821_vm5 = vcmp.eq.s32.totalorder %v1491_v17, %v5169_v28 }
 0x2a5   :  { %v2481_v29 = vsub.f32 1.0, %v2460_v5  ;;  %4310 = vmatpush3.bf16.xpose.msra.mxu0 %v4309_v13  ;;  %v4323_v13 = vpack.c.bf16 %v4721_v25, %v4720_v6  ;;  %vm2822_vm7 = vcmp.eq.s32.totalorder %v1492_v43, %v5169_v28 }
 0x2a6   :  { %v2501_v30 = vmax.f32 %v2480_v15, 0.0  ;;  %4294 = vmatpush3.bf16.xpose.msra.mxu1 %v4293_v56  ;;  %4312 = vmatprep.subr.bf16.mxu0 %v4311_v27  ;;  %v2920_v56 = vadd.f32 -0.23971277, %v5186_v61  ;;  %v2921_v27 = vadd.f32 -0.23971277, %v5188_v3 }
 0x2a7   :  { %v2502_v0 = vmax.f32 %v2481_v29, 0.0  ;;  %4327 = vmatprep.subr.bf16.mxu1 %v5358_v8 }
 0x2a8   :  { %v2522_v11 = vmin.f32 %v2501_v30, 1.0 }
 0x2a9   :  { %v2523_v40 = vmin.f32 %v2502_v0, 1.0 }
 0x2aa   :  { %4364 = vrsqrt.f32 %v2522_v11  ;;  %vm2557_vm9 = vcmp.eq.f32.partialorder %v2522_v11, inf  ;;  %v2560_v59 = vand.u32 2147483648, %v2522_v11  ;;  %vm2559_vm10 = vcmp.eq.f32.partialorder %v2522_v11, 0.0 }
 0x2ab   :  { %4366 = vrsqrt.f32 %v2523_v40  ;;  %vm2564_vm11 = vcmp.eq.f32.partialorder %v2523_v40, inf  ;;  %v2567_v47 = vand.u32 2147483648, %v2523_v40  ;;  %vm2566_vm12 = vcmp.eq.f32.partialorder %v2523_v40, 0.0 }
 0x2ac   :  { %4368 = vrsqrt.f32 %v1534_v7 }
 0x2ad   :  { %3593 = vmatmul.mubr.f32.vlgmr.msra.gmra.mrb[18].mxu1 %v5033_v58  ;;  %4314 = vmatpush3.bf16.xpose.msra.mxu0 %v4313_v49  ;;  %4370 = vrsqrt.f32 %v1535_v60 }
 0x2ae   :  { %4329 = vmatpush3.bf16.xpose.msra.mxu1 %v4328_v44  ;;  %4316 = vmatprep.subr.bf16.mxu0 %v4315_v2  ;;  %v4722_v44 = vld [vmem:[#allocation5 + $0x970] sm:$0xff]  ;;  %v5360_v2 = vld [vmem:[#allocation11_spill] sm:$0xff] }
 0x2af   :  { %4330 = vmatprep.subr.bf16.mxu1 %v5358_v8  ;;  %3672 = vmatprep.mubr.msk.f32.mxu1 %vm4802_vm0, %v5359_v37  ;;  %vm2754_vm0 = vcmp.gt.f32.partialorder %v5188_v3, -0.87758255  ;;  %v4337_v7 = vpack.c.bf16 %v5360_v2, %v5056_v45 }
 0x2b4   :  { %v4365_v16 = vpop.eup %4364 }
 0x2b5   :  { %v4367_v34 = vpop.eup %4366  ;;  %v2556_v55 = vmul.f32 %v4365_v16, %v2522_v11  ;;  %4318 = vmatpush3.bf16.xpose.msra.mxu0 %v4317_v22 }
 0x2b6   :  { %v2563_v26 = vmul.f32 %v4367_v34, %v2523_v40  ;;  %4332 = vmatpush3.bf16.xpose.msra.mxu1 %v4331_v33  ;;  %4320 = vmatprep.subr.bf16.mxu0 %v4319_v31  ;;  %v4369_v63 = vpop.eup %4368  ;;  %v5362_v31 = vld [vmem:[#allocation13_spill] sm:$0xff] }
 0x2b7   :  { %v2558_v9 = vsel %vm2557_vm9, %v2522_v11, %v2556_v55  ;;  %4333 = vmatprep.subr.bf16.mxu1 %v5358_v8  ;;  %v4371_v5 = vpop.eup %4370  ;;  %v2371_v0 = vrot.slane %v4369_v63, %v5133_v10  ;;  %v1537_v45 = vmax.f32 %v5362_v31, 1e-24 }
 0x2b8   :  { %v2561_v42 = vsel %vm2559_vm10, %v2560_v59, %v2558_v9  ;;  %v2565_v38 = vsel %vm2564_vm11, %v2523_v40, %v2563_v26  ;;  %v2375_v41 = vrot.slane %v4371_v5, %v5133_v10 }
 0x2b9   :  { %v2711_v19 = vmul.f32 0.47942555, %v2561_v42  ;;  %v2568_v39 = vsel %vm2566_vm12, %v2567_v47, %v2565_v38 }
 0x2ba   :  { %v2712_v62 = vmul.f32 0.47942555, %v2568_v39 }
 0x2bb   :  { %v2732_v4 = vsub.f32 %v2690_v18, %v2711_v19 }
 0x2bc   :  { %v2733_v35 = vsub.f32 %v2691_v52, %v2712_v62 }
 0x2bd   :  { %v2795_v15 = vsel %vm2753_vm14, %v2732_v4, %v2920_v56  ;;  %4322 = vmatpush3.bf16.xpose.msra.mxu0 %v4321_v1 }
 0x2be   :  { %v2840_v23 = vsel %vm2819_vm13, %v2795_v15, %v5186_v61  ;;  %v2796_v24 = vsel %vm2754_vm0, %v2733_v35, %v2921_v27  ;;  %4335 = vmatpush3.bf16.xpose.msra.mxu1 %v4334_v53  ;;  %4324 = vmatprep.subr.bf16.mxu0 %v4323_v13  ;;  %v4325_v61 = vpack.c.bf16 %v4723_v12, %v4722_v44  ;;  %v1538_v12 = vmax.f32 %v5083_v14, 1e-24 }
 0x2bf   :  { %v2861_v29 = vmul.f32 30.0, %v2840_v23  ;;  %v2841_v30 = vsel %vm2820_vm15, %v2796_v24, %v5188_v3  ;;  %4336 = vmatprep.subr.bf16.mxu1 %v5358_v8 }
 0x2c0   :  { %v2862_v11 = vmul.f32 30.0, %v2841_v30  ;;  %v1780_v40 = vpop.f32.mrb[12].mxu1 }
 0x2c1   :  { %2882 = vst [vmem:[#allocation7 + $0x10] sm:$0xff] %v2861_v29  ;;  %v2440_v46 = vmul.f32 %v2371_v0, %v1780_v40  ;;  %v1782_v49 = vpop.f32.mrb[13].mxu1 }
 0x2c2   :  { %2883 = vst [vmem:[#allocation7 + $0x18] sm:$0xff] %v2862_v11  ;;  %v2441_v36 = vmul.f32 %v2375_v41, %v1782_v49 }
 0x2c3   :  { %v2461_v3 = vmul.f32 %v2440_v46, %v2440_v46  ;;  %v2692_v38 = vmul.f32 0.87758255, %v2440_v46  ;;  %v2922_v62 = vadd.f32 -0.23971277, %v2440_v46  ;;  %vm2755_vm6 = vcmp.gt.f32.partialorder %v2440_v46, -0.87758255 }
 0x2c4   :  { %v2462_v60 = vmul.f32 %v2441_v36, %v2441_v36  ;;  %v2693_v48 = vmul.f32 0.87758255, %v2441_v36  ;;  %v2923_v6 = vadd.f32 -0.23971277, %v2441_v36  ;;  %vm2756_vm8 = vcmp.gt.f32.partialorder %v2441_v36, -0.87758255 }
 0x2c5   :  { %v2482_v37 = vsub.f32 1.0, %v2461_v3  ;;  %4326 = vmatpush3.bf16.xpose.msra.mxu0 %v4325_v61  ;;  %v5363_v61 = vld [vmem:[#allocation14_spill] sm:$0xff] }
 0x2c6   :  { %v2483_v8 = vsub.f32 1.0, %v2462_v60  ;;  %4338 = vmatpush3.bf16.xpose.msra.mxu1 %v4337_v7  ;;  %v1493_v60 = vadd.s32 768, %v5164_v57 }
 0x2c7   :  { %v2503_v32 = vmax.f32 %v2482_v37, 0.0 }
 0x2c8   :  { %v2504_v21 = vmax.f32 %v2483_v8, 0.0  ;;  %vm2823_vm13 = vcmp.eq.s32.totalorder %v1493_v60, %v5169_v28 }
 0x2c9   :  { %v2524_v22 = vmin.f32 %v2503_v32, 1.0 }
 0x2ca   :  { %v2525_v33 = vmin.f32 %v2504_v21, 1.0 }
 0x2cb   :  { %4372 = vrsqrt.f32 %v2524_v22  ;;  %vm2571_vm1 = vcmp.eq.f32.partialorder %v2524_v22, inf  ;;  %v2574_v59 = vand.u32 2147483648, %v2524_v22  ;;  %vm2573_vm2 = vcmp.eq.f32.partialorder %v2524_v22, 0.0 }
 0x2cc   :  { %4374 = vrsqrt.f32 %v2525_v33  ;;  %3627 = vmatmul.mubr.f32.vlgmr.msra.gmra.mrb[20].mxu0 %v5033_v58  ;;  %vm2578_vm3 = vcmp.eq.f32.partialorder %v2525_v33, inf  ;;  %v2581_v47 = vand.u32 2147483648, %v2525_v33  ;;  %vm2580_vm4 = vcmp.eq.f32.partialorder %v2525_v33, 0.0 }
 0x2cd   :  { %3673 = vmatmul.mubr.f32.vlgmr.msra.gmra.mrb[20].mxu1 %v5033_v58  ;;  %4376 = vrsqrt.f32 %v1536_v50 }
 0x2ce   :  { %4378 = vrsqrt.f32 %v1537_v45 }
 0x2d5   :  { %v4373_v16 = vpop.eup %4372 }
 0x2d6   :  { %v4375_v34 = vpop.eup %4374  ;;  %v2570_v55 = vmul.f32 %v4373_v16, %v2524_v22 }
 0x2d7   :  { %v2577_v26 = vmul.f32 %v4375_v34, %v2525_v33  ;;  %v4377_v39 = vpop.eup %4376 }
 0x2d8   :  { %v2572_v9 = vsel %vm2571_vm1, %v2524_v22, %v2570_v55  ;;  %v4379_v1 = vpop.eup %4378  ;;  %v2379_v13 = vrot.slane %v4377_v39, %v5133_v10 }
 0x2d9   :  { %v2575_v42 = vsel %vm2573_vm2, %v2574_v59, %v2572_v9  ;;  %v2579_v58 = vsel %vm2578_vm3, %v2525_v33, %v2577_v26  ;;  %v2383_v35 = vrot.slane %v4379_v1, %v5133_v10  ;;  %v1494_v33 = vadd.s32 896, %v5164_v57 }
 0x2da   :  { %v2713_v18 = vmul.f32 0.47942555, %v2575_v42  ;;  %v2582_v19 = vsel %vm2580_vm4, %v2581_v47, %v2579_v58 }
 0x2db   :  { %v2714_v54 = vmul.f32 0.47942555, %v2582_v19  ;;  %vm2824_vm15 = vcmp.eq.s32.totalorder %v1494_v33, %v5169_v28 }
 0x2dc   :  { %v2734_v52 = vsub.f32 %v2692_v38, %v2713_v18 }
 0x2dd   :  { %v2735_v53 = vsub.f32 %v2693_v48, %v2714_v54 }
 0x2de   :  { %v2797_v25 = vsel %vm2755_vm6, %v2734_v52, %v2922_v62 }
 0x2df   :  { %v2842_v4 = vsel %vm2821_vm5, %v2797_v25, %v2440_v46  ;;  %v2798_v56 = vsel %vm2756_vm8, %v2735_v53, %v2923_v6  ;;  %v1851_v63 = vpop.f32.mrb[14].mxu0 }
 0x2e0   :  { %v2863_v27 = vmul.f32 30.0, %v2842_v4  ;;  %v2843_v5 = vsel %vm2822_vm7, %v2798_v56, %v2441_v36  ;;  %v2442_v15 = vmul.f32 %v2379_v13, %v1851_v63  ;;  %v1853_v23 = vpop.f32.mrb[15].mxu0  ;;  %v1539_v36 = vmax.f32 %v5363_v61, 1e-24 }
 0x2e1   :  { %v2864_v24 = vmul.f32 30.0, %v2843_v5  ;;  %v2443_v29 = vmul.f32 %v2383_v35, %v1853_v23  ;;  %v5364_v35 = vld [vmem:[#allocation15_spill] sm:$0xff]  ;;  %v5365_v5 = vld [vmem:[#allocation16_spill] sm:$0xff] }
 0x2e2   :  { %2884 = vst [vmem:[#allocation7 + $0x20] sm:$0xff] %v2863_v27  ;;  %v2463_v30 = vmul.f32 %v2442_v15, %v2442_v15  ;;  %v2694_v20 = vmul.f32 0.87758255, %v2442_v15  ;;  %v2924_v55 = vadd.f32 -0.23971277, %v2442_v15 }
 0x2e3   :  { %2885 = vst [vmem:[#allocation7 + $0x28] sm:$0xff] %v2864_v24  ;;  %v2464_v0 = vmul.f32 %v2443_v29, %v2443_v29  ;;  %v2695_v45 = vmul.f32 0.87758255, %v2443_v29  ;;  %vm2757_vm14 = vcmp.gt.f32.partialorder %v2442_v15, -0.87758255 }
 0x2e4   :  { %v2484_v11 = vsub.f32 1.0, %v2463_v30  ;;  %v2925_v26 = vadd.f32 -0.23971277, %v2443_v29  ;;  %vm2758_vm0 = vcmp.gt.f32.partialorder %v2443_v29, -0.87758255  ;;  %v1495_v30 = vadd.s32 1024, %v5164_v57 }
 0x2e5   :  { %v2485_v40 = vsub.f32 1.0, %v2464_v0  ;;  %v1540_v27 = vmax.f32 %v5364_v35, 1e-24 }
 0x2e6   :  { %v2505_v41 = vmax.f32 %v2484_v11, 0.0  ;;  %vm2825_vm5 = vcmp.eq.s32.totalorder %v1495_v30, %v5169_v28 }
 0x2e7   :  { %v2506_v49 = vmax.f32 %v2485_v40, 0.0 }
 0x2e8   :  { %v2526_v44 = vmin.f32 %v2505_v41, 1.0 }
 0x2e9   :  { %v2527_v46 = vmin.f32 %v2506_v49, 1.0 }
 0x2ea   :  { %4380 = vrsqrt.f32 %v2526_v44  ;;  %vm2585_vm9 = vcmp.eq.f32.partialorder %v2526_v44, inf  ;;  %v2588_v37 = vand.u32 2147483648, %v2526_v44  ;;  %vm2587_vm10 = vcmp.eq.f32.partialorder %v2526_v44, 0.0 }
 0x2eb   :  { %4382 = vrsqrt.f32 %v2527_v46  ;;  %vm2592_vm11 = vcmp.eq.f32.partialorder %v2527_v46, inf  ;;  %v2595_v21 = vand.u32 2147483648, %v2527_v46  ;;  %vm2594_vm12 = vcmp.eq.f32.partialorder %v2527_v46, 0.0 }
 0x2ec   :  { %4384 = vrsqrt.f32 %v1538_v12 }
 0x2ed   :  { %4386 = vrsqrt.f32 %v1539_v36 }
 0x2f4   :  { %v4381_v2 = vpop.eup %4380 }
 0x2f5   :  { %v4383_v7 = vpop.eup %4382  ;;  %v2584_v3 = vmul.f32 %v4381_v2, %v2526_v44 }
 0x2f6   :  { %v2591_v8 = vmul.f32 %v4383_v7, %v2527_v46  ;;  %v4385_v17 = vpop.eup %4384 }
 0x2f7   :  { %v2586_v32 = vsel %vm2585_vm9, %v2526_v44, %v2584_v3  ;;  %v4387_v9 = vpop.eup %4386  ;;  %v2387_v18 = vrot.slane %v4385_v17, %v5133_v10  ;;  %v1496_v44 = vadd.s32 1152, %v5164_v57 }
 0x2f8   :  { %v2589_v22 = vsel %vm2587_vm10, %v2588_v37, %v2586_v32  ;;  %v2593_v14 = vsel %vm2592_vm11, %v2527_v46, %v2591_v8  ;;  %v2391_v48 = vrot.slane %v4387_v9, %v5133_v10 }
 0x2f9   :  { %v2715_v50 = vmul.f32 0.47942555, %v2589_v22  ;;  %v2596_v31 = vsel %vm2594_vm12, %v2595_v21, %v2593_v14  ;;  %vm2826_vm7 = vcmp.eq.s32.totalorder %v1496_v44, %v5169_v28 }
 0x2fa   :  { %v2716_v16 = vmul.f32 0.47942555, %v2596_v31 }
 0x2fb   :  { %v2736_v34 = vsub.f32 %v2694_v20, %v2715_v50 }
 0x2fc   :  { %v2737_v59 = vsub.f32 %v2695_v45, %v2716_v16 }
 0x2fd   :  { %v2799_v47 = vsel %vm2757_vm14, %v2736_v34, %v2924_v55 }
 0x2fe   :  { %v2844_v42 = vsel %vm2823_vm13, %v2799_v47, %v2442_v15  ;;  %v2800_v43 = vsel %vm2758_vm0, %v2737_v59, %v2925_v26  ;;  %v1541_v15 = vmax.f32 %v5365_v5, 1e-24 }
 0x2ff   :  { %v2865_v58 = vmul.f32 30.0, %v2844_v42  ;;  %v2845_v38 = vsel %vm2824_vm15, %v2800_v43, %v2443_v29 }
 0x300   :  { %v2866_v19 = vmul.f32 30.0, %v2845_v38  ;;  %v1922_v39 = vpop.f32.mrb[14].mxu1 }
 0x301   :  { %2886 = vst [vmem:[#allocation7 + $0x30] sm:$0xff] %v2865_v58  ;;  %v2444_v54 = vmul.f32 %v2387_v18, %v1922_v39  ;;  %v1924_v1 = vpop.f32.mrb[15].mxu1 }
 0x302   :  { %2887 = vst [vmem:[#allocation7 + $0x38] sm:$0xff] %v2866_v19  ;;  %v2445_v52 = vmul.f32 %v2391_v48, %v1924_v1  ;;  %v5366_v19 = vld [vmem:[#allocation17_spill] sm:$0xff]  ;;  %v5367_v48 = vld [vmem:[#allocation18_spill] sm:$0xff] }
 0x303   :  { %v2465_v62 = vmul.f32 %v2444_v54, %v2444_v54  ;;  %v2696_v12 = vmul.f32 0.87758255, %v2444_v54  ;;  %v2926_v8 = vadd.f32 -0.23971277, %v2444_v54  ;;  %vm2759_vm6 = vcmp.gt.f32.partialorder %v2444_v54, -0.87758255 }
 0x304   :  { %v2466_v53 = vmul.f32 %v2445_v52, %v2445_v52  ;;  %v2697_v7 = vmul.f32 0.87758255, %v2445_v52  ;;  %v2927_v21 = vadd.f32 -0.23971277, %v2445_v52  ;;  %vm2760_vm8 = vcmp.gt.f32.partialorder %v2445_v52, -0.87758255 }
 0x305   :  { %v2486_v6 = vsub.f32 1.0, %v2465_v62  ;;  %v1542_v39 = vmax.f32 %v5366_v19, 1e-24 }
 0x306   :  { %v2487_v25 = vsub.f32 1.0, %v2466_v53  ;;  %v1497_v53 = vadd.s32 1280, %v5164_v57 }
 0x307   :  { %v2507_v13 = vmax.f32 %v2486_v6, 0.0 }
 0x308   :  { %v2508_v4 = vmax.f32 %v2487_v25, 0.0  ;;  %vm2827_vm13 = vcmp.eq.s32.totalorder %v1497_v53, %v5169_v28 }
 0x309   :  { %v2528_v56 = vmin.f32 %v2507_v13, 1.0 }
 0x30a   :  { %v2529_v63 = vmin.f32 %v2508_v4, 1.0 }
 0x30b   :  { %4388 = vrsqrt.f32 %v2528_v56  ;;  %vm2599_vm1 = vcmp.eq.f32.partialorder %v2528_v56, inf  ;;  %v2602_v0 = vand.u32 2147483648, %v2528_v56  ;;  %vm2601_vm2 = vcmp.eq.f32.partialorder %v2528_v56, 0.0 }
 0x30c   :  { %4390 = vrsqrt.f32 %v2529_v63  ;;  %vm2606_vm3 = vcmp.eq.f32.partialorder %v2529_v63, inf  ;;  %v2609_v41 = vand.u32 2147483648, %v2529_v63  ;;  %vm2608_vm4 = vcmp.eq.f32.partialorder %v2529_v63, 0.0 }
 0x30d   :  { %4392 = vrsqrt.f32 %v1540_v27 }
 0x30e   :  { %4394 = vrsqrt.f32 %v1541_v15 }
 0x315   :  { %v4389_v23 = vpop.eup %4388 }
 0x316   :  { %v4391_v24 = vpop.eup %4390  ;;  %v2598_v29 = vmul.f32 %v4389_v23, %v2528_v56 }
 0x317   :  { %v2605_v11 = vmul.f32 %v4391_v24, %v2529_v63  ;;  %v4393_v2 = vpop.eup %4392 }
 0x318   :  { %v2600_v40 = vsel %vm2599_vm1, %v2528_v56, %v2598_v29  ;;  %v4395_v60 = vpop.eup %4394  ;;  %v2395_v33 = vrot.slane %v4393_v2, %v5133_v10 }
 0x319   :  { %v2603_v49 = vsel %vm2601_vm2, %v2602_v0, %v2600_v40  ;;  %v2607_v46 = vsel %vm2606_vm3, %v2529_v63, %v2605_v11  ;;  %v2399_v31 = vrot.slane %v4395_v60, %v5133_v10  ;;  %v1498_v63 = vadd.s32 1408, %v5164_v57 }
 0x31a   :  { %v2717_v61 = vmul.f32 0.47942555, %v2603_v49  ;;  %v2610_v36 = vsel %vm2608_vm4, %v2609_v41, %v2607_v46 }
 0x31b   :  { %v2718_v3 = vmul.f32 0.47942555, %v2610_v36  ;;  %vm2828_vm15 = vcmp.eq.s32.totalorder %v1498_v63, %v5169_v28 }
 0x31c   :  { %v2738_v37 = vsub.f32 %v2696_v12, %v2717_v61 }
 0x31d   :  { %v2739_v32 = vsub.f32 %v2697_v7, %v2718_v3 }
 0x31e   :  { %v2801_v22 = vsel %vm2759_vm6, %v2738_v37, %v2926_v8 }
 0x31f   :  { %v2846_v14 = vsel %vm2825_vm5, %v2801_v22, %v2444_v54  ;;  %v2802_v20 = vsel %vm2760_vm8, %v2739_v32, %v2927_v21  ;;  %v1993_v50 = vpop.f32.mrb[16].mxu0  ;;  %v1543_v54 = vmax.f32 %v5367_v48, 1e-24 }
 0x320   :  { %v2867_v45 = vmul.f32 30.0, %v2846_v14  ;;  %v2847_v16 = vsel %vm2826_vm7, %v2802_v20, %v2445_v52  ;;  %v2446_v34 = vmul.f32 %v2395_v33, %v1993_v50  ;;  %v1995_v55 = vpop.f32.mrb[17].mxu0 }
 0x321   :  { %v2868_v17 = vmul.f32 30.0, %v2847_v16  ;;  %v2447_v59 = vmul.f32 %v2399_v31, %v1995_v55 }
 0x322   :  { %2888 = vst [vmem:[#allocation7 + $0x40] sm:$0xff] %v2867_v45  ;;  %v2467_v26 = vmul.f32 %v2446_v34, %v2446_v34  ;;  %v2698_v27 = vmul.f32 0.87758255, %v2446_v34  ;;  %v2928_v30 = vadd.f32 -0.23971277, %v2446_v34  ;;  %v5368_v45 = vld [vmem:[#allocation19_spill] sm:$0xff] }
 0x323   :  { %2889 = vst [vmem:[#allocation7 + $0x48] sm:$0xff] %v2868_v17  ;;  %v2468_v9 = vmul.f32 %v2447_v59, %v2447_v59  ;;  %v2699_v23 = vmul.f32 0.87758255, %v2447_v59  ;;  %vm2761_vm14 = vcmp.gt.f32.partialorder %v2446_v34, -0.87758255 }
 0x324   :  { %v2488_v47 = vsub.f32 1.0, %v2467_v26  ;;  %v2929_v40 = vadd.f32 -0.23971277, %v2447_v59  ;;  %vm2762_vm0 = vcmp.gt.f32.partialorder %v2447_v59, -0.87758255 }
 0x325   :  { %v2489_v42 = vsub.f32 1.0, %v2468_v9  ;;  %v1544_v16 = vmax.f32 %v5368_v45, 1e-24  ;;  %v1499_v9 = vadd.s32 1536, %v5164_v57 }
 0x326   :  { %v2509_v43 = vmax.f32 %v2488_v47, 0.0 }
 0x327   :  { %v2510_v58 = vmax.f32 %v2489_v42, 0.0  ;;  %vm2829_vm5 = vcmp.eq.s32.totalorder %v1499_v9, %v5169_v28 }
 0x328   :  { %v2530_v38 = vmin.f32 %v2509_v43, 1.0 }
 0x329   :  { %v2531_v18 = vmin.f32 %v2510_v58, 1.0 }
 0x32a   :  { %4396 = vrsqrt.f32 %v2530_v38  ;;  %vm2613_vm9 = vcmp.eq.f32.partialorder %v2530_v38, inf  ;;  %v2616_v6 = vand.u32 2147483648, %v2530_v38  ;;  %vm2615_vm10 = vcmp.eq.f32.partialorder %v2530_v38, 0.0 }
 0x32b   :  { %4398 = vrsqrt.f32 %v2531_v18  ;;  %vm2620_vm11 = vcmp.eq.f32.partialorder %v2531_v18, inf  ;;  %v2623_v4 = vand.u32 2147483648, %v2531_v18  ;;  %vm2622_vm12 = vcmp.eq.f32.partialorder %v2531_v18, 0.0 }
 0x32c   :  { %4400 = vrsqrt.f32 %v1542_v39 }
 0x32d   :  { %4402 = vrsqrt.f32 %v1543_v54 }
 0x334   :  { %v4397_v1 = vpop.eup %4396 }
 0x335   :  { %v4399_v52 = vpop.eup %4398  ;;  %v2612_v62 = vmul.f32 %v4397_v1, %v2530_v38 }
 0x336   :  { %v2619_v25 = vmul.f32 %v4399_v52, %v2531_v18  ;;  %v4401_v0 = vpop.eup %4400 }
 0x337   :  { %v2614_v13 = vsel %vm2613_vm9, %v2530_v38, %v2612_v62  ;;  %v4403_v41 = vpop.eup %4402  ;;  %v2403_v36 = vrot.slane %v4401_v0, %v5133_v10 }
 0x338   :  { %v2617_v56 = vsel %vm2615_vm10, %v2616_v6, %v2614_v13  ;;  %v2621_v35 = vsel %vm2620_vm11, %v2531_v18, %v2619_v25  ;;  %v2407_v3 = vrot.slane %v4403_v41, %v5133_v10  ;;  %v1500_v18 = vadd.s32 1664, %v5164_v57 }
 0x339   :  { %v2719_v5 = vmul.f32 0.47942555, %v2617_v56  ;;  %v2624_v15 = vsel %vm2622_vm12, %v2623_v4, %v2621_v35 }
 0x33a   :  { %v2720_v24 = vmul.f32 0.47942555, %v2624_v15  ;;  %vm2830_vm7 = vcmp.eq.s32.totalorder %v1500_v18, %v5169_v28 }
 0x33b   :  { %v2740_v29 = vsub.f32 %v2698_v27, %v2719_v5 }
 0x33c   :  { %v2741_v11 = vsub.f32 %v2699_v23, %v2720_v24 }
 0x33d   :  { %v2803_v49 = vsel %vm2761_vm14, %v2740_v29, %v2928_v30 }
 0x33e   :  { %v2848_v44 = vsel %vm2827_vm13, %v2803_v49, %v2446_v34  ;;  %v2804_v46 = vsel %vm2762_vm0, %v2741_v11, %v2929_v40  ;;  %v5369_v34 = vld [vmem:[#allocation20_spill] sm:$0xff] }
 0x33f   :  { %v2869_v12 = vmul.f32 30.0, %v2848_v44  ;;  %v2849_v61 = vsel %vm2828_vm15, %v2804_v46, %v2447_v59  ;;  %v1545_v55 = vmax.f32 %v5369_v34, 1e-24 }
 0x340   :  { %v2870_v2 = vmul.f32 30.0, %v2849_v61  ;;  %v2064_v7 = vpop.f32.mrb[16].mxu1 }
 0x341   :  { %2890 = vst [vmem:[#allocation7 + $0x50] sm:$0xff] %v2869_v12  ;;  %v2448_v60 = vmul.f32 %v2403_v36, %v2064_v7  ;;  %v2066_v37 = vpop.f32.mrb[17].mxu1 }
 0x342   :  { %2891 = vst [vmem:[#allocation7 + $0x58] sm:$0xff] %v2870_v2  ;;  %v2449_v8 = vmul.f32 %v2407_v3, %v2066_v37  ;;  %v5370_v2 = vld [vmem:[#allocation21_spill] sm:$0xff]  ;;  %v5371_v3 = vld [vmem:[#allocation22_spill] sm:$0xff] }
 0x343   :  { %v2469_v32 = vmul.f32 %v2448_v60, %v2448_v60  ;;  %v2700_v39 = vmul.f32 0.87758255, %v2448_v60  ;;  %v2930_v25 = vadd.f32 -0.23971277, %v2448_v60  ;;  %vm2763_vm6 = vcmp.gt.f32.partialorder %v2448_v60, -0.87758255 }
 0x344   :  { %v2470_v21 = vmul.f32 %v2449_v8, %v2449_v8  ;;  %v2701_v52 = vmul.f32 0.87758255, %v2449_v8  ;;  %v2931_v4 = vadd.f32 -0.23971277, %v2449_v8  ;;  %vm2764_vm8 = vcmp.gt.f32.partialorder %v2449_v8, -0.87758255 }
 0x345   :  { %v2490_v22 = vsub.f32 1.0, %v2469_v32  ;;  %v1546_v7 = vmax.f32 %v5370_v2, 1e-24  ;;  %v1504_v2 = vadd.s32 2176, %v5164_v57 }
 0x346   :  { %v2491_v33 = vsub.f32 1.0, %v2470_v21  ;;  %v1501_v21 = vadd.s32 1792, %v5164_v57 }
 0x347   :  { %v2511_v14 = vmax.f32 %v2490_v22, 0.0 }
 0x348   :  { %v2512_v20 = vmax.f32 %v2491_v33, 0.0  ;;  %vm2831_vm13 = vcmp.eq.s32.totalorder %v1501_v21, %v5169_v28 }
 0x349   :  { %v2532_v50 = vmin.f32 %v2511_v14, 1.0 }
 0x34a   :  { %v2533_v31 = vmin.f32 %v2512_v20, 1.0 }
 0x34b   :  { %4404 = vrsqrt.f32 %v2532_v50  ;;  %vm2627_vm1 = vcmp.eq.f32.partialorder %v2532_v50, inf  ;;  %v2630_v47 = vand.u32 2147483648, %v2532_v50  ;;  %vm2629_vm2 = vcmp.eq.f32.partialorder %v2532_v50, 0.0 }
 0x34c   :  { %4406 = vrsqrt.f32 %v2533_v31  ;;  %vm2634_vm3 = vcmp.eq.f32.partialorder %v2533_v31, inf  ;;  %v2637_v58 = vand.u32 2147483648, %v2533_v31  ;;  %vm2636_vm4 = vcmp.eq.f32.partialorder %v2533_v31, 0.0 }
 0x34d   :  { %4408 = vrsqrt.f32 %v1544_v16 }
 0x34e   :  { %4410 = vrsqrt.f32 %v1545_v55 }
 0x355   :  { %v4405_v17 = vpop.eup %4404 }
 0x356   :  { %v4407_v59 = vpop.eup %4406  ;;  %v2626_v26 = vmul.f32 %v4405_v17, %v2532_v50 }
 0x357   :  { %v2633_v42 = vmul.f32 %v4407_v59, %v2533_v31  ;;  %v4409_v1 = vpop.eup %4408 }
 0x358   :  { %v2628_v43 = vsel %vm2627_vm1, %v2532_v50, %v2626_v26  ;;  %v4411_v53 = vpop.eup %4410  ;;  %v2411_v63 = vrot.slane %v4409_v1, %v5133_v10 }
 0x359   :  { %v2631_v38 = vsel %vm2629_vm2, %v2630_v47, %v2628_v43  ;;  %v2635_v19 = vsel %vm2634_vm3, %v2533_v31, %v2633_v42  ;;  %v2415_v15 = vrot.slane %v4411_v53, %v5133_v10  ;;  %v1502_v31 = vadd.s32 1920, %v5164_v57 }
 0x35a   :  { %v2721_v48 = vmul.f32 0.47942555, %v2631_v38  ;;  %v2638_v54 = vsel %vm2636_vm4, %v2637_v58, %v2635_v19 }
 0x35b   :  { %v2722_v62 = vmul.f32 0.47942555, %v2638_v54  ;;  %vm2832_vm15 = vcmp.eq.s32.totalorder %v1502_v31, %v5169_v28 }
 0x35c   :  { %v2742_v6 = vsub.f32 %v2700_v39, %v2721_v48 }
 0x35d   :  { %v2743_v13 = vsub.f32 %v2701_v52, %v2722_v62 }
 0x35e   :  { %v2805_v56 = vsel %vm2763_vm6, %v2742_v6, %v2930_v25 }
 0x35f   :  { %v2850_v35 = vsel %vm2829_vm5, %v2805_v56, %v2448_v60  ;;  %v2806_v27 = vsel %vm2764_vm8, %v2743_v13, %v2931_v4  ;;  %v2135_v5 = vpop.f32.mrb[18].mxu0  ;;  %v1547_v60 = vmax.f32 %v5371_v3, 1e-24 }
 0x360   :  { %v2871_v23 = vmul.f32 30.0, %v2850_v35  ;;  %v2851_v24 = vsel %vm2830_vm7, %v2806_v27, %v2449_v8  ;;  %v2450_v29 = vmul.f32 %v2411_v63, %v2135_v5  ;;  %v2137_v30 = vpop.f32.mrb[19].mxu0  ;;  %vm2834_vm7 = vcmp.eq.s32.totalorder %v1504_v2, %v5169_v28 }
 0x361   :  { %v2872_v0 = vmul.f32 30.0, %v2851_v24  ;;  %v2451_v11 = vmul.f32 %v2415_v15, %v2137_v30 }
 0x362   :  { %2892 = vst [vmem:[#allocation7 + $0x60] sm:$0xff] %v2871_v23  ;;  %v2471_v40 = vmul.f32 %v2450_v29, %v2450_v29  ;;  %v2702_v16 = vmul.f32 0.87758255, %v2450_v29  ;;  %v2932_v9 = vadd.f32 -0.23971277, %v2450_v29  ;;  %v5372_v23 = vld [vmem:[#allocation23_spill] sm:$0xff] }
 0x363   :  { %2893 = vst [vmem:[#allocation7 + $0x68] sm:$0xff] %v2872_v0  ;;  %v2472_v41 = vmul.f32 %v2451_v11, %v2451_v11  ;;  %v2703_v17 = vmul.f32 0.87758255, %v2451_v11  ;;  %vm2765_vm14 = vcmp.gt.f32.partialorder %v2450_v29, -0.87758255 }
 0x364   :  { %v2492_v49 = vsub.f32 1.0, %v2471_v40  ;;  %v2933_v43 = vadd.f32 -0.23971277, %v2451_v11  ;;  %vm2766_vm0 = vcmp.gt.f32.partialorder %v2451_v11, -0.87758255 }
 0x365   :  { %v2493_v44 = vsub.f32 1.0, %v2472_v41  ;;  %v1548_v24 = vmax.f32 %v5372_v23, 1e-24  ;;  %v1550_v0 = vmax.f32 %v5117_v51, 1e-24 }
 0x366   :  { %v2513_v46 = vmax.f32 %v2492_v49, 0.0  ;;  %v1503_v49 = vadd.s32 2048, %v5164_v57 }
 0x367   :  { %v2514_v12 = vmax.f32 %v2493_v44, 0.0 }
 0x368   :  { %v2534_v61 = vmin.f32 %v2513_v46, 1.0  ;;  %vm2833_vm5 = vcmp.eq.s32.totalorder %v1503_v49, %v5169_v28 }
 0x369   :  { %v2535_v36 = vmin.f32 %v2514_v12, 1.0 }
 0x36a   :  { %4412 = vrsqrt.f32 %v2534_v61  ;;  %vm2641_vm9 = vcmp.eq.f32.partialorder %v2534_v61, inf  ;;  %v2644_v22 = vand.u32 2147483648, %v2534_v61  ;;  %vm2643_vm10 = vcmp.eq.f32.partialorder %v2534_v61, 0.0 }
 0x36b   :  { %4414 = vrsqrt.f32 %v2535_v36  ;;  %vm2648_vm11 = vcmp.eq.f32.partialorder %v2535_v36, inf  ;;  %v2651_v20 = vand.u32 2147483648, %v2535_v36  ;;  %vm2650_vm12 = vcmp.eq.f32.partialorder %v2535_v36, 0.0 }
 0x36c   :  { %4416 = vrsqrt.f32 %v1546_v7 }
 0x36d   :  { %4418 = vrsqrt.f32 %v1547_v60 }
 0x374   :  { %v4413_v37 = vpop.eup %4412 }
 0x375   :  { %v4415_v8 = vpop.eup %4414  ;;  %v2640_v32 = vmul.f32 %v4413_v37, %v2534_v61 }
 0x376   :  { %v2647_v33 = vmul.f32 %v4415_v8, %v2535_v36  ;;  %v4417_v47 = vpop.eup %4416 }
 0x377   :  { %v2642_v14 = vsel %vm2641_vm9, %v2534_v61, %v2640_v32  ;;  %v4419_v58 = vpop.eup %4418  ;;  %v2419_v54 = vrot.slane %v4417_v47, %v5133_v10 }
 0x378   :  { %v2645_v50 = vsel %vm2643_vm10, %v2644_v22, %v2642_v14  ;;  %v2649_v45 = vsel %vm2648_vm11, %v2535_v36, %v2647_v33  ;;  %v2423_v62 = vrot.slane %v4419_v58, %v5133_v10 }
 0x379   :  { %v2723_v34 = vmul.f32 0.47942555, %v2645_v50  ;;  %v2652_v55 = vsel %vm2650_vm12, %v2651_v20, %v2649_v45 }
 0x37a   :  { %v2724_v59 = vmul.f32 0.47942555, %v2652_v55 }
 0x37b   :  { %v2744_v26 = vsub.f32 %v2702_v16, %v2723_v34 }
 0x37c   :  { %v2745_v42 = vsub.f32 %v2703_v17, %v2724_v59 }
 0x37d   :  { %v2807_v38 = vsel %vm2765_vm14, %v2744_v26, %v2932_v9 }
 0x37e   :  { %v2852_v18 = vsel %vm2831_vm13, %v2807_v38, %v2450_v29  ;;  %v2808_v19 = vsel %vm2766_vm0, %v2745_v42, %v2933_v43  ;;  %v5373_v29 = vld [vmem:[#allocation24_spill] sm:$0xff] }
 0x37f   :  { %v2873_v39 = vmul.f32 30.0, %v2852_v18  ;;  %v2853_v48 = vsel %vm2832_vm15, %v2808_v19, %v2451_v11  ;;  %v1549_v30 = vmax.f32 %v5373_v29, 1e-24 }
 0x380   :  { %v2874_v1 = vmul.f32 30.0, %v2853_v48  ;;  %v2206_v52 = vpop.f32.mrb[18].mxu1 }
 0x381   :  { %2894 = vst [vmem:[#allocation7 + $0x70] sm:$0xff] %v2873_v39  ;;  %v2452_v53 = vmul.f32 %v2419_v54, %v2206_v52  ;;  %v2208_v6 = vpop.f32.mrb[19].mxu1 }
 0x382   :  { %2895 = vst [vmem:[#allocation7 + $0x78] sm:$0xff] %v2874_v1  ;;  %v2453_v25 = vmul.f32 %v2423_v62, %v2208_v6 }
 0x383   :  { %v2473_v13 = vmul.f32 %v2452_v53, %v2452_v53  ;;  %v2704_v3 = vmul.f32 0.87758255, %v2452_v53  ;;  %v2934_v14 = vadd.f32 -0.23971277, %v2452_v53  ;;  %vm2767_vm6 = vcmp.gt.f32.partialorder %v2452_v53, -0.87758255 }
 0x384   :  { %v2474_v4 = vmul.f32 %v2453_v25, %v2453_v25  ;;  %v2705_v32 = vmul.f32 0.87758255, %v2453_v25  ;;  %v2935_v50 = vadd.f32 -0.23971277, %v2453_v25  ;;  %vm2768_vm8 = vcmp.gt.f32.partialorder %v2453_v25, -0.87758255 }
 0x385   :  { %v2494_v56 = vsub.f32 1.0, %v2473_v13 }
 0x386   :  { %v2495_v63 = vsub.f32 1.0, %v2474_v4 }
 0x387   :  { %v2515_v35 = vmax.f32 %v2494_v56, 0.0  ;;  %v1505_v56 = vadd.s32 2304, %v5164_v57 }
 0x388   :  { %v2516_v27 = vmax.f32 %v2495_v63, 0.0 }
 0x389   :  { %v2536_v5 = vmin.f32 %v2515_v35, 1.0  ;;  %v1507_v35 = vadd.s32 2560, %v5164_v57  ;;  %vm2835_vm9 = vcmp.eq.s32.totalorder %v1505_v56, %v5169_v28 }
 0x38a   :  { %v2537_v15 = vmin.f32 %v2516_v27, 1.0 }
 0x38b   :  { %4420 = vrsqrt.f32 %v2536_v5  ;;  %vm2655_vm1 = vcmp.eq.f32.partialorder %v2536_v5, inf  ;;  %v2658_v44 = vand.u32 2147483648, %v2536_v5  ;;  %vm2657_vm2 = vcmp.eq.f32.partialorder %v2536_v5, 0.0 }
 0x38c   :  { %4422 = vrsqrt.f32 %v2537_v15  ;;  %vm2662_vm3 = vcmp.eq.f32.partialorder %v2537_v15, inf  ;;  %v2665_v61 = vand.u32 2147483648, %v2537_v15  ;;  %vm2664_vm4 = vcmp.eq.f32.partialorder %v2537_v15, 0.0 }
 0x38d   :  { %4424 = vrsqrt.f32 %v1548_v24  ;;  %v1506_v24 = vadd.s32 2432, %v5164_v57  ;;  %vm2837_vm14 = vcmp.eq.s32.totalorder %v1507_v35, %v5169_v28 }
 0x38e   :  { %4426 = vrsqrt.f32 %v1549_v30 }
 0x38f   :  { %4428 = vrsqrt.f32 %v1550_v0 }
 0x395   :  { %v4421_v11 = vpop.eup %4420 }
 0x396   :  { %v4423_v40 = vpop.eup %4422  ;;  %v2654_v41 = vmul.f32 %v4421_v11, %v2536_v5 }
 0x397   :  { %v2661_v46 = vmul.f32 %v4423_v40, %v2537_v15  ;;  %v4425_v51 = vpop.eup %4424 }
 0x398   :  { %v2656_v12 = vsel %vm2655_vm1, %v2536_v5, %v2654_v41  ;;  %v4427_v8 = vpop.eup %4426  ;;  %v2427_v45 = vrot.slane %v4425_v51, %v5133_v10 }
 0x399   :  { %v2659_v36 = vsel %vm2657_vm2, %v2658_v44, %v2656_v12  ;;  %v2663_v7 = vsel %vm2662_vm3, %v2537_v15, %v2661_v46  ;;  %v4429_v22 = vpop.eup %4428  ;;  %v2431_v59 = vrot.slane %v4427_v8, %v5133_v10  ;;  %vm2900_vm3 = vcmask 506880  }
 0x39a   :  { %v2725_v60 = vmul.f32 0.47942555, %v2659_v36  ;;  %v2666_v37 = vsel %vm2664_vm4, %v2665_v61, %v2663_v7  ;;  %v2435_v17 = vrot.slane %v4429_v22, %v5133_v10  ;;  %vm2836_vm4 = vcmp.eq.s32.totalorder %v1506_v24, %v5169_v28 }
 0x39b   :  { %v2726_v21 = vmul.f32 0.47942555, %v2666_v37 }
 0x39c   :  { %v2746_v33 = vsub.f32 %v2704_v3, %v2725_v60 }
 0x39d   :  { %v2747_v20 = vsub.f32 %v2705_v32, %v2726_v21 }
 0x39e   :  { %v2809_v31 = vsel %vm2767_vm6, %v2746_v33, %v2934_v14 }
 0x39f   :  { %v2854_v16 = vsel %vm2833_vm5, %v2809_v31, %v2452_v53  ;;  %v2810_v34 = vsel %vm2768_vm8, %v2747_v20, %v2935_v50  ;;  %v2277_v55 = vpop.f32.mrb[20].mxu0 }
 0x3a0   :  { %v2875_v26 = vmul.f32 30.0, %v2854_v16  ;;  %v2855_v9 = vsel %vm2834_vm7, %v2810_v34, %v2453_v25  ;;  %v5287_v47 = vmul.f32 %v2427_v45, %v2277_v55  ;;  %v2348_v42 = vpop.f32.mrb[20].mxu1  ;;  %v2279_v43 = vpop.f32.mrb[21].mxu0 }
 0x3a1   :  { %v2876_v58 = vmul.f32 30.0, %v2855_v9  ;;  %v5289_v38 = vmul.f32 %v2435_v17, %v2348_v42  ;;  %v5291_v18 = vmul.f32 %v2431_v59, %v2279_v43  ;;  %v3674_v19 = vpop.f32.mrb[21].mxu1 }
 0x3a2   :  { %2896 = vst [vmem:[#allocation7 + $0x80] sm:$0xff] %v2875_v26  ;;  %v2475_v39 = vmul.f32 %v5287_v47, %v5287_v47  ;;  %v2706_v41 = vmul.f32 0.87758255, %v5287_v47  ;;  %v2936_v2 = vadd.f32 -0.23971277, %v5287_v47 }
 0x3a3   :  { %2897 = vst [vmem:[#allocation7 + $0x88] sm:$0xff] %v2876_v58  ;;  %v2477_v10 = vmul.f32 %v5289_v38, %v5289_v38  ;;  %v2476_v54 = vmul.f32 %v5291_v18, %v5291_v18  ;;  %v2708_v12 = vmul.f32 0.87758255, %v5289_v38  ;;  %vm2769_vm1 = vcmp.gt.f32.partialorder %v5287_v47, -0.87758255 }
 0x3a4   :  { %v2496_v48 = vsub.f32 1.0, %v2475_v39  ;;  %v2938_v3 = vadd.f32 -0.23971277, %v5289_v38  ;;  %vm2771_vm2 = vcmp.gt.f32.partialorder %v5289_v38, -0.87758255 }
 0x3a5   :  { %v2498_v1 = vsub.f32 1.0, %v2477_v10  ;;  %v2497_v62 = vsub.f32 1.0, %v2476_v54  ;;  %v2707_v8 = vmul.f32 0.87758255, %v5291_v18  ;;  %v2937_v50 = vadd.f32 -0.23971277, %v5291_v18 }
 0x3a6   :  { %v2517_v52 = vmax.f32 %v2496_v48, 0.0  ;;  %vm2770_vm5 = vcmp.gt.f32.partialorder %v5291_v18, -0.87758255 }
 0x3a7   :  { %v2519_v53 = vmax.f32 %v2498_v1, 0.0  ;;  %v2518_v25 = vmax.f32 %v2497_v62, 0.0 }
 0x3a8   :  { %v2538_v6 = vmin.f32 %v2517_v52, 1.0 }
 0x3a9   :  { %v2540_v13 = vmin.f32 %v2519_v53, 1.0  ;;  %v2539_v4 = vmin.f32 %v2518_v25, 1.0 }
 0x3aa   :  { %4430 = vrsqrt.f32 %v2538_v6  ;;  %vm2669_vm10 = vcmp.eq.f32.partialorder %v2538_v6, inf  ;;  %v2672_v15 = vand.u32 2147483648, %v2538_v6  ;;  %vm2671_vm11 = vcmp.eq.f32.partialorder %v2538_v6, 0.0 }
 0x3ab   :  { %4432 = vrsqrt.f32 %v2540_v13  ;;  %vm2683_vm12 = vcmp.eq.f32.partialorder %v2540_v13, inf  ;;  %v2686_v30 = vand.u32 2147483648, %v2540_v13  ;;  %vm2685_vm13 = vcmp.eq.f32.partialorder %v2540_v13, 0.0 }
 0x3ac   :  { %4434 = vrsqrt.f32 %v2539_v4  ;;  %vm2676_vm15 = vcmp.eq.f32.partialorder %v2539_v4, inf  ;;  %v2679_v57 = vand.u32 2147483648, %v2539_v4  ;;  %vm2678_vm0 = vcmp.eq.f32.partialorder %v2539_v4, 0.0 }
 0x3b4   :  { %v4431_v63 = vpop.eup %4430 }
 0x3b5   :  { %v4433_v27 = vpop.eup %4432  ;;  %v2668_v5 = vmul.f32 %v4431_v63, %v2538_v6 }
 0x3b6   :  { %v2682_v23 = vmul.f32 %v4433_v27, %v2540_v13  ;;  %v4435_v0 = vpop.eup %4434 }
 0x3b7   :  { %v2670_v29 = vsel %vm2669_vm10, %v2538_v6, %v2668_v5  ;;  %v2675_v46 = vmul.f32 %v4435_v0, %v2539_v4 }
 0x3b8   :  { %v2673_v11 = vsel %vm2671_vm11, %v2672_v15, %v2670_v29  ;;  %v2684_v40 = vsel %vm2683_vm12, %v2540_v13, %v2682_v23 }
 0x3b9   :  { %v2727_v49 = vmul.f32 0.47942555, %v2673_v11  ;;  %v2687_v44 = vsel %vm2685_vm13, %v2686_v30, %v2684_v40  ;;  %v2677_v7 = vsel %vm2676_vm15, %v2539_v4, %v2675_v46 }
 0x3ba   :  { %v2729_v61 = vmul.f32 0.47942555, %v2687_v44  ;;  %v2680_v60 = vsel %vm2678_vm0, %v2679_v57, %v2677_v7 }
 0x3bb   :  { %v2748_v36 = vsub.f32 %v2706_v41, %v2727_v49  ;;  %v2728_v32 = vmul.f32 0.47942555, %v2680_v60 }
 0x3bc   :  { %v2750_v51 = vsub.f32 %v2708_v12, %v2729_v61 }
 0x3bd   :  { %v2811_v37 = vsel %vm2769_vm1, %v2748_v36, %v2936_v2  ;;  %v2749_v20 = vsub.f32 %v2707_v8, %v2728_v32 }
 0x3be   :  { %v2856_v21 = vsel %vm2835_vm9, %v2811_v37, %v5287_v47  ;;  %v2813_v22 = vsel %vm2771_vm2, %v2750_v51, %v2938_v3 }
 0x3bf   :  { %v2877_v33 = vmul.f32 30.0, %v2856_v21  ;;  %v2858_v14 = vsel %vm2837_vm14, %v2813_v22, %v5289_v38  ;;  %v2812_v45 = vsel %vm2770_vm5, %v2749_v20, %v2937_v50 }
 0x3c0   :  { %v2879_v31 = vmul.f32 30.0, %v2858_v14  ;;  %v2857_v16 = vsel %vm2836_vm4, %v2812_v45, %v5291_v18 }
 0x3c1   :  { %2898 = vst [vmem:[#allocation7 + $0x90] sm:$0xff] %v2877_v33  ;;  %v2878_v34 = vmul.f32 30.0, %v2857_v16 }
 0x3c2   :  { %2901 = vst.msk [vmem:[#allocation7 + $0xa0] sm:$0xff] %vm2900_vm3, %v2879_v31 }
 0x3c3   :  { %2899 = vst [vmem:[#allocation7 + $0x98] sm:$0xff] %v2878_v34 }
 0x3c4   :  { %4779 = shalt.err (!%p4776_p6)
}
 0x3c5   :  { %s4780_s15 = scalar_lea.hbm %s5336_s3, 2688 }
 0x3c6   :  { %p4781_p7 = scmp.ne.s32.totalorder %s5336_s3, %s4780_s15  ;;  %p4784_p8 = scmp.lt.u32.totalorder %s4780_s15, %s5336_s3 }
 0x3c8   :  { %p4786_p9 = pnand %p4784_p8, %p4781_p7 }
 0x3ca   :  { %4789 = shalt.err (!%p4786_p9)
}
 0x3cb   :  { %2911 = dma.vmem_to_hbm [thread:$0]  %s2909_s11, 2688, %s5336_s3, [#allocation4]  }
 0x3cc   :  { %4794 = dma.done.wait [#allocation4], 2688  }
 0x3cd   :  { %4795 = vsyncadd [#allocation4], 4294964608 }
 0x3ce   :  { %2915 = vsyncpa [#allocation3], 1 }
 0x3cf   :  { %2916 = vsyncpa [#allocation6], 1 }
 0x3d0   :  { %2917 = vsyncpa [#allocation4], 1 }

</bundles_post_ra>
